<compile_context>
chip_gen: v6e
topology: v6e:2x2x1
jax: 0.10.0
libtpu: 0.0.40
codegen_flags: <defaults>
</compile_context>

<pallas_src>
import jax
import jax.numpy as jnp
from jax.experimental import pallas as pl
from jax.experimental.pallas import tpu as pltpu


OUT_PAD = 128  # lane-dense padded width for the fc2 output (real out_dim = 10)


def _round_up(x, m):
    return -(-x // m) * m


def mlp_kernel(x_ref, w1_ref, b1_ref, w2_ref, b2_ref, o_ref):
    # In-kernel bf16 cast of the input tile (VPU; hides under the fc1 MXU work).
    x = x_ref[...].astype(jnp.bfloat16)
    # fc1: (TB, 3072) bf16 @ (3072, 512) bf16 -> f32 accumulator on the MXU.
    h = jnp.dot(x, w1_ref[...], preferred_element_type=jnp.float32)
    # Bias + ReLU in f32 on the VPU.
    h = jnp.maximum(h + b1_ref[...], 0.0)
    # fc2 in bf16 (f32 accumulation): (TB, 512) @ (512, 128) -> (TB, 128).
    o = jnp.dot(h.astype(jnp.bfloat16), w2_ref[...],
                preferred_element_type=jnp.float32)
    o_ref[...] = o + b2_ref[...]


def prepare_params(w1, b1, w2, b2):
    """One-time parameter prep (hoisted out of the per-call forward path):
    W1/W2 cast to bf16, fc2 weight/bias zero-padded to a lane-dense 128 width."""
    hid = w1.shape[1]
    out_dim = w2.shape[1]
    w1_bf = w1.astype(jnp.bfloat16)                     # (3072, 512) bf16
    b1_2d = b1.reshape(1, hid).astype(jnp.float32)      # (1, 512) f32
    w2_p = jnp.zeros((hid, OUT_PAD), jnp.bfloat16).at[:, :out_dim].set(
        w2.astype(jnp.bfloat16))                        # (512, 128) bf16
    b2_p = jnp.zeros((1, OUT_PAD), jnp.float32).at[:, :out_dim].set(b2)
    return w1_bf, b1_2d, w2_p, b2_p, out_dim


def ann_forward(x_nchw, params, *, block_b=512):
    """x_nchw: (B, 3, 32, 32) float32. params: output of prepare_params.
    Returns (B, 10) float32 logits, matching torch Flatten->fc1->ReLU->fc2."""
    w1_bf, b1_2d, w2_p, b2_p, out_dim = params
    B = x_nchw.shape[0]
    in_dim = w1_bf.shape[0]   # 3072
    hid = w1_bf.shape[1]      # 512

    # Flatten like torch.nn.Flatten (row-major over C,H,W); stays f32 — no extra
    # HBM pass (cast happens inside the kernel), no batch padding pass.
    x2d = x_nchw.reshape(B, in_dim)

    # Batch tile: multiple of 16 (bf16 sublane packing), capped at block_b; also
    # capped so the grid has >= 2 tiles when B allows it (both TCs on v7x).
    tb = min(block_b, _round_up(B, 16))
    if B > 16:
        tb = min(tb, max(16, _round_up(pl.cdiv(B, 2), 16)))

    grid = (pl.cdiv(B, tb),)  # ragged last tile: Pallas masks its stores

    out = pl.pallas_call(
        mlp_kernel,
        out_shape=jax.ShapeDtypeStruct((B, OUT_PAD), jnp.float32),
        grid=grid,
        in_specs=[
            pl.BlockSpec((tb, in_dim), lambda i: (i, 0)),      # x: batch-tiled, f32
            pl.BlockSpec((in_dim, hid), lambda i: (0, 0)),     # W1 bf16: VMEM-resident
            pl.BlockSpec((1, hid), lambda i: (0, 0)),          # b1
            pl.BlockSpec((hid, OUT_PAD), lambda i: (0, 0)),    # W2 bf16 (padded)
            pl.BlockSpec((1, OUT_PAD), lambda i: (0, 0)),      # b2 (padded)
        ],
        out_specs=pl.BlockSpec((tb, OUT_PAD), lambda i: (i, 0)),
        compiler_params=pltpu.CompilerParams(
            dimension_semantics=("parallel",),   # shard batch tiles across TCs
            vmem_limit_bytes=48 << 20,           # fits v7x's 64 MiB per-TC VMEM
        ),
    )(x2d, w1_bf, b1_2d, w2_p, b2_p)

    return out[:, :out_dim]


def init_params(key):
    """Deterministic init mirroring torch.nn.Linear defaults: U(-1/sqrt(fan_in), +1/sqrt(fan_in))."""
    in_dim, hid, out_dim = 32 * 32 * 3, 512, 10
    k1, k2, k3, k4 = jax.random.split(key, 4)
    bound1 = 1.0 / jnp.sqrt(in_dim)
    bound2 = 1.0 / jnp.sqrt(hid)
    w1 = jax.random.uniform(k1, (in_dim, hid), jnp.float32, -bound1, bound1)
    b1 = jax.random.uniform(k2, (hid,), jnp.float32, -bound1, bound1)
    w2 = jax.random.uniform(k3, (hid, out_dim), jnp.float32, -bound2, bound2)
    b2 = jax.random.uniform(k4, (out_dim,), jnp.float32, -bound2, bound2)
    return w1, b1, w2, b2


if __name__ == "__main__":
    key = jax.random.PRNGKey(0)
    kx, kp = jax.random.split(key)

    # Small batch; input shape implied by fc1: (B, 3, 32, 32)
    B = 2
    x = jax.random.normal(kx, (B, 3, 32, 32), jnp.float32)
    w1, b1, w2, b2 = init_params(kp)

    params = prepare_params(w1, b1, w2, b2)   # one-time: bf16 cast + lane padding
    out = jax.block_until_ready(ann_forward(x, params))

    # Sanity-check against plain-JAX f32 reference (same math as the PyTorch module).
    # Tolerance relaxed: fc1 and fc2 use bf16 operands (f32 accumulation).
    ref = jnp.maximum(x.reshape(B, -1) @ w1 + b1, 0.0) @ w2 + b2
    assert out.shape == (B, 10)
    assert jnp.allclose(out, ref, atol=3e-2, rtol=3e-2), float(jnp.max(jnp.abs(out - ref)))

    print("KERNEL_OK")
</pallas_src>

<mosaic_0001>
module attributes {stable_mosaic.version = 11 : i64} {
  func.func @mlp_kernel(%arg0: i32, %arg1: memref<16x3072xf32, #tpu.memory_space<vmem>>, %arg2: memref<3072x512xbf16, #tpu.memory_space<vmem>>, %arg3: memref<1x512xf32, #tpu.memory_space<vmem>>, %arg4: memref<512x128xbf16, #tpu.memory_space<vmem>>, %arg5: memref<1x128xf32, #tpu.memory_space<vmem>>, %arg6: memref<16x128xf32, #tpu.memory_space<vmem>>) attributes {dimension_semantics = [#tpu.dimension_semantics<parallel>], iteration_bounds = array<i64: 1>, scalar_prefetch = 0 : i64, scratch_operands = 0 : i64, tpu.core_type = #tpu.core_type<tc>, window_params = [{transform_indices = @transform_0, window_bounds = array<i64: 16, 3072>}, {pipeline_mode = #tpu.pipeline_mode<synchronous>, transform_indices = @transform_1, window_bounds = array<i64: 3072, 512>}, {pipeline_mode = #tpu.pipeline_mode<synchronous>, transform_indices = @transform_2, window_bounds = array<i64: 1, 512>}, {pipeline_mode = #tpu.pipeline_mode<synchronous>, transform_indices = @transform_3, window_bounds = array<i64: 512, 128>}, {pipeline_mode = #tpu.pipeline_mode<synchronous>, transform_indices = @transform_4, window_bounds = array<i64: 1, 128>}, {transform_indices = @transform_5, window_bounds = array<i64: 16, 128>}]} {
    %c0 = arith.constant 0 : index
    %c0_0 = arith.constant 0 : index
    %0 = vector.load %arg1[%c0, %c0_0] : memref<16x3072xf32, #tpu.memory_space<vmem>>, vector<16x3072xf32>
    %1 = arith.truncf %0 : vector<16x3072xf32> to vector<16x3072xbf16>
    %c0_1 = arith.constant 0 : index
    %c0_2 = arith.constant 0 : index
    %2 = vector.load %arg2[%c0_1, %c0_2] : memref<3072x512xbf16, #tpu.memory_space<vmem>>, vector<3072x512xbf16>
    %cst = arith.constant dense<0.000000e+00> : vector<16x512xf32>
    %3 = tpu.matmul %1, %2, %cst {dimension_numbers = #tpu.dot_dimension_numbers<[1], [0], [0], [1], [0, 0, 1, 1], [], []>} : vector<16x3072xbf16>, vector<3072x512xbf16>, vector<16x512xf32> -> vector<16x512xf32>
    %c0_3 = arith.constant 0 : index
    %c0_4 = arith.constant 0 : index
    %4 = vector.load %arg3[%c0_3, %c0_4] : memref<1x512xf32, #tpu.memory_space<vmem>>, vector<1x512xf32>
    %5 = vector.broadcast %4 : vector<1x512xf32> to vector<16x512xf32>
    %6 = arith.addf %3, %5 : vector<16x512xf32>
    %cst_5 = arith.constant 0.000000e+00 : f32
    %7 = vector.broadcast %cst_5 : f32 to vector<16x512xf32>
    %8 = arith.maximumf %6, %7 : vector<16x512xf32>
    %9 = arith.truncf %8 : vector<16x512xf32> to vector<16x512xbf16>
    %c0_6 = arith.constant 0 : index
    %c0_7 = arith.constant 0 : index
    %10 = vector.load %arg4[%c0_6, %c0_7] : memref<512x128xbf16, #tpu.memory_space<vmem>>, vector<512x128xbf16>
    %cst_8 = arith.constant dense<0.000000e+00> : vector<16x128xf32>
    %11 = tpu.matmul %9, %10, %cst_8 {dimension_numbers = #tpu.dot_dimension_numbers<[1], [0], [0], [1], [0, 0, 1, 1], [], []>} : vector<16x512xbf16>, vector<512x128xbf16>, vector<16x128xf32> -> vector<16x128xf32>
    %c0_9 = arith.constant 0 : index
    %c0_10 = arith.constant 0 : index
    %12 = vector.load %arg5[%c0_9, %c0_10] : memref<1x128xf32, #tpu.memory_space<vmem>>, vector<1x128xf32>
    %13 = vector.broadcast %12 : vector<1x128xf32> to vector<16x128xf32>
    %14 = arith.addf %11, %13 : vector<16x128xf32>
    %c0_11 = arith.constant 0 : index
    %c0_12 = arith.constant 0 : index
    %15 = vector.load %arg6[%c0_11, %c0_12] : memref<16x128xf32, #tpu.memory_space<vmem>>, vector<16x128xf32>
    tpu.vector_store %arg6[%c0_11, %c0_12], %14 {strides = array<i32>} : memref<16x128xf32, #tpu.memory_space<vmem>>, vector<16x128xf32>,
    return
  }
  func.func @transform_0(%arg0: i32) -> (i32, i32) {
    %c0_i32 = arith.constant 0 : i32
    %c0_i32_0 = arith.constant 0 : i32
    return %arg0, %c0_i32 : i32, i32
  }
  func.func @transform_1(%arg0: i32) -> (i32, i32) {
    %c0_i32 = arith.constant 0 : i32
    %c0_i32_0 = arith.constant 0 : i32
    %c0_i32_1 = arith.constant 0 : i32
    return %c0_i32, %c0_i32_0 : i32, i32
  }
  func.func @transform_2(%arg0: i32) -> (i32, i32) {
    %c0_i32 = arith.constant 0 : i32
    %c0_i32_0 = arith.constant 0 : i32
    %c0_i32_1 = arith.constant 0 : i32
    return %c0_i32, %c0_i32_0 : i32, i32
  }
  func.func @transform_3(%arg0: i32) -> (i32, i32) {
    %c0_i32 = arith.constant 0 : i32
    %c0_i32_0 = arith.constant 0 : i32
    %c0_i32_1 = arith.constant 0 : i32
    return %c0_i32, %c0_i32_0 : i32, i32
  }
  func.func @transform_4(%arg0: i32) -> (i32, i32) {
    %c0_i32 = arith.constant 0 : i32
    %c0_i32_0 = arith.constant 0 : i32
    %c0_i32_1 = arith.constant 0 : i32
    return %c0_i32, %c0_i32_0 : i32, i32
  }
  func.func @transform_5(%arg0: i32) -> (i32, i32) {
    %c0_i32 = arith.constant 0 : i32
    %c0_i32_0 = arith.constant 0 : i32
    return %arg0, %c0_i32 : i32, i32
  }
}

</mosaic_0001>

<bundles_post_ra>
// kernel: tpu_custom_call.1
= control target key start
LH: loop header
LB: loop body
LE: loop exit
PB: predicated region body
PF: predicated region fallthrough
CT: control target
= control target key end

     0   :  { %10 = vsyncpa [#allocation3], 0  ;;  %s9475_s0 = inlined_call_operand.hbm [shape: f32[2,3072], index: 0, kind: input, shape index: {}]   ;;  %s9476_s1 = inlined_call_operand.hbm [shape: bf16[3072,512], index: 1, kind: input, shape index: {}]   ;;  %s9477_s2 = inlined_call_operand.hbm [shape: f32[1,512], index: 2, kind: input, shape index: {}]   ;;  %s9478_s3 = inlined_call_operand.hbm [shape: bf16[512,128], index: 3, kind: input, shape index: {}]   ;;  %s9479_s4 = inlined_call_operand.hbm [shape: f32[1,128], index: 4, kind: input, shape index: {}]   ;;  %s9480_s5 = inlined_call_operand.hbm [shape: f32[2,128], index: 5, kind: output, shape index: {}]  }
   0x1   :  { %11 = vsyncpa [#allocation6], 0 }
   0x2   :  { %12 = vsyncpa [#allocation9], 0 }
   0x3   :  { %13 = vsyncpa [#allocation4], 0 }
   0x4   :  { %18 = vsyncadd [#allocation3], 5376  ;;  %s8970_s18 = smov [#allocation5]  }
   0x5   :  { %s31_s19 = sshll.u32 %s8970_s18, 4  ;;  %s32_s19 = int_to_ptr.vmem [resolvable:$true] %s31_s19 }
   0x6   :  { %s8850_s20 = scalar_lea.vmem %s32_s19, 98304  ;;  %p8855_p1 = scmp.lt.s32.totalorder %s32_s19, %s32_s19 }
   0x7   :  { %p8851_p0 = scmp.ne.s32.totalorder %s32_s19, %s8850_s20  ;;  %p8856_p2 = scmp.lt.s32.totalorder %s8850_s20, %s8850_s20 }
   0x9   :  { %p8857_p3 = por %p8856_p2, %p8855_p1 }
   0xb   :  { %p8858_p4 = pnand %p8857_p3, %p8851_p0 }
   0xd   :  { %8861 = shalt.err (!%p8858_p4)
}
   0xe   :  { %s8971_s21 = smov 256   ;;  %s8972_s22 = smov 16  }
   0xf   :  { %37 = dma.hbm_to_vmem [thread:$0]  %s9476_s1, 98304, %s32_s19, [#allocation6], %s8971_s21, %s8971_s21, %s8972_s22  }
  0x10   :  { %s8973_s25 = smov [#allocation8]  }
  0x11   :  { %s53_s26 = sshll.u32 %s8973_s25, 4  ;;  %s54_s26 = int_to_ptr.vmem [resolvable:$true] %s53_s26 }
  0x12   :  { %s8870_s27 = scalar_lea.vmem %s54_s26, 4096  ;;  %p8875_p6 = scmp.lt.s32.totalorder %s54_s26, %s54_s26 }
  0x13   :  { %p8871_p5 = scmp.ne.s32.totalorder %s54_s26, %s8870_s27  ;;  %p8876_p7 = scmp.lt.s32.totalorder %s8870_s27, %s8870_s27 }
  0x15   :  { %p8877_p8 = por %p8876_p7, %p8875_p6 }
  0x17   :  { %p8878_p9 = pnand %p8877_p8, %p8871_p5 }
  0x19   :  { %8881 = shalt.err (!%p8878_p9)
}
  0x1a   :  { %s8974_s28 = smov 64   ;;  %s8975_s29 = smov 4  }
  0x1b   :  { %59 = dma.hbm_to_vmem [thread:$0]  %s9478_s3, 4096, %s54_s26, [#allocation9], %s8974_s28, %s8974_s28, %s8975_s29  }
  0x1c   :  { %s8976_s7 = smov [#allocation2]  }
  0x1d   :  { %s19_s8 = sshll.u32 %s8976_s7, 4  ;;  %s20_s8 = int_to_ptr.vmem [resolvable:$true] %s19_s8 }
  0x1e   :  { %s8890_s1 = scalar_lea.vmem %s20_s8, 768  ;;  %s8894_s9 = scalar_lea.vmem %s20_s8, 6144 }
  0x1f   :  { %p8891_p10 = scmp.ne.s32.totalorder %s20_s8, %s8890_s1  ;;  %p8895_p11 = scmp.lt.s32.totalorder %s20_s8, %s20_s8 }
  0x20   :  { %p8896_p12 = scmp.lt.s32.totalorder %s8894_s9, %s8890_s1 }
  0x22   :  { %p8897_p13 = por %p8896_p12, %p8895_p11 }
  0x24   :  { %p8898_p0 = pnand %p8897_p13, %p8891_p10 }
  0x26   :  { %8901 = shalt.err (!%p8898_p0)
}
  0x27   :  { %s8977_s10 = smov 768   ;;  %s8978_s11 = smov 48  }
  0x28   :  { %25 = dma.hbm_to_vmem [thread:$0]  %s9475_s0, 768, %s20_s8, [#allocation3], %s8977_s10, %s8977_s10, %s8978_s11  }
  0x29   :  { %s8979_s14 = smov [#allocation7]   ;;  %s8980_s3 = smov [#allocation10]  }
  0x2a   :  { %s44_s15 = sshll.u32 %s8979_s14, 4  ;;  %s66_s16 = sshll.u32 %s8980_s3, 4  ;;  %s45_s15 = int_to_ptr.vmem [resolvable:$true] %s44_s15  ;;  %s67_s16 = int_to_ptr.vmem [resolvable:$true] %s66_s16 }
  0x2b   :  { %s8910_s17 = scalar_lea.vmem %s45_s15, 64  ;;  %p8915_p2 = scmp.lt.s32.totalorder %s45_s15, %s45_s15 }
  0x2c   :  { %p8911_p1 = scmp.ne.s32.totalorder %s45_s15, %s8910_s17  ;;  %p8916_p3 = scmp.lt.s32.totalorder %s8910_s17, %s8910_s17 }
  0x2e   :  { %p8917_p4 = por %p8916_p3, %p8915_p2 }
  0x30   :  { %p8918_p5 = pnand %p8917_p4, %p8911_p1 }
  0x32   :  { %8921 = shalt.err (!%p8918_p5)
}
  0x33   :  { %47 = dma.hbm_to_vmem [thread:$0]  %s9477_s2, 64, %s45_s15, [#allocation6]  }
  0x34   :  { %s8930_s20 = scalar_lea.vmem %s67_s16, 16  ;;  %s8934_s0 = scalar_lea.vmem %s67_s16, 32 }
  0x35   :  { %p8931_p6 = scmp.ne.s32.totalorder %s67_s16, %s8930_s20  ;;  %p8935_p7 = scmp.lt.s32.totalorder %s67_s16, %s67_s16 }
  0x36   :  { %p8936_p8 = scmp.lt.s32.totalorder %s8934_s0, %s8930_s20 }
  0x38   :  { %p8937_p9 = por %p8936_p8, %p8935_p7 }
  0x3a   :  { %p8938_p10 = pnand %p8937_p9, %p8931_p6 }
  0x3c   :  { %8941 = shalt.err (!%p8938_p10)
}
  0x3d   :  { %69 = dma.hbm_to_vmem [thread:$0]  %s9479_s4, 16, %s67_s16, [#allocation9]  }
  0x3e   :  { %8962 = dma.done.wait [#allocation3], 6144  }
  0x3f   :  { %8963 = vsyncadd [#allocation3], 4294961152 }
  0x40   :  { %8964 = dma.done.wait [#allocation6], 98368  }
  0x41   :  { %8965 = vsyncadd [#allocation6], 4294868928 }
  0x42   :  { %8966 = dma.done.wait [#allocation9], 4112  }
  0x43   :  { %8967 = vsyncadd [#allocation9], 4294963184  ;;  %v7586_v0 = vld [vmem:[#allocation5 + $0xe4] ss:$16 sps:$4 sm:$0xff]   ;;  %v7590_v2 = vld [vmem:[#allocation5 + $0xe0] ss:$16 sps:$4 sm:$0xff]   ;;  %v189_v41 = vlaneseq }
  0x44   :  { %v7588_v1 = vld [vmem:[#allocation5 + $0x2e4] ss:$16 sps:$4 sm:$0xff]   ;;  %5316 = vmatprep.subr.bf16.mxu0 %v7586_v0  ;;  %v7591_v3 = vld [vmem:[#allocation5 + $0x2e0] ss:$16 sps:$4 sm:$0xff]   ;;  %v8981_v39 = vmov 1983009808  }
  0x45   :  { %5359 = vmatprep.subr.bf16.mxu1 %v7588_v1  ;;  %v7592_v4 = vld [vmem:[#allocation5 + $0xc4] ss:$16 sps:$4 sm:$0xff]   ;;  %5317 = vmatpush1.bf16.msra.mxu0 %v7590_v2  ;;  %v7596_v6 = vld [vmem:[#allocation5 + $0xc0] ss:$16 sps:$4 sm:$0xff]   ;;  %v187_v40 = vunpack.c.l.s4 %v8981_v39  ;;  %v9030_v48 = vshrl.u32 %v189_v41, 7 }
  0x46   :  { %5360 = vmatpush1.bf16.msra.mxu1 %v7591_v3  ;;  %v7594_v5 = vld [vmem:[#allocation5 + $0x2c4] ss:$16 sps:$4 sm:$0xff]   ;;  %5318 = vmatprep.subr.bf16.mxu0 %v7592_v4  ;;  %v7597_v7 = vld [vmem:[#allocation5 + $0x2c0] ss:$16 sps:$4 sm:$0xff]  }
  0x47   :  { %5361 = vmatprep.subr.bf16.mxu1 %v7594_v5  ;;  %v7598_v8 = vld [vmem:[#allocation5 + $0xa4] ss:$16 sps:$4 sm:$0xff]   ;;  %v7602_v10 = vld [vmem:[#allocation5 + $0xa0] ss:$16 sps:$4 sm:$0xff]   ;;  %v188_v47 = vunpack.c.0.s8 %v187_v40 }
  0x48   :  { %v7600_v9 = vld [vmem:[#allocation5 + $0x2a4] ss:$16 sps:$4 sm:$0xff]   ;;  %v7603_v11 = vld [vmem:[#allocation5 + $0x2a0] ss:$16 sps:$4 sm:$0xff]  }
  0x49   :  { %5319 = vmatpush1.bf16.msra.mxu0 %v7596_v6  ;;  %v7604_v12 = vld [vmem:[#allocation5 + $0x84] ss:$16 sps:$4 sm:$0xff]   ;;  %v7608_v14 = vld [vmem:[#allocation5 + $0x80] ss:$16 sps:$4 sm:$0xff]   ;;  %v9033_v55 = vsub.s32 %v188_v47, %v9030_v48 }
  0x4a   :  { %5362 = vmatpush1.bf16.msra.mxu1 %v7597_v7  ;;  %5320 = vmatprep.subr.bf16.mxu0 %v7598_v8  ;;  %v7606_v13 = vld [vmem:[#allocation5 + $0x284] ss:$16 sps:$4 sm:$0xff]   ;;  %v7609_v15 = vld [vmem:[#allocation5 + $0x280] ss:$16 sps:$4 sm:$0xff]  }
  0x4b   :  { %5363 = vmatprep.subr.bf16.mxu1 %v7600_v9  ;;  %v7610_v16 = vld [vmem:[#allocation5 + $0x64] ss:$16 sps:$4 sm:$0xff]   ;;  %v7614_v18 = vld [vmem:[#allocation5 + $0x60] ss:$16 sps:$4 sm:$0xff]  }
  0x4c   :  { %v7612_v17 = vld [vmem:[#allocation5 + $0x264] ss:$16 sps:$4 sm:$0xff]   ;;  %v7615_v19 = vld [vmem:[#allocation5 + $0x260] ss:$16 sps:$4 sm:$0xff]  }
  0x4d   :  { %5321 = vmatpush1.bf16.msra.mxu0 %v7602_v10  ;;  %v7616_v20 = vld [vmem:[#allocation5 + $0x44] ss:$16 sps:$4 sm:$0xff]   ;;  %v7620_v22 = vld [vmem:[#allocation5 + $0x40] ss:$16 sps:$4 sm:$0xff]  }
  0x4e   :  { %5364 = vmatpush1.bf16.msra.mxu1 %v7603_v11  ;;  %5322 = vmatprep.subr.bf16.mxu0 %v7604_v12  ;;  %v7618_v21 = vld [vmem:[#allocation5 + $0x244] ss:$16 sps:$4 sm:$0xff]   ;;  %v7621_v23 = vld [vmem:[#allocation5 + $0x240] ss:$16 sps:$4 sm:$0xff]  }
  0x4f   :  { %5365 = vmatprep.subr.bf16.mxu1 %v7606_v13  ;;  %v7622_v24 = vld [vmem:[#allocation5 + $0x24] ss:$16 sps:$4 sm:$0xff]   ;;  %v7626_v26 = vld [vmem:[#allocation5 + $0x20] ss:$16 sps:$4 sm:$0xff]  }
  0x50   :  { %v7624_v25 = vld [vmem:[#allocation5 + $0x224] ss:$16 sps:$4 sm:$0xff]   ;;  %v7627_v27 = vld [vmem:[#allocation5 + $0x220] ss:$16 sps:$4 sm:$0xff]  }
  0x51   :  { %5323 = vmatpush1.bf16.msra.mxu0 %v7608_v14  ;;  %v7628_v28 = vld [vmem:[#allocation5 + $0x4] ss:$16 sps:$4 sm:$0xff]   ;;  %v7632_v30 = vld [vmem:[#allocation5] ss:$16 sps:$4 sm:$0xff]  }
  0x52   :  { %5366 = vmatpush1.bf16.msra.mxu1 %v7609_v15  ;;  %5324 = vmatprep.subr.bf16.mxu0 %v7610_v16  ;;  %v7630_v29 = vld [vmem:[#allocation5 + $0x204] ss:$16 sps:$4 sm:$0xff]   ;;  %v7633_v31 = vld [vmem:[#allocation5 + $0x200] ss:$16 sps:$4 sm:$0xff]  }
  0x53   :  { %5367 = vmatprep.subr.bf16.mxu1 %v7612_v17  ;;  %v7634_v32 = vld [vmem:[#allocation5 + $0x1e4] ss:$16 sps:$4 sm:$0xff]   ;;  %v7638_v34 = vld [vmem:[#allocation5 + $0x1e0] ss:$16 sps:$4 sm:$0xff]  }
  0x54   :  { %v7636_v33 = vld [vmem:[#allocation5 + $0x3e4] ss:$16 sps:$4 sm:$0xff]   ;;  %v7639_v35 = vld [vmem:[#allocation5 + $0x3e0] ss:$16 sps:$4 sm:$0xff]  }
  0x55   :  { %5325 = vmatpush1.bf16.msra.mxu0 %v7614_v18  ;;  %v7640_v36 = vld [vmem:[#allocation5 + $0x1c4] ss:$16 sps:$4 sm:$0xff]   ;;  %v7644_v38 = vld [vmem:[#allocation5 + $0x1c0] ss:$16 sps:$4 sm:$0xff]  }
  0x56   :  { %5368 = vmatpush1.bf16.msra.mxu1 %v7615_v19  ;;  %5326 = vmatprep.subr.bf16.mxu0 %v7616_v20  ;;  %v7642_v37 = vld [vmem:[#allocation5 + $0x3c4] ss:$16 sps:$4 sm:$0xff]   ;;  %v7645_v42 = vld [vmem:[#allocation5 + $0x3c0] ss:$16 sps:$4 sm:$0xff]  }
  0x57   :  { %5369 = vmatprep.subr.bf16.mxu1 %v7618_v21  ;;  %v7646_v43 = vld [vmem:[#allocation5 + $0x1a4] ss:$16 sps:$4 sm:$0xff]   ;;  %v7650_v45 = vld [vmem:[#allocation5 + $0x1a0] ss:$16 sps:$4 sm:$0xff]  }
  0x58   :  { %v7648_v44 = vld [vmem:[#allocation5 + $0x3a4] ss:$16 sps:$4 sm:$0xff]   ;;  %v7651_v46 = vld [vmem:[#allocation5 + $0x3a0] ss:$16 sps:$4 sm:$0xff]  }
  0x59   :  { %5327 = vmatpush1.bf16.msra.mxu0 %v7620_v22  ;;  %v7652_v49 = vld [vmem:[#allocation5 + $0x184] ss:$16 sps:$4 sm:$0xff]   ;;  %v7656_v51 = vld [vmem:[#allocation5 + $0x180] ss:$16 sps:$4 sm:$0xff]  }
  0x5a   :  { %5370 = vmatpush1.bf16.msra.mxu1 %v7621_v23  ;;  %5328 = vmatprep.subr.bf16.mxu0 %v7622_v24  ;;  %v7654_v50 = vld [vmem:[#allocation5 + $0x384] ss:$16 sps:$4 sm:$0xff]   ;;  %v7657_v52 = vld [vmem:[#allocation5 + $0x380] ss:$16 sps:$4 sm:$0xff]  }
  0x5b   :  { %5371 = vmatprep.subr.bf16.mxu1 %v7624_v25  ;;  %v7658_v53 = vld [vmem:[#allocation5 + $0x164] ss:$16 sps:$4 sm:$0xff]   ;;  %v7682_v56 = vld [vmem:[#allocation2] ss:$48 sps:$4 sm:$0xff]  }
  0x5c   :  { %v7660_v54 = vld [vmem:[#allocation5 + $0x364] ss:$16 sps:$4 sm:$0xff]   ;;  %v7684_v57 = vld [vmem:[#allocation2 + $0x60] ss:$48 sps:$4 sm:$0xff]   ;;  %v192_v63 = vrot.slane %v7682_v56, %v9033_v55 }
  0x5d   :  { %5329 = vmatpush1.bf16.msra.mxu0 %v7626_v26  ;;  %v7662_v58 = vld [vmem:[#allocation5 + $0x160] ss:$16 sps:$4 sm:$0xff]   ;;  %v7690_v62 = vld [vmem:[#allocation2 + $0x4] ss:$48 sps:$4 sm:$0xff]   ;;  %v206_v0 = vrot.slane %v7684_v57, %v9033_v55 }
  0x5e   :  { %5372 = vmatpush1.bf16.msra.mxu1 %v7627_v27  ;;  %5330 = vmatprep.subr.bf16.mxu0 %v7628_v28  ;;  %v7663_v59 = vld [vmem:[#allocation5 + $0x360] ss:$16 sps:$4 sm:$0xff]   ;;  %v7691_v1 = vld [vmem:[#allocation2 + $0x64] ss:$48 sps:$4 sm:$0xff]   ;;  %v199_v7 = vrot.slane %v7690_v62, %v9033_v55 }
  0x5f   :  { %5373 = vmatprep.subr.bf16.mxu1 %v7630_v29  ;;  %v7686_v60 = vld [vmem:[#allocation2 + $0xc0] ss:$48 sps:$4 sm:$0xff]   ;;  %v7692_v2 = vld [vmem:[#allocation2 + $0xc4] ss:$48 sps:$4 sm:$0xff]   ;;  %v215_v9 = vcombine.high %v192_v63, %v206_v0  ;;  %v213_v10 = vrot.slane %v7691_v1, %v9033_v55  ;;  %v214_v28 = vcombine.low %v192_v63, %v206_v0 }
  0x60   :  { %v7688_v61 = vld [vmem:[#allocation2 + $0x120] ss:$48 sps:$4 sm:$0xff]   ;;  %v7693_v3 = vld [vmem:[#allocation2 + $0x124] ss:$48 sps:$4 sm:$0xff]   ;;  %v408_v5 = vrot.slane %v7686_v60, %v9033_v55  ;;  %v415_v11 = vrot.slane %v7692_v2, %v9033_v55 }
  0x61   :  { %5331 = vmatpush1.bf16.msra.mxu0 %v7632_v30  ;;  %v7664_v4 = vld [vmem:[#allocation5 + $0x144] ss:$16 sps:$4 sm:$0xff]   ;;  %v422_v6 = vrot.slane %v7688_v61, %v9033_v55  ;;  %v429_v13 = vrot.slane %v7693_v3, %v9033_v55  ;;  %v7668_v14 = vld [vmem:[#allocation5 + $0x140] ss:$16 sps:$4 sm:$0xff]   ;;  %v217_v16 = vcombine.high %v199_v7, %v213_v10  ;;  %v216_v30 = vcombine.low %v199_v7, %v213_v10  ;;  %v7792_v7 = vld [vmem:[#allocation2 + $0x68] ss:$48 sps:$4 sm:$0xff]  }
  0x62   :  { %5374 = vmatpush1.bf16.msra.mxu1 %v7633_v31  ;;  %5332 = vmatprep.subr.bf16.mxu0 %v7634_v32  ;;  %v7666_v8 = vld [vmem:[#allocation5 + $0x344] ss:$16 sps:$4 sm:$0xff]   ;;  %v7669_v15 = vld [vmem:[#allocation5 + $0x340] ss:$16 sps:$4 sm:$0xff]   ;;  %v7794_v10 = vld [vmem:[#allocation2 + $0xc8] ss:$48 sps:$4 sm:$0xff]  }
  0x63   :  { %5375 = vmatprep.subr.bf16.mxu1 %v7636_v33  ;;  %v431_v12 = vcombine.high %v408_v5, %v422_v6  ;;  %v7670_v17 = vld [vmem:[#allocation5 + $0x124] ss:$16 sps:$4 sm:$0xff]   ;;  %v433_v19 = vcombine.high %v415_v11, %v429_v13  ;;  %v7674_v22 = vld [vmem:[#allocation5 + $0x120] ss:$16 sps:$4 sm:$0xff]   ;;  %v430_v29 = vcombine.low %v408_v5, %v422_v6  ;;  %v432_v31 = vcombine.low %v415_v11, %v429_v13  ;;  %v7790_v6 = vld [vmem:[#allocation2 + $0x8] ss:$48 sps:$4 sm:$0xff]  }
  0x64   :  { %v7672_v20 = vld [vmem:[#allocation5 + $0x324] ss:$16 sps:$4 sm:$0xff]   ;;  %v7675_v23 = vld [vmem:[#allocation5 + $0x320] ss:$16 sps:$4 sm:$0xff]   ;;  %v7796_v11 = vld [vmem:[#allocation2 + $0x128] ss:$48 sps:$4 sm:$0xff]   ;;  %v9056_v13 = vrot.slane %v7790_v6, %v9033_v55 }
  0x65   :  { %5333 = vmatpush2.bf16.msra.mxu0 %v7638_v34  ;;  %v9043_v18 = vpack.c.bf16 %v431_v12, %v215_v9  ;;  %v9046_v21 = vpack.c.bf16 %v433_v19, %v217_v16  ;;  %v7676_v24 = vld [vmem:[#allocation5 + $0x104] ss:$16 sps:$4 sm:$0xff]   ;;  %v7680_v26 = vld [vmem:[#allocation5 + $0x100] ss:$16 sps:$4 sm:$0xff]   ;;  %v9049_v34 = vpack.c.bf16 %v430_v29, %v214_v28  ;;  %v7798_v12 = vld [vmem:[#allocation2 + $0xc] ss:$48 sps:$4 sm:$0xff]  }
  0x66   :  { %5376 = vmatpush2.bf16.msra.mxu1 %v7639_v35  ;;  %5334 = vmatprep.subr.bf16.mxu0 %v7640_v36  ;;  %v7678_v25 = vld [vmem:[#allocation5 + $0x304] ss:$16 sps:$4 sm:$0xff]   ;;  %v7681_v27 = vld [vmem:[#allocation5 + $0x300] ss:$16 sps:$4 sm:$0xff]   ;;  %v9051_v35 = vpack.c.bf16 %v432_v31, %v216_v30  ;;  %v7800_v16 = vld [vmem:[#allocation2 + $0xcc] ss:$48 sps:$4 sm:$0xff]  }
  0x67   :  { %5377 = vmatprep.subr.bf16.mxu1 %v7642_v37  ;;  %5348 = vmatprep.mubr.bf16.mxu0 %v9043_v18  ;;  %v7696_v32 = vld [vmem:[#allocation5 + $0x4e4] ss:$16 sps:$4 sm:$0xff]   ;;  %v7694_v36 = vld [vmem:[#allocation5 + $0x4e0] ss:$16 sps:$4 sm:$0xff]  }
  0x68   :  { %5391 = vmatprep.mubr.bf16.mxu1 %v9046_v21  ;;  %v7699_v33 = vld [vmem:[#allocation5 + $0x6e4] ss:$16 sps:$4 sm:$0xff]   ;;  %v7697_v37 = vld [vmem:[#allocation5 + $0x6e0] ss:$16 sps:$4 sm:$0xff]  }
  0x69   :  { %5335 = vmatpush2.bf16.msra.mxu0 %v7644_v38  ;;  %v7702_v38 = vld [vmem:[#allocation5 + $0x4c4] ss:$16 sps:$4 sm:$0xff]   ;;  %v7700_v40 = vld [vmem:[#allocation5 + $0x4c0] ss:$16 sps:$4 sm:$0xff]  }
  0x6a   :  { %5378 = vmatpush2.bf16.msra.mxu1 %v7645_v42  ;;  %5336 = vmatprep.subr.bf16.mxu0 %v7646_v43  ;;  %v7705_v39 = vld [vmem:[#allocation5 + $0x6c4] ss:$16 sps:$4 sm:$0xff]   ;;  %v7703_v41 = vld [vmem:[#allocation5 + $0x6c0] ss:$16 sps:$4 sm:$0xff]  }
  0x6b   :  { %5379 = vmatprep.subr.bf16.mxu1 %v7648_v44  ;;  %v7708_v42 = vld [vmem:[#allocation5 + $0x4a4] ss:$16 sps:$4 sm:$0xff]   ;;  %v7706_v44 = vld [vmem:[#allocation5 + $0x4a0] ss:$16 sps:$4 sm:$0xff]  }
  0x6c   :  { %v7711_v43 = vld [vmem:[#allocation5 + $0x6a4] ss:$16 sps:$4 sm:$0xff]   ;;  %v7730_v62 = vld [vmem:[#allocation5 + $0x420] ss:$16 sps:$4 sm:$0xff]  }
  0x6d   :  { %5337 = vmatpush2.bf16.msra.mxu0 %v7650_v45  ;;  %v7709_v45 = vld [vmem:[#allocation5 + $0x6a0] ss:$16 sps:$4 sm:$0xff]   ;;  %v7717_v47 = vld [vmem:[#allocation5 + $0x684] ss:$16 sps:$4 sm:$0xff]  }
  0x6e   :  { %5380 = vmatpush2.bf16.msra.mxu1 %v7651_v46  ;;  %5338 = vmatprep.subr.bf16.mxu0 %v7652_v49  ;;  %v7714_v46 = vld [vmem:[#allocation5 + $0x484] ss:$16 sps:$4 sm:$0xff]   ;;  %v7712_v49 = vld [vmem:[#allocation5 + $0x480] ss:$16 sps:$4 sm:$0xff]  }
  0x6f   :  { %5381 = vmatprep.subr.bf16.mxu1 %v7654_v50  ;;  %v7715_v50 = vld [vmem:[#allocation5 + $0x680] ss:$16 sps:$4 sm:$0xff]   ;;  %v7726_v56 = vld [vmem:[#allocation5 + $0x444] ss:$16 sps:$4 sm:$0xff]  }
  0x70   :  { %v7729_v57 = vld [vmem:[#allocation5 + $0x644] ss:$16 sps:$4 sm:$0xff]   ;;  %v7733_v63 = vld [vmem:[#allocation5 + $0x620] ss:$16 sps:$4 sm:$0xff]  }
  0x71   :  { %5339 = vmatpush2.bf16.msra.mxu0 %v7656_v51  ;;  %v7720_v51 = vld [vmem:[#allocation5 + $0x464] ss:$16 sps:$4 sm:$0xff]   ;;  %v7736_v2 = vld [vmem:[#allocation5 + $0x400] ss:$16 sps:$4 sm:$0xff]  }
  0x72   :  { %5382 = vmatpush2.bf16.msra.mxu1 %v7657_v52  ;;  %5340 = vmatprep.subr.bf16.mxu0 %v7658_v53  ;;  %v7723_v52 = vld [vmem:[#allocation5 + $0x664] ss:$16 sps:$4 sm:$0xff]   ;;  %v7718_v53 = vld [vmem:[#allocation5 + $0x460] ss:$16 sps:$4 sm:$0xff]  }
  0x73   :  { %5383 = vmatprep.subr.bf16.mxu1 %v7660_v54  ;;  %v7721_v54 = vld [vmem:[#allocation5 + $0x660] ss:$16 sps:$4 sm:$0xff]   ;;  %v7732_v60 = vld [vmem:[#allocation5 + $0x424] ss:$16 sps:$4 sm:$0xff]  }
  0x74   :  { %v7735_v61 = vld [vmem:[#allocation5 + $0x624] ss:$16 sps:$4 sm:$0xff]   ;;  %v7739_v3 = vld [vmem:[#allocation5 + $0x600] ss:$16 sps:$4 sm:$0xff]  }
  0x75   :  { %5341 = vmatpush2.bf16.msra.mxu0 %v7662_v58  ;;  %v7724_v58 = vld [vmem:[#allocation5 + $0x440] ss:$16 sps:$4 sm:$0xff]   ;;  %v7738_v0 = vld [vmem:[#allocation5 + $0x404] ss:$16 sps:$4 sm:$0xff]  }
  0x76   :  { %5384 = vmatpush2.bf16.msra.mxu1 %v7663_v59  ;;  %5342 = vmatprep.subr.bf16.mxu0 %v7664_v4  ;;  %v7727_v59 = vld [vmem:[#allocation5 + $0x640] ss:$16 sps:$4 sm:$0xff]   ;;  %v7741_v1 = vld [vmem:[#allocation5 + $0x604] ss:$16 sps:$4 sm:$0xff]  }
  0x77   :  { %5385 = vmatprep.subr.bf16.mxu1 %v7666_v8  ;;  %v7744_v4 = vld [vmem:[#allocation5 + $0x5e4] ss:$16 sps:$4 sm:$0xff]   ;;  %v7742_v8 = vld [vmem:[#allocation5 + $0x5e0] ss:$16 sps:$4 sm:$0xff]  }
  0x78   :  { %v7747_v5 = vld [vmem:[#allocation5 + $0x7e4] ss:$16 sps:$4 sm:$0xff]   ;;  %v7745_v9 = vld [vmem:[#allocation5 + $0x7e0] ss:$16 sps:$4 sm:$0xff]  }
  0x79   :  { %5343 = vmatpush2.bf16.msra.mxu0 %v7668_v14  ;;  %v9059_v14 = vrot.slane %v7792_v7, %v9033_v55  ;;  %v7750_v19 = vld [vmem:[#allocation5 + $0x5c4] ss:$16 sps:$4 sm:$0xff]   ;;  %v7748_v30 = vld [vmem:[#allocation5 + $0x5c0] ss:$16 sps:$4 sm:$0xff]  }
  0x7a   :  { %5386 = vmatpush2.bf16.msra.mxu1 %v7669_v15  ;;  %5344 = vmatprep.subr.bf16.mxu0 %v7670_v17  ;;  %v7799_v15 = vld [vmem:[#allocation2 + $0x6c] ss:$48 sps:$4 sm:$0xff]   ;;  %v7751_v31 = vld [vmem:[#allocation5 + $0x7c0] ss:$16 sps:$4 sm:$0xff]  }
  0x7b   :  { %5387 = vmatprep.subr.bf16.mxu1 %v7672_v20  ;;  %v7801_v17 = vld [vmem:[#allocation2 + $0x12c] ss:$48 sps:$4 sm:$0xff]   ;;  %v9062_v20 = vrot.slane %v7794_v10, %v9033_v55  ;;  %v7810_v10 = vld [vmem:[#allocation5 + $0x8c4] ss:$16 sps:$4 sm:$0xff]  }
  0x7c   :  { %v9081_v29 = vrot.slane %v7801_v17, %v9033_v55  ;;  %v7817_v17 = vld [vmem:[#allocation5 + $0xaa0] ss:$16 sps:$4 sm:$0xff]  }
  0x7d   :  { %5345 = vmatpush2.bf16.msra.mxu0 %v7674_v22  ;;  %v9065_v22 = vrot.slane %v7796_v11, %v9033_v55  ;;  %v7813_v11 = vld [vmem:[#allocation5 + $0xac4] ss:$16 sps:$4 sm:$0xff]  }
  0x7e   :  { %5388 = vmatpush2.bf16.msra.mxu1 %v7675_v23  ;;  %5346 = vmatprep.subr.bf16.mxu0 %v7676_v24  ;;  %v9068_v23 = vrot.slane %v7798_v12, %v9033_v55  ;;  %v7753_v24 = vld [vmem:[#allocation5 + $0x7c4] ss:$16 sps:$4 sm:$0xff]   ;;  %v7808_v12 = vld [vmem:[#allocation5 + $0x8c0] ss:$16 sps:$4 sm:$0xff]  }
  0x7f   :  { %5389 = vmatprep.subr.bf16.mxu1 %v7678_v25  ;;  %v251_v25 = vcombine.high %v9056_v13, %v9059_v14  ;;  %v467_v28 = vcombine.high %v9062_v20, %v9065_v22 }
  0x81   :  { %5347 = vmatpush2.bf16.msra.mxu0 %v7680_v26  ;;  %v9073_v26 = vrot.slane %v7799_v15, %v9033_v55  ;;  %v7819_v15 = vld [vmem:[#allocation5 + $0xaa4] ss:$16 sps:$4 sm:$0xff]  }
  0x82   :  { %5390 = vmatpush2.bf16.msra.mxu1 %v7681_v27  ;;  %5402 = vmatprep.subr.bf16.mxu0 %v7696_v32  ;;  %v9076_v27 = vrot.slane %v7800_v16, %v9033_v55  ;;  %v7814_v16 = vld [vmem:[#allocation5 + $0x8a0] ss:$16 sps:$4 sm:$0xff]  }
  0x83   :  { %5445 = vmatprep.subr.bf16.mxu1 %v7699_v33  ;;  %v253_v32 = vcombine.high %v9068_v23, %v9073_v26  ;;  %v7756_v33 = vld [vmem:[#allocation5 + $0x5a4] ss:$16 sps:$4 sm:$0xff]  }
  0x84   :  { %5349 = vmatmul.mubr.bf16.vlgmr.msra.gmra.mxu0 %v9049_v34 }
  0x85   :  { %5392 = vmatmul.mubr.bf16.vlgmr.msra.gmra.mxu1 %v9051_v35  ;;  %5403 = vmatpush1.bf16.msra.mxu0 %v7694_v36  ;;  %v9085_v36 = vpack.c.bf16 %v467_v28, %v251_v25  ;;  %v7831_v25 = vld [vmem:[#allocation5 + $0xa64] ss:$16 sps:$4 sm:$0xff]   ;;  %v7826_v28 = vld [vmem:[#allocation5 + $0x860] ss:$16 sps:$4 sm:$0xff]  }
  0x86   :  { %5446 = vmatpush1.bf16.msra.mxu1 %v7697_v37  ;;  %5404 = vmatprep.subr.bf16.mxu0 %v7702_v38  ;;  %v469_v37 = vcombine.high %v9076_v27, %v9081_v29  ;;  %v7759_v38 = vld [vmem:[#allocation5 + $0x7a4] ss:$16 sps:$4 sm:$0xff]  }
  0x87   :  { %5447 = vmatprep.subr.bf16.mxu1 %v7705_v39  ;;  %5434 = vmatprep.mubr.bf16.mxu0 %v9085_v36 }
  0x88   :  { %v9090_v39 = vpack.c.bf16 %v469_v37, %v253_v32  ;;  %v7906_v32 = vld [vmem:[#allocation2 + $0x14] ss:$48 sps:$4 sm:$0xff]  }
  0x89   :  { %5405 = vmatpush1.bf16.msra.mxu0 %v7700_v40  ;;  %v7754_v40 = vld [vmem:[#allocation5 + $0x5a0] ss:$16 sps:$4 sm:$0xff]  }
  0x8a   :  { %5448 = vmatpush1.bf16.msra.mxu1 %v7703_v41  ;;  %5406 = vmatprep.subr.bf16.mxu0 %v7708_v42  ;;  %v7757_v41 = vld [vmem:[#allocation5 + $0x7a0] ss:$16 sps:$4 sm:$0xff]   ;;  %v7762_v42 = vld [vmem:[#allocation5 + $0x584] ss:$16 sps:$4 sm:$0xff]  }
  0x8b   :  { %5449 = vmatprep.subr.bf16.mxu1 %v7711_v43  ;;  %v7765_v43 = vld [vmem:[#allocation5 + $0x784] ss:$16 sps:$4 sm:$0xff]   ;;  %5477 = vmatprep.mubr.bf16.mxu1 %v9090_v39 }
  0x8d   :  { %5407 = vmatpush1.bf16.msra.mxu0 %v7706_v44  ;;  %v7760_v44 = vld [vmem:[#allocation5 + $0x580] ss:$16 sps:$4 sm:$0xff]  }
  0x8e   :  { %5450 = vmatpush1.bf16.msra.mxu1 %v7709_v45  ;;  %5408 = vmatprep.subr.bf16.mxu0 %v7714_v46  ;;  %v7763_v45 = vld [vmem:[#allocation5 + $0x780] ss:$16 sps:$4 sm:$0xff]   ;;  %v7768_v46 = vld [vmem:[#allocation5 + $0x564] ss:$16 sps:$4 sm:$0xff]  }
  0x8f   :  { %5451 = vmatprep.subr.bf16.mxu1 %v7717_v47  ;;  %v7771_v47 = vld [vmem:[#allocation5 + $0x764] ss:$16 sps:$4 sm:$0xff]  }
  0x91   :  { %5409 = vmatpush1.bf16.msra.mxu0 %v7712_v49  ;;  %v7766_v49 = vld [vmem:[#allocation5 + $0x560] ss:$16 sps:$4 sm:$0xff]  }
  0x92   :  { %5452 = vmatpush1.bf16.msra.mxu1 %v7715_v50  ;;  %5410 = vmatprep.subr.bf16.mxu0 %v7720_v51  ;;  %v7769_v50 = vld [vmem:[#allocation5 + $0x760] ss:$16 sps:$4 sm:$0xff]   ;;  %v7774_v51 = vld [vmem:[#allocation5 + $0x544] ss:$16 sps:$4 sm:$0xff]  }
  0x93   :  { %5453 = vmatprep.subr.bf16.mxu1 %v7723_v52  ;;  %v7777_v52 = vld [vmem:[#allocation5 + $0x744] ss:$16 sps:$4 sm:$0xff]  }
  0x95   :  { %5411 = vmatpush1.bf16.msra.mxu0 %v7718_v53  ;;  %v7772_v53 = vld [vmem:[#allocation5 + $0x540] ss:$16 sps:$4 sm:$0xff]  }
  0x96   :  { %5454 = vmatpush1.bf16.msra.mxu1 %v7721_v54  ;;  %5412 = vmatprep.subr.bf16.mxu0 %v7726_v56  ;;  %v7775_v54 = vld [vmem:[#allocation5 + $0x740] ss:$16 sps:$4 sm:$0xff]   ;;  %v7780_v56 = vld [vmem:[#allocation5 + $0x524] ss:$16 sps:$4 sm:$0xff]  }
  0x97   :  { %5455 = vmatprep.subr.bf16.mxu1 %v7729_v57  ;;  %v7783_v57 = vld [vmem:[#allocation5 + $0x724] ss:$16 sps:$4 sm:$0xff]  }
  0x99   :  { %5413 = vmatpush1.bf16.msra.mxu0 %v7724_v58  ;;  %v7778_v58 = vld [vmem:[#allocation5 + $0x520] ss:$16 sps:$4 sm:$0xff]  }
  0x9a   :  { %5456 = vmatpush1.bf16.msra.mxu1 %v7727_v59  ;;  %5414 = vmatprep.subr.bf16.mxu0 %v7732_v60  ;;  %v7781_v59 = vld [vmem:[#allocation5 + $0x720] ss:$16 sps:$4 sm:$0xff]   ;;  %v7786_v60 = vld [vmem:[#allocation5 + $0x504] ss:$16 sps:$4 sm:$0xff]  }
  0x9b   :  { %5457 = vmatprep.subr.bf16.mxu1 %v7735_v61  ;;  %v7789_v61 = vld [vmem:[#allocation5 + $0x704] ss:$16 sps:$4 sm:$0xff]  }
  0x9d   :  { %5415 = vmatpush1.bf16.msra.mxu0 %v7730_v62  ;;  %v7784_v62 = vld [vmem:[#allocation5 + $0x500] ss:$16 sps:$4 sm:$0xff]  }
  0x9e   :  { %5458 = vmatpush1.bf16.msra.mxu1 %v7733_v63  ;;  %5416 = vmatprep.subr.bf16.mxu0 %v7738_v0  ;;  %v7787_v63 = vld [vmem:[#allocation5 + $0x700] ss:$16 sps:$4 sm:$0xff]   ;;  %v250_v0 = vcombine.low %v9056_v13, %v9059_v14  ;;  %v7816_v14 = vld [vmem:[#allocation5 + $0x8a4] ss:$16 sps:$4 sm:$0xff]  }
  0x9f   :  { %5459 = vmatprep.subr.bf16.mxu1 %v7741_v1  ;;  %v466_v1 = vcombine.low %v9062_v20, %v9065_v22  ;;  %v7811_v13 = vld [vmem:[#allocation5 + $0xac0] ss:$16 sps:$4 sm:$0xff]   ;;  %v7825_v20 = vld [vmem:[#allocation5 + $0xa84] ss:$16 sps:$4 sm:$0xff]  }
  0xa0   :  { %v7820_v22 = vld [vmem:[#allocation5 + $0x880] ss:$16 sps:$4 sm:$0xff]  }
  0xa1   :  { %5417 = vmatpush1.bf16.msra.mxu0 %v7736_v2  ;;  %v252_v2 = vcombine.low %v9068_v23, %v9073_v26  ;;  %v9101_v6 = vpack.c.bf16 %v466_v1, %v250_v0  ;;  %v7823_v23 = vld [vmem:[#allocation5 + $0xa80] ss:$16 sps:$4 sm:$0xff]   ;;  %v7846_v0 = vld [vmem:[#allocation5 + $0x804] ss:$16 sps:$4 sm:$0xff]  }
  0xa2   :  { %5460 = vmatpush1.bf16.msra.mxu1 %v7739_v3  ;;  %5418 = vmatprep.subr.bf16.mxu0 %v7744_v4  ;;  %v468_v3 = vcombine.low %v9076_v27, %v9081_v29  ;;  %v7804_v4 = vld [vmem:[#allocation5 + $0x8e4] ss:$16 sps:$4 sm:$0xff]   ;;  %v7898_v26 = vld [vmem:[#allocation2 + $0x10] ss:$48 sps:$4 sm:$0xff]  }
  0xa3   :  { %5461 = vmatprep.subr.bf16.mxu1 %v7747_v5  ;;  %v7807_v5 = vld [vmem:[#allocation5 + $0xae4] ss:$16 sps:$4 sm:$0xff]   ;;  %v7900_v27 = vld [vmem:[#allocation2 + $0x70] ss:$48 sps:$4 sm:$0xff]  }
  0xa4   :  { %v9103_v7 = vpack.c.bf16 %v468_v3, %v252_v2  ;;  %v7829_v29 = vld [vmem:[#allocation5 + $0xa60] ss:$16 sps:$4 sm:$0xff]   ;;  %v9111_v37 = vrot.slane %v7900_v27, %v9033_v55  ;;  %v7849_v1 = vld [vmem:[#allocation5 + $0xa04] ss:$16 sps:$4 sm:$0xff]  }
  0xa5   :  { %5419 = vmatpush2.bf16.msra.mxu0 %v7742_v8  ;;  %v7802_v8 = vld [vmem:[#allocation5 + $0x8e0] ss:$16 sps:$4 sm:$0xff]  }
  0xa6   :  { %5462 = vmatpush2.bf16.msra.mxu1 %v7745_v9  ;;  %5420 = vmatprep.subr.bf16.mxu0 %v7750_v19  ;;  %v7805_v9 = vld [vmem:[#allocation5 + $0xae0] ss:$16 sps:$4 sm:$0xff]   ;;  %v7822_v19 = vld [vmem:[#allocation5 + $0x884] ss:$16 sps:$4 sm:$0xff]  }
  0xa7   :  { %5463 = vmatprep.subr.bf16.mxu1 %v7753_v24  ;;  %v7828_v24 = vld [vmem:[#allocation5 + $0x864] ss:$16 sps:$4 sm:$0xff]   ;;  %v7844_v2 = vld [vmem:[#allocation5 + $0x800] ss:$16 sps:$4 sm:$0xff]  }
  0xa8   :  { %v7847_v3 = vld [vmem:[#allocation5 + $0xa00] ss:$16 sps:$4 sm:$0xff]  }
  0xa9   :  { %5421 = vmatpush2.bf16.msra.mxu0 %v7748_v30  ;;  %v7902_v30 = vld [vmem:[#allocation2 + $0xd0] ss:$48 sps:$4 sm:$0xff]  }
  0xaa   :  { %5464 = vmatpush2.bf16.msra.mxu1 %v7751_v31  ;;  %5422 = vmatprep.subr.bf16.mxu0 %v7756_v33  ;;  %v7904_v31 = vld [vmem:[#allocation2 + $0x130] ss:$48 sps:$4 sm:$0xff]   ;;  %v9108_v33 = vrot.slane %v7898_v26, %v9033_v55 }
  0xab   :  { %5465 = vmatprep.subr.bf16.mxu1 %v7759_v38  ;;  %v7907_v38 = vld [vmem:[#allocation2 + $0x74] ss:$48 sps:$4 sm:$0xff]   ;;  %v7874_v26 = vld [vmem:[#allocation5 + $0x960] ss:$16 sps:$4 sm:$0xff]  }
  0xac   :  { %v7877_v27 = vld [vmem:[#allocation5 + $0xb60] ss:$16 sps:$4 sm:$0xff]  }
  0xad   :  { %5423 = vmatpush2.bf16.msra.mxu0 %v7754_v40  ;;  %v7908_v40 = vld [vmem:[#allocation2 + $0xd4] ss:$48 sps:$4 sm:$0xff]  }
  0xae   :  { %5466 = vmatpush2.bf16.msra.mxu1 %v7757_v41  ;;  %5424 = vmatprep.subr.bf16.mxu0 %v7762_v42  ;;  %v7909_v41 = vld [vmem:[#allocation2 + $0x134] ss:$48 sps:$4 sm:$0xff]  }
  0xaf   :  { %5467 = vmatprep.subr.bf16.mxu1 %v7765_v43  ;;  %v7834_v42 = vld [vmem:[#allocation5 + $0x844] ss:$16 sps:$4 sm:$0xff]   ;;  %v9114_v43 = vrot.slane %v7902_v30, %v9033_v55  ;;  %v7880_v30 = vld [vmem:[#allocation5 + $0x940] ss:$16 sps:$4 sm:$0xff]  }
  0xb1   :  { %5425 = vmatpush2.bf16.msra.mxu0 %v7760_v44  ;;  %v9117_v44 = vrot.slane %v7904_v31, %v9033_v55  ;;  %v7883_v31 = vld [vmem:[#allocation5 + $0xb40] ss:$16 sps:$4 sm:$0xff]  }
  0xb2   :  { %5468 = vmatpush2.bf16.msra.mxu1 %v7763_v45  ;;  %5426 = vmatprep.subr.bf16.mxu0 %v7768_v46  ;;  %v9120_v45 = vrot.slane %v7906_v32, %v9033_v55  ;;  %v7837_v46 = vld [vmem:[#allocation5 + $0xa44] ss:$16 sps:$4 sm:$0xff]  }
  0xb3   :  { %5469 = vmatprep.subr.bf16.mxu1 %v7771_v47  ;;  %v287_v47 = vcombine.high %v9108_v33, %v9111_v37  ;;  %v7888_v32 = vld [vmem:[#allocation5 + $0x924] ss:$16 sps:$4 sm:$0xff]  }
  0xb5   :  { %5427 = vmatpush2.bf16.msra.mxu0 %v7766_v49  ;;  %v9125_v49 = vrot.slane %v7907_v38, %v9033_v55  ;;  %v7891_v38 = vld [vmem:[#allocation5 + $0xb24] ss:$16 sps:$4 sm:$0xff]  }
  0xb6   :  { %5470 = vmatpush2.bf16.msra.mxu1 %v7769_v50  ;;  %5428 = vmatprep.subr.bf16.mxu0 %v7774_v51  ;;  %v9128_v50 = vrot.slane %v7908_v40, %v9033_v55  ;;  %v503_v51 = vcombine.high %v9114_v43, %v9117_v44  ;;  %v7886_v40 = vld [vmem:[#allocation5 + $0x920] ss:$16 sps:$4 sm:$0xff]  }
  0xb7   :  { %5471 = vmatprep.subr.bf16.mxu1 %v7777_v52  ;;  %v9133_v52 = vrot.slane %v7909_v41, %v9033_v55  ;;  %v7889_v41 = vld [vmem:[#allocation5 + $0xb20] ss:$16 sps:$4 sm:$0xff]  }
  0xb9   :  { %5429 = vmatpush2.bf16.msra.mxu0 %v7772_v53  ;;  %v7832_v53 = vld [vmem:[#allocation5 + $0x840] ss:$16 sps:$4 sm:$0xff]  }
  0xba   :  { %5472 = vmatpush2.bf16.msra.mxu1 %v7775_v54  ;;  %5430 = vmatprep.subr.bf16.mxu0 %v7780_v56  ;;  %v7835_v54 = vld [vmem:[#allocation5 + $0xa40] ss:$16 sps:$4 sm:$0xff]   ;;  %v289_v56 = vcombine.high %v9120_v45, %v9125_v49 }
  0xbb   :  { %5473 = vmatprep.subr.bf16.mxu1 %v7783_v57  ;;  %v7840_v57 = vld [vmem:[#allocation5 + $0x824] ss:$16 sps:$4 sm:$0xff]  }
  0xbd   :  { %5431 = vmatpush2.bf16.msra.mxu0 %v7778_v58  ;;  %v9137_v58 = vpack.c.bf16 %v503_v51, %v287_v47  ;;  %v7892_v47 = vld [vmem:[#allocation5 + $0x900] ss:$16 sps:$4 sm:$0xff]  }
  0xbe   :  { %5474 = vmatpush2.bf16.msra.mxu1 %v7781_v59  ;;  %5432 = vmatprep.subr.bf16.mxu0 %v7786_v60  ;;  %v505_v59 = vcombine.high %v9128_v50, %v9133_v52  ;;  %v7843_v60 = vld [vmem:[#allocation5 + $0xa24] ss:$16 sps:$4 sm:$0xff]   ;;  %v7895_v51 = vld [vmem:[#allocation5 + $0xb00] ss:$16 sps:$4 sm:$0xff]  }
  0xbf   :  { %5475 = vmatprep.subr.bf16.mxu1 %v7789_v61 }
  0xc0   :  { %v9142_v61 = vpack.c.bf16 %v505_v59, %v289_v56  ;;  %v288_v56 = vcombine.low %v9120_v45, %v9125_v49  ;;  %v7912_v59 = vld [vmem:[#allocation5 + $0xce4] ss:$16 sps:$4 sm:$0xff]   ;;  %v8015_v49 = vld [vmem:[#allocation2 + $0x7c] ss:$48 sps:$4 sm:$0xff]  }
  0xc1   :  { %5433 = vmatpush2.bf16.msra.mxu0 %v7784_v62  ;;  %v7838_v62 = vld [vmem:[#allocation5 + $0x820] ss:$16 sps:$4 sm:$0xff]  }
  0xc2   :  { %5476 = vmatpush2.bf16.msra.mxu1 %v7787_v63  ;;  %5488 = vmatprep.subr.bf16.mxu0 %v7804_v4  ;;  %v7841_v63 = vld [vmem:[#allocation5 + $0xa20] ss:$16 sps:$4 sm:$0xff]   ;;  %v7852_v4 = vld [vmem:[#allocation5 + $0x9e4] ss:$16 sps:$4 sm:$0xff]  }
  0xc3   :  { %5531 = vmatprep.subr.bf16.mxu1 %v7807_v5  ;;  %v7855_v5 = vld [vmem:[#allocation5 + $0xbe4] ss:$16 sps:$4 sm:$0xff]  }
  0xc4   :  { %5435 = vmatmul.mubr.bf16.vlgmr.msra.gmra.mxu0 %v9101_v6 }
  0xc5   :  { %5478 = vmatmul.mubr.bf16.vlgmr.msra.gmra.mxu1 %v9103_v7  ;;  %5489 = vmatpush1.bf16.msra.mxu0 %v7802_v8  ;;  %v7850_v8 = vld [vmem:[#allocation5 + $0x9e0] ss:$16 sps:$4 sm:$0xff]  }
  0xc6   :  { %5532 = vmatpush1.bf16.msra.mxu1 %v7805_v9  ;;  %5490 = vmatprep.subr.bf16.mxu0 %v7810_v10  ;;  %v7853_v9 = vld [vmem:[#allocation5 + $0xbe0] ss:$16 sps:$4 sm:$0xff]   ;;  %v7858_v10 = vld [vmem:[#allocation5 + $0x9c4] ss:$16 sps:$4 sm:$0xff]  }
  0xc7   :  { %5533 = vmatprep.subr.bf16.mxu1 %v7813_v11  ;;  %5520 = vmatprep.mubr.bf16.mxu0 %v9137_v58  ;;  %v7861_v11 = vld [vmem:[#allocation5 + $0xbc4] ss:$16 sps:$4 sm:$0xff]  }
  0xc8   :  { %5563 = vmatprep.mubr.bf16.mxu1 %v9142_v61 }
  0xc9   :  { %5491 = vmatpush1.bf16.msra.mxu0 %v7808_v12  ;;  %v7856_v12 = vld [vmem:[#allocation5 + $0x9c0] ss:$16 sps:$4 sm:$0xff]  }
  0xca   :  { %5534 = vmatpush1.bf16.msra.mxu1 %v7811_v13  ;;  %5492 = vmatprep.subr.bf16.mxu0 %v7816_v14  ;;  %v7859_v13 = vld [vmem:[#allocation5 + $0xbc0] ss:$16 sps:$4 sm:$0xff]   ;;  %v7864_v14 = vld [vmem:[#allocation5 + $0x9a4] ss:$16 sps:$4 sm:$0xff]  }
  0xcb   :  { %5535 = vmatprep.subr.bf16.mxu1 %v7819_v15  ;;  %v7867_v15 = vld [vmem:[#allocation5 + $0xba4] ss:$16 sps:$4 sm:$0xff]  }
  0xcd   :  { %5493 = vmatpush1.bf16.msra.mxu0 %v7814_v16  ;;  %v7862_v16 = vld [vmem:[#allocation5 + $0x9a0] ss:$16 sps:$4 sm:$0xff]  }
  0xce   :  { %5536 = vmatpush1.bf16.msra.mxu1 %v7817_v17  ;;  %5494 = vmatprep.subr.bf16.mxu0 %v7822_v19  ;;  %v7865_v17 = vld [vmem:[#allocation5 + $0xba0] ss:$16 sps:$4 sm:$0xff]   ;;  %v7870_v19 = vld [vmem:[#allocation5 + $0x984] ss:$16 sps:$4 sm:$0xff]  }
  0xcf   :  { %5537 = vmatprep.subr.bf16.mxu1 %v7825_v20  ;;  %v7873_v20 = vld [vmem:[#allocation5 + $0xb84] ss:$16 sps:$4 sm:$0xff]  }
  0xd1   :  { %5495 = vmatpush1.bf16.msra.mxu0 %v7820_v22  ;;  %v7868_v22 = vld [vmem:[#allocation5 + $0x980] ss:$16 sps:$4 sm:$0xff]  }
  0xd2   :  { %5538 = vmatpush1.bf16.msra.mxu1 %v7823_v23  ;;  %5496 = vmatprep.subr.bf16.mxu0 %v7828_v24  ;;  %v7871_v23 = vld [vmem:[#allocation5 + $0xb80] ss:$16 sps:$4 sm:$0xff]   ;;  %v7876_v24 = vld [vmem:[#allocation5 + $0x964] ss:$16 sps:$4 sm:$0xff]  }
  0xd3   :  { %5539 = vmatprep.subr.bf16.mxu1 %v7831_v25  ;;  %v7879_v25 = vld [vmem:[#allocation5 + $0xb64] ss:$16 sps:$4 sm:$0xff]  }
  0xd5   :  { %5497 = vmatpush1.bf16.msra.mxu0 %v7826_v28  ;;  %v7882_v28 = vld [vmem:[#allocation5 + $0x944] ss:$16 sps:$4 sm:$0xff]  }
  0xd6   :  { %5540 = vmatpush1.bf16.msra.mxu1 %v7829_v29  ;;  %5498 = vmatprep.subr.bf16.mxu0 %v7834_v42  ;;  %v7885_v29 = vld [vmem:[#allocation5 + $0xb44] ss:$16 sps:$4 sm:$0xff]  }
  0xd7   :  { %5541 = vmatprep.subr.bf16.mxu1 %v7837_v46  ;;  %v7894_v42 = vld [vmem:[#allocation5 + $0x904] ss:$16 sps:$4 sm:$0xff]  }
  0xd8   :  { %v7897_v46 = vld [vmem:[#allocation5 + $0xb04] ss:$16 sps:$4 sm:$0xff]  }
  0xd9   :  { %5499 = vmatpush1.bf16.msra.mxu0 %v7832_v53  ;;  %v286_v53 = vcombine.low %v9108_v33, %v9111_v37  ;;  %v8012_v33 = vld [vmem:[#allocation2 + $0x138] ss:$48 sps:$4 sm:$0xff]   ;;  %v8014_v37 = vld [vmem:[#allocation2 + $0x1c] ss:$48 sps:$4 sm:$0xff]  }
  0xda   :  { %5542 = vmatpush1.bf16.msra.mxu1 %v7835_v54  ;;  %5500 = vmatprep.subr.bf16.mxu0 %v7840_v57  ;;  %v502_v54 = vcombine.low %v9114_v43, %v9117_v44  ;;  %v504_v57 = vcombine.low %v9128_v50, %v9133_v52  ;;  %v8016_v50 = vld [vmem:[#allocation2 + $0xdc] ss:$48 sps:$4 sm:$0xff]  }
  0xdb   :  { %5543 = vmatprep.subr.bf16.mxu1 %v7843_v60  ;;  %v7915_v60 = vld [vmem:[#allocation5 + $0xee4] ss:$16 sps:$4 sm:$0xff]   ;;  %v8017_v52 = vld [vmem:[#allocation2 + $0x13c] ss:$48 sps:$4 sm:$0xff]  }
  0xdc   :  { %v9155_v43 = vpack.c.bf16 %v504_v57, %v288_v56  ;;  %v7946_v56 = vld [vmem:[#allocation5 + $0xc20] ss:$16 sps:$4 sm:$0xff]  }
  0xdd   :  { %5501 = vmatpush1.bf16.msra.mxu0 %v7838_v62  ;;  %v8006_v62 = vld [vmem:[#allocation2 + $0x18] ss:$48 sps:$4 sm:$0xff]   ;;  %v7949_v57 = vld [vmem:[#allocation5 + $0xe20] ss:$16 sps:$4 sm:$0xff]  }
  0xde   :  { %5544 = vmatpush1.bf16.msra.mxu1 %v7841_v63  ;;  %5502 = vmatprep.subr.bf16.mxu0 %v7846_v0  ;;  %v8008_v63 = vld [vmem:[#allocation2 + $0x78] ss:$48 sps:$4 sm:$0xff]   ;;  %v7910_v0 = vld [vmem:[#allocation5 + $0xce0] ss:$16 sps:$4 sm:$0xff]   ;;  %v9158_v44 = vrot.slane %v8006_v62, %v9033_v55 }
  0xdf   :  { %5545 = vmatprep.subr.bf16.mxu1 %v7849_v1  ;;  %v8010_v1 = vld [vmem:[#allocation2 + $0xd8] ss:$48 sps:$4 sm:$0xff]   ;;  %v9161_v45 = vrot.slane %v8008_v63, %v9033_v55  ;;  %v7952_v62 = vld [vmem:[#allocation5 + $0xc00] ss:$16 sps:$4 sm:$0xff]  }
  0xe0   :  { %v7955_v63 = vld [vmem:[#allocation5 + $0xe00] ss:$16 sps:$4 sm:$0xff]  }
  0xe1   :  { %5503 = vmatpush1.bf16.msra.mxu0 %v7844_v2  ;;  %v9153_v2 = vpack.c.bf16 %v502_v54, %v286_v53  ;;  %v7948_v53 = vld [vmem:[#allocation5 + $0xc24] ss:$16 sps:$4 sm:$0xff]  }
  0xe2   :  { %5546 = vmatpush1.bf16.msra.mxu1 %v7847_v3  ;;  %5504 = vmatprep.subr.bf16.mxu0 %v7852_v4  ;;  %v7913_v3 = vld [vmem:[#allocation5 + $0xee0] ss:$16 sps:$4 sm:$0xff]   ;;  %v9164_v4 = vrot.slane %v8010_v1, %v9033_v55  ;;  %v7951_v54 = vld [vmem:[#allocation5 + $0xe24] ss:$16 sps:$4 sm:$0xff]  }
  0xe3   :  { %5547 = vmatprep.subr.bf16.mxu1 %v7855_v5  ;;  %v9167_v5 = vrot.slane %v8012_v33, %v9033_v55  ;;  %v7963_v1 = vld [vmem:[#allocation5 + $0xfe4] ss:$16 sps:$4 sm:$0xff]   ;;  %v7958_v33 = vld [vmem:[#allocation5 + $0xde0] ss:$16 sps:$4 sm:$0xff]  }
  0xe5   :  { %5505 = vmatpush2.bf16.msra.mxu0 %v7850_v8  ;;  %v9170_v8 = vrot.slane %v8014_v37, %v9033_v55  ;;  %v7961_v37 = vld [vmem:[#allocation5 + $0xfe0] ss:$16 sps:$4 sm:$0xff]  }
  0xe6   :  { %5548 = vmatpush2.bf16.msra.mxu1 %v7853_v9  ;;  %5506 = vmatprep.subr.bf16.mxu0 %v7858_v10  ;;  %v7918_v9 = vld [vmem:[#allocation5 + $0xcc4] ss:$16 sps:$4 sm:$0xff]  }
  0xe7   :  { %5549 = vmatprep.subr.bf16.mxu1 %v7861_v11  ;;  %v7921_v10 = vld [vmem:[#allocation5 + $0xec4] ss:$16 sps:$4 sm:$0xff]   ;;  %v323_v11 = vcombine.high %v9158_v44, %v9161_v45 }
  0xe9   :  { %5507 = vmatpush2.bf16.msra.mxu0 %v7856_v12  ;;  %v9175_v12 = vrot.slane %v8015_v49, %v9033_v55  ;;  %v7966_v49 = vld [vmem:[#allocation5 + $0xdc4] ss:$16 sps:$4 sm:$0xff]  }
  0xea   :  { %5550 = vmatpush2.bf16.msra.mxu1 %v7859_v13  ;;  %5508 = vmatprep.subr.bf16.mxu0 %v7864_v14  ;;  %v9178_v13 = vrot.slane %v8016_v50, %v9033_v55  ;;  %v539_v14 = vcombine.high %v9164_v4, %v9167_v5  ;;  %v7969_v50 = vld [vmem:[#allocation5 + $0xfc4] ss:$16 sps:$4 sm:$0xff]  }
  0xeb   :  { %5551 = vmatprep.subr.bf16.mxu1 %v7867_v15  ;;  %v9183_v15 = vrot.slane %v8017_v52, %v9033_v55  ;;  %v7964_v52 = vld [vmem:[#allocation5 + $0xdc0] ss:$16 sps:$4 sm:$0xff]  }
  0xed   :  { %5509 = vmatpush2.bf16.msra.mxu0 %v7862_v16  ;;  %v7916_v16 = vld [vmem:[#allocation5 + $0xcc0] ss:$16 sps:$4 sm:$0xff]  }
  0xee   :  { %5552 = vmatpush2.bf16.msra.mxu1 %v7865_v17  ;;  %5510 = vmatprep.subr.bf16.mxu0 %v7870_v19  ;;  %v325_v17 = vcombine.high %v9170_v8, %v9175_v12  ;;  %v7919_v19 = vld [vmem:[#allocation5 + $0xec0] ss:$16 sps:$4 sm:$0xff]  }
  0xef   :  { %5553 = vmatprep.subr.bf16.mxu1 %v7873_v20  ;;  %v9189_v20 = vpack.c.bf16 %v539_v14, %v323_v11  ;;  %v7970_v11 = vld [vmem:[#allocation5 + $0xda0] ss:$16 sps:$4 sm:$0xff]  }
  0xf0   :  { %v7973_v14 = vld [vmem:[#allocation5 + $0xfa0] ss:$16 sps:$4 sm:$0xff]  }
  0xf1   :  { %5511 = vmatpush2.bf16.msra.mxu0 %v7868_v22  ;;  %v541_v22 = vcombine.high %v9178_v13, %v9183_v15 }
  0xf2   :  { %5554 = vmatpush2.bf16.msra.mxu1 %v7871_v23  ;;  %5512 = vmatprep.subr.bf16.mxu0 %v7876_v24  ;;  %v7924_v23 = vld [vmem:[#allocation5 + $0xca4] ss:$16 sps:$4 sm:$0xff]  }
  0xf3   :  { %5555 = vmatprep.subr.bf16.mxu1 %v7879_v25  ;;  %v7927_v24 = vld [vmem:[#allocation5 + $0xea4] ss:$16 sps:$4 sm:$0xff]   ;;  %v9194_v25 = vpack.c.bf16 %v541_v22, %v325_v17  ;;  %v7979_v22 = vld [vmem:[#allocation5 + $0xf80] ss:$16 sps:$4 sm:$0xff]  }
  0xf4   :  { %v7981_v17 = vld [vmem:[#allocation5 + $0xf84] ss:$16 sps:$4 sm:$0xff]  }
  0xf5   :  { %5513 = vmatpush2.bf16.msra.mxu0 %v7874_v26  ;;  %v7922_v26 = vld [vmem:[#allocation5 + $0xca0] ss:$16 sps:$4 sm:$0xff]  }
  0xf6   :  { %5556 = vmatpush2.bf16.msra.mxu1 %v7877_v27  ;;  %5514 = vmatprep.subr.bf16.mxu0 %v7882_v28  ;;  %v7925_v27 = vld [vmem:[#allocation5 + $0xea0] ss:$16 sps:$4 sm:$0xff]   ;;  %v7930_v28 = vld [vmem:[#allocation5 + $0xc84] ss:$16 sps:$4 sm:$0xff]  }
  0xf7   :  { %5557 = vmatprep.subr.bf16.mxu1 %v7885_v29  ;;  %v7933_v29 = vld [vmem:[#allocation5 + $0xe84] ss:$16 sps:$4 sm:$0xff]  }
  0xf9   :  { %5515 = vmatpush2.bf16.msra.mxu0 %v7880_v30  ;;  %v7928_v30 = vld [vmem:[#allocation5 + $0xc80] ss:$16 sps:$4 sm:$0xff]  }
  0xfa   :  { %5558 = vmatpush2.bf16.msra.mxu1 %v7883_v31  ;;  %5516 = vmatprep.subr.bf16.mxu0 %v7888_v32  ;;  %v7931_v31 = vld [vmem:[#allocation5 + $0xe80] ss:$16 sps:$4 sm:$0xff]   ;;  %v7936_v32 = vld [vmem:[#allocation5 + $0xc64] ss:$16 sps:$4 sm:$0xff]  }
  0xfb   :  { %5559 = vmatprep.subr.bf16.mxu1 %v7891_v38  ;;  %v7939_v38 = vld [vmem:[#allocation5 + $0xe64] ss:$16 sps:$4 sm:$0xff]  }
  0xfd   :  { %5517 = vmatpush2.bf16.msra.mxu0 %v7886_v40  ;;  %v7934_v40 = vld [vmem:[#allocation5 + $0xc60] ss:$16 sps:$4 sm:$0xff]  }
  0xfe   :  { %5560 = vmatpush2.bf16.msra.mxu1 %v7889_v41  ;;  %5518 = vmatprep.subr.bf16.mxu0 %v7894_v42  ;;  %v7937_v41 = vld [vmem:[#allocation5 + $0xe60] ss:$16 sps:$4 sm:$0xff]   ;;  %v7942_v42 = vld [vmem:[#allocation5 + $0xc44] ss:$16 sps:$4 sm:$0xff]  }
  0xff   :  { %5561 = vmatprep.subr.bf16.mxu1 %v7897_v46  ;;  %v7945_v46 = vld [vmem:[#allocation5 + $0xe44] ss:$16 sps:$4 sm:$0xff]  }
 0x101   :  { %5519 = vmatpush2.bf16.msra.mxu0 %v7892_v47  ;;  %v7940_v47 = vld [vmem:[#allocation5 + $0xc40] ss:$16 sps:$4 sm:$0xff]  }
 0x102   :  { %5562 = vmatpush2.bf16.msra.mxu1 %v7895_v51  ;;  %5574 = vmatprep.subr.bf16.mxu0 %v7912_v59  ;;  %v7943_v51 = vld [vmem:[#allocation5 + $0xe40] ss:$16 sps:$4 sm:$0xff]   ;;  %v7954_v59 = vld [vmem:[#allocation5 + $0xc04] ss:$16 sps:$4 sm:$0xff]  }
 0x103   :  { %5617 = vmatprep.subr.bf16.mxu1 %v7915_v60  ;;  %v7957_v60 = vld [vmem:[#allocation5 + $0xe04] ss:$16 sps:$4 sm:$0xff]  }
 0x104   :  { %5521 = vmatmul.mubr.bf16.vlgmr.msra.gmra.mxu0 %v9153_v2 }
 0x105   :  { %5564 = vmatmul.mubr.bf16.vlgmr.msra.gmra.mxu1 %v9155_v43  ;;  %5575 = vmatpush1.bf16.msra.mxu0 %v7910_v0  ;;  %v7960_v0 = vld [vmem:[#allocation5 + $0xde4] ss:$16 sps:$4 sm:$0xff]  }
 0x106   :  { %5618 = vmatpush1.bf16.msra.mxu1 %v7913_v3  ;;  %5576 = vmatprep.subr.bf16.mxu0 %v7918_v9  ;;  %v7967_v3 = vld [vmem:[#allocation5 + $0xfc0] ss:$16 sps:$4 sm:$0xff]   ;;  %v7972_v9 = vld [vmem:[#allocation5 + $0xda4] ss:$16 sps:$4 sm:$0xff]  }
 0x107   :  { %5619 = vmatprep.subr.bf16.mxu1 %v7921_v10  ;;  %5606 = vmatprep.mubr.bf16.mxu0 %v9189_v20  ;;  %v7975_v10 = vld [vmem:[#allocation5 + $0xfa4] ss:$16 sps:$4 sm:$0xff]  }
 0x108   :  { %5649 = vmatprep.mubr.bf16.mxu1 %v9194_v25 }
 0x109   :  { %5577 = vmatpush1.bf16.msra.mxu0 %v7916_v16  ;;  %v7978_v16 = vld [vmem:[#allocation5 + $0xd84] ss:$16 sps:$4 sm:$0xff]  }
 0x10a   :  { %5620 = vmatpush1.bf16.msra.mxu1 %v7919_v19  ;;  %5578 = vmatprep.subr.bf16.mxu0 %v7924_v23  ;;  %v7976_v19 = vld [vmem:[#allocation5 + $0xd80] ss:$16 sps:$4 sm:$0xff]   ;;  %v7984_v23 = vld [vmem:[#allocation5 + $0xd64] ss:$16 sps:$4 sm:$0xff]  }
 0x10b   :  { %5621 = vmatprep.subr.bf16.mxu1 %v7927_v24  ;;  %v7987_v24 = vld [vmem:[#allocation5 + $0xf64] ss:$16 sps:$4 sm:$0xff]  }
 0x10d   :  { %5579 = vmatpush1.bf16.msra.mxu0 %v7922_v26  ;;  %v7982_v26 = vld [vmem:[#allocation5 + $0xd60] ss:$16 sps:$4 sm:$0xff]  }
 0x10e   :  { %5622 = vmatpush1.bf16.msra.mxu1 %v7925_v27  ;;  %5580 = vmatprep.subr.bf16.mxu0 %v7930_v28  ;;  %v7985_v27 = vld [vmem:[#allocation5 + $0xf60] ss:$16 sps:$4 sm:$0xff]   ;;  %v7990_v28 = vld [vmem:[#allocation5 + $0xd44] ss:$16 sps:$4 sm:$0xff]  }
 0x10f   :  { %5623 = vmatprep.subr.bf16.mxu1 %v7933_v29  ;;  %v7993_v29 = vld [vmem:[#allocation5 + $0xf44] ss:$16 sps:$4 sm:$0xff]  }
 0x111   :  { %5581 = vmatpush1.bf16.msra.mxu0 %v7928_v30  ;;  %v7988_v30 = vld [vmem:[#allocation5 + $0xd40] ss:$16 sps:$4 sm:$0xff]  }
 0x112   :  { %5624 = vmatpush1.bf16.msra.mxu1 %v7931_v31  ;;  %5582 = vmatprep.subr.bf16.mxu0 %v7936_v32  ;;  %v7991_v31 = vld [vmem:[#allocation5 + $0xf40] ss:$16 sps:$4 sm:$0xff]  }
 0x113   :  { %5625 = vmatprep.subr.bf16.mxu1 %v7939_v38  ;;  %v8114_v32 = vld [vmem:[#allocation2 + $0x20] ss:$48 sps:$4 sm:$0xff]   ;;  %v7996_v38 = vld [vmem:[#allocation5 + $0xd24] ss:$16 sps:$4 sm:$0xff]  }
 0x115   :  { %5583 = vmatpush1.bf16.msra.mxu0 %v7934_v40  ;;  %v7999_v40 = vld [vmem:[#allocation5 + $0xf24] ss:$16 sps:$4 sm:$0xff]  }
 0x116   :  { %5626 = vmatpush1.bf16.msra.mxu1 %v7937_v41  ;;  %5584 = vmatprep.subr.bf16.mxu0 %v7942_v42  ;;  %v8116_v41 = vld [vmem:[#allocation2 + $0x80] ss:$48 sps:$4 sm:$0xff]  }
 0x117   :  { %5627 = vmatprep.subr.bf16.mxu1 %v7945_v46  ;;  %v8118_v42 = vld [vmem:[#allocation2 + $0xe0] ss:$48 sps:$4 sm:$0xff]  }
 0x118   :  { %v8120_v46 = vld [vmem:[#allocation2 + $0x140] ss:$48 sps:$4 sm:$0xff]  }
 0x119   :  { %5585 = vmatpush1.bf16.msra.mxu0 %v7940_v47  ;;  %v8122_v47 = vld [vmem:[#allocation2 + $0x24] ss:$48 sps:$4 sm:$0xff]  }
 0x11a   :  { %5628 = vmatpush1.bf16.msra.mxu1 %v7943_v51  ;;  %5586 = vmatprep.subr.bf16.mxu0 %v7948_v53  ;;  %v8123_v51 = vld [vmem:[#allocation2 + $0x84] ss:$48 sps:$4 sm:$0xff]  }
 0x11b   :  { %5629 = vmatprep.subr.bf16.mxu1 %v7951_v54  ;;  %v8124_v53 = vld [vmem:[#allocation2 + $0xe4] ss:$48 sps:$4 sm:$0xff]  }
 0x11c   :  { %v8125_v54 = vld [vmem:[#allocation2 + $0x144] ss:$48 sps:$4 sm:$0xff]  }
 0x11d   :  { %5587 = vmatpush1.bf16.msra.mxu0 %v7946_v56  ;;  %v7994_v56 = vld [vmem:[#allocation5 + $0xd20] ss:$16 sps:$4 sm:$0xff]  }
 0x11e   :  { %5630 = vmatpush1.bf16.msra.mxu1 %v7949_v57  ;;  %5588 = vmatprep.subr.bf16.mxu0 %v7954_v59  ;;  %v7997_v57 = vld [vmem:[#allocation5 + $0xf20] ss:$16 sps:$4 sm:$0xff]   ;;  %v9198_v59 = vrot.slane %v8114_v32, %v9033_v55  ;;  %v8038_v32 = vld [vmem:[#allocation5 + $0x1084] ss:$16 sps:$4 sm:$0xff]  }
 0x11f   :  { %5631 = vmatprep.subr.bf16.mxu1 %v7957_v60  ;;  %v8002_v60 = vld [vmem:[#allocation5 + $0xd04] ss:$16 sps:$4 sm:$0xff]  }
 0x121   :  { %5589 = vmatpush1.bf16.msra.mxu0 %v7952_v62  ;;  %v8005_v62 = vld [vmem:[#allocation5 + $0xf04] ss:$16 sps:$4 sm:$0xff]  }
 0x122   :  { %5632 = vmatpush1.bf16.msra.mxu1 %v7955_v63  ;;  %5590 = vmatprep.subr.bf16.mxu0 %v7960_v0  ;;  %v9201_v63 = vrot.slane %v8116_v41, %v9033_v55  ;;  %v9204_v0 = vrot.slane %v8118_v42, %v9033_v55  ;;  %v8039_v41 = vld [vmem:[#allocation5 + $0x1280] ss:$16 sps:$4 sm:$0xff]   ;;  %v8044_v42 = vld [vmem:[#allocation5 + $0x1064] ss:$16 sps:$4 sm:$0xff]  }
 0x123   :  { %5633 = vmatprep.subr.bf16.mxu1 %v7963_v1  ;;  %v9207_v1 = vrot.slane %v8120_v46, %v9033_v55  ;;  %v8047_v46 = vld [vmem:[#allocation5 + $0x1264] ss:$16 sps:$4 sm:$0xff]  }
 0x125   :  { %5591 = vmatpush2.bf16.msra.mxu0 %v7958_v33  ;;  %v9210_v33 = vrot.slane %v8122_v47, %v9033_v55  ;;  %v8042_v47 = vld [vmem:[#allocation5 + $0x1060] ss:$16 sps:$4 sm:$0xff]  }
 0x126   :  { %5634 = vmatpush2.bf16.msra.mxu1 %v7961_v37  ;;  %5592 = vmatprep.subr.bf16.mxu0 %v7966_v49  ;;  %v9213_v37 = vrot.slane %v8123_v51, %v9033_v55  ;;  %v9216_v49 = vrot.slane %v8124_v53, %v9033_v55  ;;  %v8045_v51 = vld [vmem:[#allocation5 + $0x1260] ss:$16 sps:$4 sm:$0xff]   ;;  %v8050_v53 = vld [vmem:[#allocation5 + $0x1044] ss:$16 sps:$4 sm:$0xff]  }
 0x127   :  { %5635 = vmatprep.subr.bf16.mxu1 %v7969_v50  ;;  %v9219_v50 = vrot.slane %v8125_v54, %v9033_v55  ;;  %v8053_v54 = vld [vmem:[#allocation5 + $0x1244] ss:$16 sps:$4 sm:$0xff]  }
 0x129   :  { %5593 = vmatpush2.bf16.msra.mxu0 %v7964_v52  ;;  %v8000_v52 = vld [vmem:[#allocation5 + $0xd00] ss:$16 sps:$4 sm:$0xff]  }
 0x12a   :  { %5636 = vmatpush2.bf16.msra.mxu1 %v7967_v3  ;;  %5594 = vmatprep.subr.bf16.mxu0 %v7972_v9  ;;  %v322_v3 = vcombine.low %v9158_v44, %v9161_v45  ;;  %v538_v9 = vcombine.low %v9164_v4, %v9167_v5  ;;  %v575_v44 = vcombine.high %v9204_v0, %v9207_v1 }
 0x12b   :  { %5637 = vmatprep.subr.bf16.mxu1 %v7975_v10  ;;  %v324_v10 = vcombine.low %v9170_v8, %v9175_v12  ;;  %v361_v45 = vcombine.high %v9210_v33, %v9213_v37  ;;  %v577_v4 = vcombine.high %v9216_v49, %v9219_v50  ;;  %v8018_v12 = vld [vmem:[#allocation5 + $0x10e0] ss:$16 sps:$4 sm:$0xff]  }
 0x12c   :  { %v9237_v5 = vpack.c.bf16 %v538_v9, %v322_v3  ;;  %v8057_v3 = vld [vmem:[#allocation5 + $0x1220] ss:$16 sps:$4 sm:$0xff]   ;;  %v8062_v9 = vld [vmem:[#allocation5 + $0x1004] ss:$16 sps:$4 sm:$0xff]  }
 0x12d   :  { %5595 = vmatpush2.bf16.msra.mxu0 %v7970_v11  ;;  %v540_v11 = vcombine.low %v9178_v13, %v9183_v15  ;;  %v8021_v13 = vld [vmem:[#allocation5 + $0x12e0] ss:$16 sps:$4 sm:$0xff]   ;;  %v8026_v15 = vld [vmem:[#allocation5 + $0x10c4] ss:$16 sps:$4 sm:$0xff]  }
 0x12e   :  { %5638 = vmatpush2.bf16.msra.mxu1 %v7973_v14  ;;  %5596 = vmatprep.subr.bf16.mxu0 %v7978_v16  ;;  %v8003_v14 = vld [vmem:[#allocation5 + $0xf00] ss:$16 sps:$4 sm:$0xff]   ;;  %v8020_v16 = vld [vmem:[#allocation5 + $0x10e4] ss:$16 sps:$4 sm:$0xff]  }
 0x12f   :  { %5639 = vmatprep.subr.bf16.mxu1 %v7981_v17  ;;  %v8023_v17 = vld [vmem:[#allocation5 + $0x12e4] ss:$16 sps:$4 sm:$0xff]   ;;  %v9239_v8 = vpack.c.bf16 %v540_v11, %v324_v10  ;;  %v8060_v11 = vld [vmem:[#allocation5 + $0x1000] ss:$16 sps:$4 sm:$0xff]  }
 0x130   :  { %v8065_v10 = vld [vmem:[#allocation5 + $0x1204] ss:$16 sps:$4 sm:$0xff]  }
 0x131   :  { %5597 = vmatpush2.bf16.msra.mxu0 %v7976_v19  ;;  %v359_v19 = vcombine.high %v9198_v59, %v9201_v63 }
 0x132   :  { %5640 = vmatpush2.bf16.msra.mxu1 %v7979_v22  ;;  %5598 = vmatprep.subr.bf16.mxu0 %v7984_v23  ;;  %v8029_v22 = vld [vmem:[#allocation5 + $0x12c4] ss:$16 sps:$4 sm:$0xff]  }
 0x133   :  { %5641 = vmatprep.subr.bf16.mxu1 %v7987_v24  ;;  %v9241_v23 = vpack.c.bf16 %v575_v44, %v359_v19  ;;  %v9243_v24 = vpack.c.bf16 %v577_v4, %v361_v45  ;;  %v8066_v19 = vld [vmem:[#allocation5 + $0x11e0] ss:$16 sps:$4 sm:$0xff]   ;;  %v8074_v45 = vld [vmem:[#allocation5 + $0x11c4] ss:$16 sps:$4 sm:$0xff]  }
 0x134   :  { %v8069_v44 = vld [vmem:[#allocation5 + $0x13e0] ss:$16 sps:$4 sm:$0xff]   ;;  %v8077_v4 = vld [vmem:[#allocation5 + $0x13c4] ss:$16 sps:$4 sm:$0xff]  }
 0x135   :  { %5599 = vmatpush2.bf16.msra.mxu0 %v7982_v26  ;;  %v8024_v26 = vld [vmem:[#allocation5 + $0x10c0] ss:$16 sps:$4 sm:$0xff]  }
 0x136   :  { %5642 = vmatpush2.bf16.msra.mxu1 %v7985_v27  ;;  %5600 = vmatprep.subr.bf16.mxu0 %v7990_v28  ;;  %v8027_v27 = vld [vmem:[#allocation5 + $0x12c0] ss:$16 sps:$4 sm:$0xff]   ;;  %v8032_v28 = vld [vmem:[#allocation5 + $0x10a4] ss:$16 sps:$4 sm:$0xff]  }
 0x137   :  { %5643 = vmatprep.subr.bf16.mxu1 %v7993_v29  ;;  %v8035_v29 = vld [vmem:[#allocation5 + $0x12a4] ss:$16 sps:$4 sm:$0xff]  }
 0x139   :  { %5601 = vmatpush2.bf16.msra.mxu0 %v7988_v30  ;;  %v8030_v30 = vld [vmem:[#allocation5 + $0x10a0] ss:$16 sps:$4 sm:$0xff]  }
 0x13a   :  { %5644 = vmatpush2.bf16.msra.mxu1 %v7991_v31  ;;  %5602 = vmatprep.subr.bf16.mxu0 %v7996_v38  ;;  %v8033_v31 = vld [vmem:[#allocation5 + $0x12a0] ss:$16 sps:$4 sm:$0xff]   ;;  %v8041_v38 = vld [vmem:[#allocation5 + $0x1284] ss:$16 sps:$4 sm:$0xff]  }
 0x13b   :  { %5645 = vmatprep.subr.bf16.mxu1 %v7999_v40  ;;  %v8036_v40 = vld [vmem:[#allocation5 + $0x1080] ss:$16 sps:$4 sm:$0xff]  }
 0x13d   :  { %5603 = vmatpush2.bf16.msra.mxu0 %v7994_v56  ;;  %v8048_v56 = vld [vmem:[#allocation5 + $0x1040] ss:$16 sps:$4 sm:$0xff]  }
 0x13e   :  { %5646 = vmatpush2.bf16.msra.mxu1 %v7997_v57  ;;  %5604 = vmatprep.subr.bf16.mxu0 %v8002_v60  ;;  %v8051_v57 = vld [vmem:[#allocation5 + $0x1240] ss:$16 sps:$4 sm:$0xff]   ;;  %v8056_v60 = vld [vmem:[#allocation5 + $0x1024] ss:$16 sps:$4 sm:$0xff]  }
 0x13f   :  { %5647 = vmatprep.subr.bf16.mxu1 %v8005_v62  ;;  %v8059_v62 = vld [vmem:[#allocation5 + $0x1224] ss:$16 sps:$4 sm:$0xff]  }
 0x141   :  { %5605 = vmatpush2.bf16.msra.mxu0 %v8000_v52  ;;  %v8054_v52 = vld [vmem:[#allocation5 + $0x1020] ss:$16 sps:$4 sm:$0xff]  }
 0x142   :  { %5648 = vmatpush2.bf16.msra.mxu1 %v8003_v14  ;;  %5660 = vmatprep.subr.bf16.mxu0 %v8020_v16  ;;  %v8063_v14 = vld [vmem:[#allocation5 + $0x1200] ss:$16 sps:$4 sm:$0xff]   ;;  %v8068_v16 = vld [vmem:[#allocation5 + $0x11e4] ss:$16 sps:$4 sm:$0xff]  }
 0x143   :  { %5703 = vmatprep.subr.bf16.mxu1 %v8023_v17  ;;  %v8071_v17 = vld [vmem:[#allocation5 + $0x13e4] ss:$16 sps:$4 sm:$0xff]  }
 0x144   :  { %5607 = vmatmul.mubr.bf16.vlgmr.msra.gmra.mxu0 %v9237_v5 }
 0x145   :  { %5650 = vmatmul.mubr.bf16.vlgmr.msra.gmra.mxu1 %v9239_v8  ;;  %5661 = vmatpush1.bf16.msra.mxu0 %v8018_v12  ;;  %v8072_v12 = vld [vmem:[#allocation5 + $0x11c0] ss:$16 sps:$4 sm:$0xff]  }
 0x146   :  { %5704 = vmatpush1.bf16.msra.mxu1 %v8021_v13  ;;  %5662 = vmatprep.subr.bf16.mxu0 %v8026_v15  ;;  %v8075_v13 = vld [vmem:[#allocation5 + $0x13c0] ss:$16 sps:$4 sm:$0xff]   ;;  %v8080_v15 = vld [vmem:[#allocation5 + $0x11a4] ss:$16 sps:$4 sm:$0xff]  }
 0x147   :  { %5705 = vmatprep.subr.bf16.mxu1 %v8029_v22  ;;  %5692 = vmatprep.mubr.bf16.mxu0 %v9241_v23  ;;  %v8083_v22 = vld [vmem:[#allocation5 + $0x13a4] ss:$16 sps:$4 sm:$0xff]  }
 0x148   :  { %5735 = vmatprep.mubr.bf16.mxu1 %v9243_v24 }
 0x149   :  { %5663 = vmatpush1.bf16.msra.mxu0 %v8024_v26  ;;  %v8078_v26 = vld [vmem:[#allocation5 + $0x11a0] ss:$16 sps:$4 sm:$0xff]  }
 0x14a   :  { %5706 = vmatpush1.bf16.msra.mxu1 %v8027_v27  ;;  %5664 = vmatprep.subr.bf16.mxu0 %v8032_v28  ;;  %v8081_v27 = vld [vmem:[#allocation5 + $0x13a0] ss:$16 sps:$4 sm:$0xff]   ;;  %v8086_v28 = vld [vmem:[#allocation5 + $0x1184] ss:$16 sps:$4 sm:$0xff]  }
 0x14b   :  { %5707 = vmatprep.subr.bf16.mxu1 %v8035_v29  ;;  %v8089_v29 = vld [vmem:[#allocation5 + $0x1384] ss:$16 sps:$4 sm:$0xff]  }
 0x14d   :  { %5665 = vmatpush1.bf16.msra.mxu0 %v8030_v30  ;;  %v8084_v30 = vld [vmem:[#allocation5 + $0x1180] ss:$16 sps:$4 sm:$0xff]  }
 0x14e   :  { %5708 = vmatpush1.bf16.msra.mxu1 %v8033_v31  ;;  %5666 = vmatprep.subr.bf16.mxu0 %v8038_v32  ;;  %v8087_v31 = vld [vmem:[#allocation5 + $0x1380] ss:$16 sps:$4 sm:$0xff]   ;;  %v8092_v32 = vld [vmem:[#allocation5 + $0x1164] ss:$16 sps:$4 sm:$0xff]  }
 0x14f   :  { %5709 = vmatprep.subr.bf16.mxu1 %v8041_v38  ;;  %v8095_v38 = vld [vmem:[#allocation5 + $0x1364] ss:$16 sps:$4 sm:$0xff]  }
 0x151   :  { %5667 = vmatpush1.bf16.msra.mxu0 %v8036_v40  ;;  %v8090_v40 = vld [vmem:[#allocation5 + $0x1160] ss:$16 sps:$4 sm:$0xff]  }
 0x152   :  { %5710 = vmatpush1.bf16.msra.mxu1 %v8039_v41  ;;  %5668 = vmatprep.subr.bf16.mxu0 %v8044_v42  ;;  %v8093_v41 = vld [vmem:[#allocation5 + $0x1360] ss:$16 sps:$4 sm:$0xff]   ;;  %v8098_v42 = vld [vmem:[#allocation5 + $0x1144] ss:$16 sps:$4 sm:$0xff]  }
 0x153   :  { %5711 = vmatprep.subr.bf16.mxu1 %v8047_v46  ;;  %v8101_v46 = vld [vmem:[#allocation5 + $0x1344] ss:$16 sps:$4 sm:$0xff]  }
 0x155   :  { %5669 = vmatpush1.bf16.msra.mxu0 %v8042_v47  ;;  %v8096_v47 = vld [vmem:[#allocation5 + $0x1140] ss:$16 sps:$4 sm:$0xff]  }
 0x156   :  { %5712 = vmatpush1.bf16.msra.mxu1 %v8045_v51  ;;  %5670 = vmatprep.subr.bf16.mxu0 %v8050_v53  ;;  %v8099_v51 = vld [vmem:[#allocation5 + $0x1340] ss:$16 sps:$4 sm:$0xff]   ;;  %v8222_v53 = vld [vmem:[#allocation2 + $0x28] ss:$48 sps:$4 sm:$0xff]  }
 0x157   :  { %5713 = vmatprep.subr.bf16.mxu1 %v8053_v54  ;;  %v8104_v54 = vld [vmem:[#allocation5 + $0x1124] ss:$16 sps:$4 sm:$0xff]  }
 0x159   :  { %5671 = vmatpush1.bf16.msra.mxu0 %v8048_v56  ;;  %v8107_v56 = vld [vmem:[#allocation5 + $0x1324] ss:$16 sps:$4 sm:$0xff]  }
 0x15a   :  { %5714 = vmatpush1.bf16.msra.mxu1 %v8051_v57  ;;  %5672 = vmatprep.subr.bf16.mxu0 %v8056_v60  ;;  %v8224_v57 = vld [vmem:[#allocation2 + $0x88] ss:$48 sps:$4 sm:$0xff]  }
 0x15b   :  { %5715 = vmatprep.subr.bf16.mxu1 %v8059_v62  ;;  %v8226_v60 = vld [vmem:[#allocation2 + $0xe8] ss:$48 sps:$4 sm:$0xff]  }
 0x15c   :  { %v8228_v62 = vld [vmem:[#allocation2 + $0x148] ss:$48 sps:$4 sm:$0xff]  }
 0x15d   :  { %5673 = vmatpush1.bf16.msra.mxu0 %v8054_v52  ;;  %v8230_v52 = vld [vmem:[#allocation2 + $0x2c] ss:$48 sps:$4 sm:$0xff]  }
 0x15e   :  { %5716 = vmatpush1.bf16.msra.mxu1 %v8057_v3  ;;  %5674 = vmatprep.subr.bf16.mxu0 %v8062_v9  ;;  %v8231_v3 = vld [vmem:[#allocation2 + $0x8c] ss:$48 sps:$4 sm:$0xff]  }
 0x15f   :  { %5717 = vmatprep.subr.bf16.mxu1 %v8065_v10  ;;  %v8232_v9 = vld [vmem:[#allocation2 + $0xec] ss:$48 sps:$4 sm:$0xff]  }
 0x160   :  { %v8233_v10 = vld [vmem:[#allocation2 + $0x14c] ss:$48 sps:$4 sm:$0xff]  }
 0x161   :  { %5675 = vmatpush1.bf16.msra.mxu0 %v8060_v11  ;;  %v8102_v11 = vld [vmem:[#allocation5 + $0x1120] ss:$16 sps:$4 sm:$0xff]  }
 0x162   :  { %5718 = vmatpush1.bf16.msra.mxu1 %v8063_v14  ;;  %5676 = vmatprep.subr.bf16.mxu0 %v8068_v16  ;;  %v8105_v14 = vld [vmem:[#allocation5 + $0x1320] ss:$16 sps:$4 sm:$0xff]   ;;  %v9250_v16 = vrot.slane %v8222_v53, %v9033_v55  ;;  %v8143_v53 = vld [vmem:[#allocation5 + $0x16a4] ss:$16 sps:$4 sm:$0xff]  }
 0x163   :  { %5719 = vmatprep.subr.bf16.mxu1 %v8071_v17  ;;  %v8110_v17 = vld [vmem:[#allocation5 + $0x1104] ss:$16 sps:$4 sm:$0xff]  }
 0x165   :  { %5677 = vmatpush2.bf16.msra.mxu0 %v8066_v19  ;;  %v8113_v19 = vld [vmem:[#allocation5 + $0x1304] ss:$16 sps:$4 sm:$0xff]  }
 0x166   :  { %5720 = vmatpush2.bf16.msra.mxu1 %v8069_v44  ;;  %5678 = vmatprep.subr.bf16.mxu0 %v8074_v45  ;;  %v9253_v44 = vrot.slane %v8224_v57, %v9033_v55  ;;  %v9256_v45 = vrot.slane %v8226_v60, %v9033_v55  ;;  %v8146_v57 = vld [vmem:[#allocation5 + $0x1484] ss:$16 sps:$4 sm:$0xff]  }
 0x167   :  { %5721 = vmatprep.subr.bf16.mxu1 %v8077_v4  ;;  %v9259_v4 = vrot.slane %v8228_v62, %v9033_v55  ;;  %v8149_v60 = vld [vmem:[#allocation5 + $0x1684] ss:$16 sps:$4 sm:$0xff]   ;;  %v8144_v62 = vld [vmem:[#allocation5 + $0x1480] ss:$16 sps:$4 sm:$0xff]  }
 0x169   :  { %5679 = vmatpush2.bf16.msra.mxu0 %v8072_v12  ;;  %v9262_v12 = vrot.slane %v8230_v52, %v9033_v55  ;;  %v8147_v52 = vld [vmem:[#allocation5 + $0x1680] ss:$16 sps:$4 sm:$0xff]  }
 0x16a   :  { %5722 = vmatpush2.bf16.msra.mxu1 %v8075_v13  ;;  %5680 = vmatprep.subr.bf16.mxu0 %v8080_v15  ;;  %v9265_v13 = vrot.slane %v8231_v3, %v9033_v55  ;;  %v9268_v15 = vrot.slane %v8232_v9, %v9033_v55  ;;  %v8152_v3 = vld [vmem:[#allocation5 + $0x1464] ss:$16 sps:$4 sm:$0xff]  }
 0x16b   :  { %5723 = vmatprep.subr.bf16.mxu1 %v8083_v22  ;;  %v9271_v22 = vrot.slane %v8233_v10, %v9033_v55  ;;  %v8128_v55 = vld [vmem:[#allocation5 + $0x14e4] ss:$16 sps:$4 sm:$0xff]   ;;  %v8150_v10 = vld [vmem:[#allocation5 + $0x1460] ss:$16 sps:$4 sm:$0xff]  }
 0x16c   :  { %v8155_v9 = vld [vmem:[#allocation5 + $0x1664] ss:$16 sps:$4 sm:$0xff]  }
 0x16d   :  { %5681 = vmatpush2.bf16.msra.mxu0 %v8078_v26  ;;  %v8108_v26 = vld [vmem:[#allocation5 + $0x1100] ss:$16 sps:$4 sm:$0xff]  }
 0x16e   :  { %5724 = vmatpush2.bf16.msra.mxu1 %v8081_v27  ;;  %5682 = vmatprep.subr.bf16.mxu0 %v8086_v28  ;;  %v358_v27 = vcombine.low %v9198_v59, %v9201_v63  ;;  %v574_v28 = vcombine.low %v9204_v0, %v9207_v1  ;;  %v611_v59 = vcombine.high %v9256_v45, %v9259_v4 }
 0x16f   :  { %5725 = vmatprep.subr.bf16.mxu1 %v8089_v29  ;;  %v360_v29 = vcombine.low %v9210_v33, %v9213_v37  ;;  %v397_v63 = vcombine.high %v9262_v12, %v9265_v13  ;;  %v613_v0 = vcombine.high %v9268_v15, %v9271_v22  ;;  %v8126_v37 = vld [vmem:[#allocation5 + $0x14e0] ss:$16 sps:$4 sm:$0xff]  }
 0x170   :  { %v9289_v1 = vpack.c.bf16 %v574_v28, %v358_v27  ;;  %v8164_v27 = vld [vmem:[#allocation5 + $0x1424] ss:$16 sps:$4 sm:$0xff]  }
 0x171   :  { %5683 = vmatpush2.bf16.msra.mxu0 %v8084_v30  ;;  %v576_v30 = vcombine.low %v9216_v49, %v9219_v50  ;;  %v8129_v49 = vld [vmem:[#allocation5 + $0x16e0] ss:$16 sps:$4 sm:$0xff]   ;;  %v8134_v50 = vld [vmem:[#allocation5 + $0x14c4] ss:$16 sps:$4 sm:$0xff]  }
 0x172   :  { %5726 = vmatpush2.bf16.msra.mxu1 %v8087_v31  ;;  %5684 = vmatprep.subr.bf16.mxu0 %v8092_v32  ;;  %v8111_v31 = vld [vmem:[#allocation5 + $0x1300] ss:$16 sps:$4 sm:$0xff]   ;;  %v8131_v32 = vld [vmem:[#allocation5 + $0x16e4] ss:$16 sps:$4 sm:$0xff]  }
 0x173   :  { %5727 = vmatprep.subr.bf16.mxu1 %v8095_v38  ;;  %v395_v38 = vcombine.high %v9250_v16, %v9253_v44  ;;  %v9291_v33 = vpack.c.bf16 %v576_v30, %v360_v29  ;;  %v8167_v28 = vld [vmem:[#allocation5 + $0x1624] ss:$16 sps:$4 sm:$0xff]   ;;  %v8162_v29 = vld [vmem:[#allocation5 + $0x1420] ss:$16 sps:$4 sm:$0xff]  }
 0x174   :  { %v8165_v30 = vld [vmem:[#allocation5 + $0x1620] ss:$16 sps:$4 sm:$0xff]  }
 0x175   :  { %5685 = vmatpush2.bf16.msra.mxu0 %v8090_v40  ;;  %v8137_v40 = vld [vmem:[#allocation5 + $0x16c4] ss:$16 sps:$4 sm:$0xff]  }
 0x176   :  { %5728 = vmatpush2.bf16.msra.mxu1 %v8093_v41  ;;  %5686 = vmatprep.subr.bf16.mxu0 %v8098_v42  ;;  %v9293_v41 = vpack.c.bf16 %v611_v59, %v395_v38  ;;  %v9295_v42 = vpack.c.bf16 %v613_v0, %v397_v63  ;;  %v8171_v38 = vld [vmem:[#allocation5 + $0x1600] ss:$16 sps:$4 sm:$0xff]   ;;  %v8176_v59 = vld [vmem:[#allocation5 + $0x15e4] ss:$16 sps:$4 sm:$0xff]  }
 0x177   :  { %5729 = vmatprep.subr.bf16.mxu1 %v8101_v46  ;;  %v8132_v46 = vld [vmem:[#allocation5 + $0x14c0] ss:$16 sps:$4 sm:$0xff]   ;;  %v8179_v63 = vld [vmem:[#allocation5 + $0x17e4] ss:$16 sps:$4 sm:$0xff]  }
 0x178   :  { %v8174_v0 = vld [vmem:[#allocation5 + $0x15e0] ss:$16 sps:$4 sm:$0xff]  }
 0x179   :  { %5687 = vmatpush2.bf16.msra.mxu0 %v8096_v47  ;;  %v8135_v47 = vld [vmem:[#allocation5 + $0x16c0] ss:$16 sps:$4 sm:$0xff]  }
 0x17a   :  { %5730 = vmatpush2.bf16.msra.mxu1 %v8099_v51  ;;  %5688 = vmatprep.subr.bf16.mxu0 %v8104_v54  ;;  %v8140_v51 = vld [vmem:[#allocation5 + $0x14a4] ss:$16 sps:$4 sm:$0xff]   ;;  %v8138_v54 = vld [vmem:[#allocation5 + $0x14a0] ss:$16 sps:$4 sm:$0xff]  }
 0x17b   :  { %5731 = vmatprep.subr.bf16.mxu1 %v8107_v56  ;;  %v8141_v56 = vld [vmem:[#allocation5 + $0x16a0] ss:$16 sps:$4 sm:$0xff]  }
 0x17d   :  { %5689 = vmatpush2.bf16.msra.mxu0 %v8102_v11  ;;  %v8153_v11 = vld [vmem:[#allocation5 + $0x1660] ss:$16 sps:$4 sm:$0xff]  }
 0x17e   :  { %5732 = vmatpush2.bf16.msra.mxu1 %v8105_v14  ;;  %5690 = vmatprep.subr.bf16.mxu0 %v8110_v17  ;;  %v8158_v14 = vld [vmem:[#allocation5 + $0x1444] ss:$16 sps:$4 sm:$0xff]  }
 0x17f   :  { %5733 = vmatprep.subr.bf16.mxu1 %v8113_v19  ;;  %v8161_v17 = vld [vmem:[#allocation5 + $0x1644] ss:$16 sps:$4 sm:$0xff]   ;;  %v8156_v19 = vld [vmem:[#allocation5 + $0x1440] ss:$16 sps:$4 sm:$0xff]  }
 0x181   :  { %5691 = vmatpush2.bf16.msra.mxu0 %v8108_v26  ;;  %v8159_v26 = vld [vmem:[#allocation5 + $0x1640] ss:$16 sps:$4 sm:$0xff]  }
 0x182   :  { %5734 = vmatpush2.bf16.msra.mxu1 %v8111_v31  ;;  %5746 = vmatprep.subr.bf16.mxu0 %v8128_v55  ;;  %v8170_v31 = vld [vmem:[#allocation5 + $0x1404] ss:$16 sps:$4 sm:$0xff]  }
 0x183   :  { %5789 = vmatprep.subr.bf16.mxu1 %v8131_v32  ;;  %v8173_v55 = vld [vmem:[#allocation5 + $0x1604] ss:$16 sps:$4 sm:$0xff]   ;;  %v8168_v32 = vld [vmem:[#allocation5 + $0x1400] ss:$16 sps:$4 sm:$0xff]  }
 0x184   :  { %5693 = vmatmul.mubr.bf16.vlgmr.msra.gmra.mxu0 %v9289_v1 }
 0x185   :  { %5736 = vmatmul.mubr.bf16.vlgmr.msra.gmra.mxu1 %v9291_v33  ;;  %5747 = vmatpush1.bf16.msra.mxu0 %v8126_v37  ;;  %v8177_v37 = vld [vmem:[#allocation5 + $0x17e0] ss:$16 sps:$4 sm:$0xff]  }
 0x186   :  { %5790 = vmatpush1.bf16.msra.mxu1 %v8129_v49  ;;  %5748 = vmatprep.subr.bf16.mxu0 %v8134_v50  ;;  %v8182_v49 = vld [vmem:[#allocation5 + $0x15c4] ss:$16 sps:$4 sm:$0xff]  }
 0x187   :  { %5791 = vmatprep.subr.bf16.mxu1 %v8137_v40  ;;  %5778 = vmatprep.mubr.bf16.mxu0 %v9293_v41  ;;  %v8185_v50 = vld [vmem:[#allocation5 + $0x17c4] ss:$16 sps:$4 sm:$0xff]   ;;  %v8180_v40 = vld [vmem:[#allocation5 + $0x15c0] ss:$16 sps:$4 sm:$0xff]  }
 0x188   :  { %5821 = vmatprep.mubr.bf16.mxu1 %v9295_v42 }
 0x189   :  { %5749 = vmatpush1.bf16.msra.mxu0 %v8132_v46  ;;  %v8183_v46 = vld [vmem:[#allocation5 + $0x17c0] ss:$16 sps:$4 sm:$0xff]  }
 0x18a   :  { %5792 = vmatpush1.bf16.msra.mxu1 %v8135_v47  ;;  %5750 = vmatprep.subr.bf16.mxu0 %v8140_v51  ;;  %v8188_v47 = vld [vmem:[#allocation5 + $0x15a4] ss:$16 sps:$4 sm:$0xff]  }
 0x18b   :  { %5793 = vmatprep.subr.bf16.mxu1 %v8143_v53  ;;  %v8191_v51 = vld [vmem:[#allocation5 + $0x17a4] ss:$16 sps:$4 sm:$0xff]   ;;  %v8186_v53 = vld [vmem:[#allocation5 + $0x15a0] ss:$16 sps:$4 sm:$0xff]  }
 0x18d   :  { %5751 = vmatpush1.bf16.msra.mxu0 %v8138_v54  ;;  %v8189_v54 = vld [vmem:[#allocation5 + $0x17a0] ss:$16 sps:$4 sm:$0xff]  }
 0x18e   :  { %5794 = vmatpush1.bf16.msra.mxu1 %v8141_v56  ;;  %5752 = vmatprep.subr.bf16.mxu0 %v8146_v57  ;;  %v8194_v56 = vld [vmem:[#allocation5 + $0x1584] ss:$16 sps:$4 sm:$0xff]  }
 0x18f   :  { %5795 = vmatprep.subr.bf16.mxu1 %v8149_v60  ;;  %v8197_v57 = vld [vmem:[#allocation5 + $0x1784] ss:$16 sps:$4 sm:$0xff]   ;;  %v8192_v60 = vld [vmem:[#allocation5 + $0x1580] ss:$16 sps:$4 sm:$0xff]  }
 0x191   :  { %5753 = vmatpush1.bf16.msra.mxu0 %v8144_v62  ;;  %v8195_v62 = vld [vmem:[#allocation5 + $0x1780] ss:$16 sps:$4 sm:$0xff]  }
 0x192   :  { %5796 = vmatpush1.bf16.msra.mxu1 %v8147_v52  ;;  %5754 = vmatprep.subr.bf16.mxu0 %v8152_v3  ;;  %v8200_v52 = vld [vmem:[#allocation5 + $0x1564] ss:$16 sps:$4 sm:$0xff]  }
 0x193   :  { %5797 = vmatprep.subr.bf16.mxu1 %v8155_v9  ;;  %v8203_v3 = vld [vmem:[#allocation5 + $0x1764] ss:$16 sps:$4 sm:$0xff]   ;;  %v8198_v9 = vld [vmem:[#allocation5 + $0x1560] ss:$16 sps:$4 sm:$0xff]  }
 0x195   :  { %5755 = vmatpush1.bf16.msra.mxu0 %v8150_v10  ;;  %v8201_v10 = vld [vmem:[#allocation5 + $0x1760] ss:$16 sps:$4 sm:$0xff]  }
 0x196   :  { %5798 = vmatpush1.bf16.msra.mxu1 %v8153_v11  ;;  %5756 = vmatprep.subr.bf16.mxu0 %v8158_v14  ;;  %v8206_v11 = vld [vmem:[#allocation5 + $0x1544] ss:$16 sps:$4 sm:$0xff]  }
 0x197   :  { %5799 = vmatprep.subr.bf16.mxu1 %v8161_v17  ;;  %v8209_v14 = vld [vmem:[#allocation5 + $0x1744] ss:$16 sps:$4 sm:$0xff]   ;;  %v8204_v17 = vld [vmem:[#allocation5 + $0x1540] ss:$16 sps:$4 sm:$0xff]  }
 0x199   :  { %5757 = vmatpush1.bf16.msra.mxu0 %v8156_v19  ;;  %v8207_v19 = vld [vmem:[#allocation5 + $0x1740] ss:$16 sps:$4 sm:$0xff]  }
 0x19a   :  { %5800 = vmatpush1.bf16.msra.mxu1 %v8159_v26  ;;  %5758 = vmatprep.subr.bf16.mxu0 %v8164_v27  ;;  %v8212_v26 = vld [vmem:[#allocation5 + $0x1524] ss:$16 sps:$4 sm:$0xff]  }
 0x19b   :  { %5801 = vmatprep.subr.bf16.mxu1 %v8167_v28  ;;  %v8215_v27 = vld [vmem:[#allocation5 + $0x1724] ss:$16 sps:$4 sm:$0xff]   ;;  %v8210_v28 = vld [vmem:[#allocation5 + $0x1520] ss:$16 sps:$4 sm:$0xff]  }
 0x19d   :  { %5759 = vmatpush1.bf16.msra.mxu0 %v8162_v29  ;;  %v8213_v29 = vld [vmem:[#allocation5 + $0x1720] ss:$16 sps:$4 sm:$0xff]  }
 0x19e   :  { %5802 = vmatpush1.bf16.msra.mxu1 %v8165_v30  ;;  %5760 = vmatprep.subr.bf16.mxu0 %v8170_v31  ;;  %v8218_v30 = vld [vmem:[#allocation5 + $0x1504] ss:$16 sps:$4 sm:$0xff]  }
 0x19f   :  { %5803 = vmatprep.subr.bf16.mxu1 %v8173_v55  ;;  %v8221_v31 = vld [vmem:[#allocation5 + $0x1704] ss:$16 sps:$4 sm:$0xff]   ;;  %v394_v55 = vcombine.low %v9250_v16, %v9253_v44 }
 0x1a1   :  { %5761 = vmatpush1.bf16.msra.mxu0 %v8168_v32  ;;  %v610_v32 = vcombine.low %v9256_v45, %v9259_v4  ;;  %v8242_v45 = vld [vmem:[#allocation5 + $0xcc] ss:$16 sps:$4 sm:$0xff]  }
 0x1a2   :  { %5804 = vmatpush1.bf16.msra.mxu1 %v8171_v38  ;;  %5762 = vmatprep.subr.bf16.mxu0 %v8176_v59  ;;  %v396_v38 = vcombine.low %v9262_v12, %v9265_v13  ;;  %v612_v59 = vcombine.low %v9268_v15, %v9271_v22  ;;  %v8245_v4 = vld [vmem:[#allocation5 + $0x2cc] ss:$16 sps:$4 sm:$0xff]   ;;  %v8240_v12 = vld [vmem:[#allocation5 + $0xc8] ss:$16 sps:$4 sm:$0xff]  }
 0x1a3   :  { %5805 = vmatprep.subr.bf16.mxu1 %v8179_v63  ;;  %v8216_v63 = vld [vmem:[#allocation5 + $0x1500] ss:$16 sps:$4 sm:$0xff]   ;;  %v9309_v16 = vpack.c.bf16 %v610_v32, %v394_v55  ;;  %v8243_v13 = vld [vmem:[#allocation5 + $0x2c8] ss:$16 sps:$4 sm:$0xff]   ;;  %v8248_v15 = vld [vmem:[#allocation5 + $0xac] ss:$16 sps:$4 sm:$0xff]  }
 0x1a4   :  { %v9311_v44 = vpack.c.bf16 %v612_v59, %v396_v38  ;;  %v8251_v22 = vld [vmem:[#allocation5 + $0x2ac] ss:$16 sps:$4 sm:$0xff]   ;;  %v8285_v55 = vld [vmem:[#allocation5 + $0x3e8] ss:$16 sps:$4 sm:$0xff]  }
 0x1a5   :  { %5763 = vmatpush2.bf16.msra.mxu0 %v8174_v0  ;;  %v8219_v0 = vld [vmem:[#allocation5 + $0x1700] ss:$16 sps:$4 sm:$0xff]   ;;  %v8290_v32 = vld [vmem:[#allocation5 + $0x1cc] ss:$16 sps:$4 sm:$0xff]   ;;  %v8288_v59 = vld [vmem:[#allocation5 + $0x1c8] ss:$16 sps:$4 sm:$0xff]  }
 0x1a6   :  { %5806 = vmatpush2.bf16.msra.mxu1 %v8177_v37  ;;  %5764 = vmatprep.subr.bf16.mxu0 %v8182_v49  ;;  %v8236_v37 = vld [vmem:[#allocation5 + $0xec] ss:$16 sps:$4 sm:$0xff]  }
 0x1a7   :  { %5807 = vmatprep.subr.bf16.mxu1 %v8185_v50  ;;  %v8239_v49 = vld [vmem:[#allocation5 + $0x2ec] ss:$16 sps:$4 sm:$0xff]   ;;  %v8234_v50 = vld [vmem:[#allocation5 + $0xe8] ss:$16 sps:$4 sm:$0xff]  }
 0x1a8   :  { %v8293_v38 = vld [vmem:[#allocation5 + $0x3cc] ss:$16 sps:$4 sm:$0xff]  }
 0x1a9   :  { %5765 = vmatpush2.bf16.msra.mxu0 %v8180_v40  ;;  %v8237_v40 = vld [vmem:[#allocation5 + $0x2e8] ss:$16 sps:$4 sm:$0xff]  }
 0x1aa   :  { %5808 = vmatpush2.bf16.msra.mxu1 %v8183_v46  ;;  %5766 = vmatprep.subr.bf16.mxu0 %v8188_v47  ;;  %v8246_v46 = vld [vmem:[#allocation5 + $0xa8] ss:$16 sps:$4 sm:$0xff]  }
 0x1ab   :  { %5809 = vmatprep.subr.bf16.mxu1 %v8191_v51  ;;  %v8249_v47 = vld [vmem:[#allocation5 + $0x2a8] ss:$16 sps:$4 sm:$0xff]   ;;  %v8254_v51 = vld [vmem:[#allocation5 + $0x8c] ss:$16 sps:$4 sm:$0xff]  }
 0x1ad   :  { %5767 = vmatpush2.bf16.msra.mxu0 %v8186_v53  ;;  %v8257_v53 = vld [vmem:[#allocation5 + $0x28c] ss:$16 sps:$4 sm:$0xff]  }
 0x1ae   :  { %5810 = vmatpush2.bf16.msra.mxu1 %v8189_v54  ;;  %5768 = vmatprep.subr.bf16.mxu0 %v8194_v56  ;;  %v8252_v54 = vld [vmem:[#allocation5 + $0x88] ss:$16 sps:$4 sm:$0xff]  }
 0x1af   :  { %5811 = vmatprep.subr.bf16.mxu1 %v8197_v57  ;;  %v8255_v56 = vld [vmem:[#allocation5 + $0x288] ss:$16 sps:$4 sm:$0xff]   ;;  %v8260_v57 = vld [vmem:[#allocation5 + $0x6c] ss:$16 sps:$4 sm:$0xff]  }
 0x1b1   :  { %5769 = vmatpush2.bf16.msra.mxu0 %v8192_v60  ;;  %v8263_v60 = vld [vmem:[#allocation5 + $0x26c] ss:$16 sps:$4 sm:$0xff]  }
 0x1b2   :  { %5812 = vmatpush2.bf16.msra.mxu1 %v8195_v62  ;;  %5770 = vmatprep.subr.bf16.mxu0 %v8200_v52  ;;  %v8258_v62 = vld [vmem:[#allocation5 + $0x68] ss:$16 sps:$4 sm:$0xff]   ;;  %v8269_v52 = vld [vmem:[#allocation5 + $0x24c] ss:$16 sps:$4 sm:$0xff]  }
 0x1b3   :  { %5813 = vmatprep.subr.bf16.mxu1 %v8203_v3  ;;  %v8264_v3 = vld [vmem:[#allocation5 + $0x48] ss:$16 sps:$4 sm:$0xff]  }
 0x1b5   :  { %5771 = vmatpush2.bf16.msra.mxu0 %v8198_v9  ;;  %v8267_v9 = vld [vmem:[#allocation5 + $0x248] ss:$16 sps:$4 sm:$0xff]  }
 0x1b6   :  { %5814 = vmatpush2.bf16.msra.mxu1 %v8201_v10  ;;  %5772 = vmatprep.subr.bf16.mxu0 %v8206_v11  ;;  %v8272_v10 = vld [vmem:[#allocation5 + $0x2c] ss:$16 sps:$4 sm:$0xff]  }
 0x1b7   :  { %5815 = vmatprep.subr.bf16.mxu1 %v8209_v14  ;;  %v8275_v11 = vld [vmem:[#allocation5 + $0x22c] ss:$16 sps:$4 sm:$0xff]   ;;  %v8270_v14 = vld [vmem:[#allocation5 + $0x28] ss:$16 sps:$4 sm:$0xff]  }
 0x1b9   :  { %5773 = vmatpush2.bf16.msra.mxu0 %v8204_v17  ;;  %v8273_v17 = vld [vmem:[#allocation5 + $0x228] ss:$16 sps:$4 sm:$0xff]  }
 0x1ba   :  { %5816 = vmatpush2.bf16.msra.mxu1 %v8207_v19  ;;  %5774 = vmatprep.subr.bf16.mxu0 %v8212_v26  ;;  %v8278_v19 = vld [vmem:[#allocation5 + $0xc] ss:$16 sps:$4 sm:$0xff]  }
 0x1bb   :  { %5817 = vmatprep.subr.bf16.mxu1 %v8215_v27  ;;  %v8281_v26 = vld [vmem:[#allocation5 + $0x20c] ss:$16 sps:$4 sm:$0xff]   ;;  %v8276_v27 = vld [vmem:[#allocation5 + $0x8] ss:$16 sps:$4 sm:$0xff]  }
 0x1bd   :  { %5775 = vmatpush2.bf16.msra.mxu0 %v8210_v28  ;;  %v8279_v28 = vld [vmem:[#allocation5 + $0x208] ss:$16 sps:$4 sm:$0xff]  }
 0x1be   :  { %5818 = vmatpush2.bf16.msra.mxu1 %v8213_v29  ;;  %5776 = vmatprep.subr.bf16.mxu0 %v8218_v30  ;;  %v8284_v29 = vld [vmem:[#allocation5 + $0x1ec] ss:$16 sps:$4 sm:$0xff]  }
 0x1bf   :  { %5819 = vmatprep.subr.bf16.mxu1 %v8221_v31  ;;  %v8287_v30 = vld [vmem:[#allocation5 + $0x3ec] ss:$16 sps:$4 sm:$0xff]   ;;  %v8282_v31 = vld [vmem:[#allocation5 + $0x1e8] ss:$16 sps:$4 sm:$0xff]  }
 0x1c1   :  { %5777 = vmatpush2.bf16.msra.mxu0 %v8216_v63  ;;  %v8291_v63 = vld [vmem:[#allocation5 + $0x3c8] ss:$16 sps:$4 sm:$0xff]  }
 0x1c2   :  { %5820 = vmatpush2.bf16.msra.mxu1 %v8219_v0  ;;  %5832 = vmatprep.subr.bf16.mxu0 %v8236_v37  ;;  %v8296_v0 = vld [vmem:[#allocation5 + $0x1ac] ss:$16 sps:$4 sm:$0xff]  }
 0x1c3   :  { %5875 = vmatprep.subr.bf16.mxu1 %v8239_v49  ;;  %v8299_v37 = vld [vmem:[#allocation5 + $0x3ac] ss:$16 sps:$4 sm:$0xff]   ;;  %v8294_v49 = vld [vmem:[#allocation5 + $0x1a8] ss:$16 sps:$4 sm:$0xff]  }
 0x1c4   :  { %5779 = vmatmul.mubr.bf16.vlgmr.msra.gmra.mxu0 %v9309_v16 }
 0x1c5   :  { %5822 = vmatmul.mubr.bf16.vlgmr.msra.gmra.mxu1 %v9311_v44  ;;  %5833 = vmatpush1.bf16.msra.mxu0 %v8234_v50  ;;  %v8297_v50 = vld [vmem:[#allocation5 + $0x3a8] ss:$16 sps:$4 sm:$0xff]  }
 0x1c6   :  { %5876 = vmatpush1.bf16.msra.mxu1 %v8237_v40  ;;  %5834 = vmatprep.subr.bf16.mxu0 %v8242_v45  ;;  %v8302_v40 = vld [vmem:[#allocation5 + $0x18c] ss:$16 sps:$4 sm:$0xff]  }
 0x1c7   :  { %5877 = vmatprep.subr.bf16.mxu1 %v8245_v4  ;;  %5864 = vmatprep.mubr.bf16.mxu0 %v9043_v18  ;;  %v8261_v18 = vld [vmem:[#allocation5 + $0x268] ss:$16 sps:$4 sm:$0xff]   ;;  %v8305_v45 = vld [vmem:[#allocation5 + $0x38c] ss:$16 sps:$4 sm:$0xff]  }
 0x1c8   :  { %5907 = vmatprep.mubr.bf16.mxu1 %v9046_v21  ;;  %v8266_v21 = vld [vmem:[#allocation5 + $0x4c] ss:$16 sps:$4 sm:$0xff]   ;;  %v8300_v4 = vld [vmem:[#allocation5 + $0x188] ss:$16 sps:$4 sm:$0xff]  }
 0x1c9   :  { %5835 = vmatpush1.bf16.msra.mxu0 %v8240_v12  ;;  %v8303_v12 = vld [vmem:[#allocation5 + $0x388] ss:$16 sps:$4 sm:$0xff]  }
 0x1ca   :  { %5878 = vmatpush1.bf16.msra.mxu1 %v8243_v13  ;;  %5836 = vmatprep.subr.bf16.mxu0 %v8248_v15  ;;  %v8308_v13 = vld [vmem:[#allocation5 + $0x16c] ss:$16 sps:$4 sm:$0xff]  }
 0x1cb   :  { %5879 = vmatprep.subr.bf16.mxu1 %v8251_v22  ;;  %v8311_v15 = vld [vmem:[#allocation5 + $0x36c] ss:$16 sps:$4 sm:$0xff]   ;;  %v8306_v22 = vld [vmem:[#allocation5 + $0x168] ss:$16 sps:$4 sm:$0xff]  }
 0x1cd   :  { %5837 = vmatpush1.bf16.msra.mxu0 %v8246_v46  ;;  %v8309_v46 = vld [vmem:[#allocation5 + $0x368] ss:$16 sps:$4 sm:$0xff]  }
 0x1ce   :  { %5880 = vmatpush1.bf16.msra.mxu1 %v8249_v47  ;;  %5838 = vmatprep.subr.bf16.mxu0 %v8254_v51  ;;  %v8314_v47 = vld [vmem:[#allocation5 + $0x14c] ss:$16 sps:$4 sm:$0xff]  }
 0x1cf   :  { %5881 = vmatprep.subr.bf16.mxu1 %v8257_v53  ;;  %v8317_v51 = vld [vmem:[#allocation5 + $0x34c] ss:$16 sps:$4 sm:$0xff]   ;;  %v8312_v53 = vld [vmem:[#allocation5 + $0x148] ss:$16 sps:$4 sm:$0xff]  }
 0x1d1   :  { %5839 = vmatpush1.bf16.msra.mxu0 %v8252_v54  ;;  %v8315_v54 = vld [vmem:[#allocation5 + $0x348] ss:$16 sps:$4 sm:$0xff]  }
 0x1d2   :  { %5882 = vmatpush1.bf16.msra.mxu1 %v8255_v56  ;;  %5840 = vmatprep.subr.bf16.mxu0 %v8260_v57  ;;  %v8320_v56 = vld [vmem:[#allocation5 + $0x12c] ss:$16 sps:$4 sm:$0xff]  }
 0x1d3   :  { %5883 = vmatprep.subr.bf16.mxu1 %v8263_v60  ;;  %v8323_v57 = vld [vmem:[#allocation5 + $0x32c] ss:$16 sps:$4 sm:$0xff]   ;;  %v8318_v60 = vld [vmem:[#allocation5 + $0x128] ss:$16 sps:$4 sm:$0xff]  }
 0x1d5   :  { %5841 = vmatpush1.bf16.msra.mxu0 %v8258_v62  ;;  %v8321_v62 = vld [vmem:[#allocation5 + $0x328] ss:$16 sps:$4 sm:$0xff]  }
 0x1d6   :  { %5884 = vmatpush1.bf16.msra.mxu1 %v8261_v18  ;;  %5842 = vmatprep.subr.bf16.mxu0 %v8266_v21  ;;  %v8326_v18 = vld [vmem:[#allocation5 + $0x10c] ss:$16 sps:$4 sm:$0xff]  }
 0x1d7   :  { %5885 = vmatprep.subr.bf16.mxu1 %v8269_v52  ;;  %v8329_v21 = vld [vmem:[#allocation5 + $0x30c] ss:$16 sps:$4 sm:$0xff]   ;;  %v8324_v52 = vld [vmem:[#allocation5 + $0x108] ss:$16 sps:$4 sm:$0xff]  }
 0x1d9   :  { %5843 = vmatpush1.bf16.msra.mxu0 %v8264_v3  ;;  %v8327_v3 = vld [vmem:[#allocation5 + $0x308] ss:$16 sps:$4 sm:$0xff]  }
 0x1da   :  { %5886 = vmatpush1.bf16.msra.mxu1 %v8267_v9  ;;  %5844 = vmatprep.subr.bf16.mxu0 %v8272_v10  ;;  %v8332_v9 = vld [vmem:[#allocation5 + $0x4ec] ss:$16 sps:$4 sm:$0xff]  }
 0x1db   :  { %5887 = vmatprep.subr.bf16.mxu1 %v8275_v11  ;;  %v8335_v10 = vld [vmem:[#allocation5 + $0x6ec] ss:$16 sps:$4 sm:$0xff]   ;;  %v8330_v11 = vld [vmem:[#allocation5 + $0x4e8] ss:$16 sps:$4 sm:$0xff]  }
 0x1dd   :  { %5845 = vmatpush1.bf16.msra.mxu0 %v8270_v14  ;;  %v8333_v14 = vld [vmem:[#allocation5 + $0x6e8] ss:$16 sps:$4 sm:$0xff]  }
 0x1de   :  { %5888 = vmatpush1.bf16.msra.mxu1 %v8273_v17  ;;  %5846 = vmatprep.subr.bf16.mxu0 %v8278_v19  ;;  %v8338_v17 = vld [vmem:[#allocation5 + $0x4cc] ss:$16 sps:$4 sm:$0xff]  }
 0x1df   :  { %5889 = vmatprep.subr.bf16.mxu1 %v8281_v26  ;;  %v8341_v19 = vld [vmem:[#allocation5 + $0x6cc] ss:$16 sps:$4 sm:$0xff]   ;;  %v8336_v26 = vld [vmem:[#allocation5 + $0x4c8] ss:$16 sps:$4 sm:$0xff]  }
 0x1e1   :  { %5847 = vmatpush1.bf16.msra.mxu0 %v8276_v27  ;;  %v8339_v27 = vld [vmem:[#allocation5 + $0x6c8] ss:$16 sps:$4 sm:$0xff]  }
 0x1e2   :  { %5890 = vmatpush1.bf16.msra.mxu1 %v8279_v28  ;;  %5848 = vmatprep.subr.bf16.mxu0 %v8284_v29  ;;  %v8344_v28 = vld [vmem:[#allocation5 + $0x4ac] ss:$16 sps:$4 sm:$0xff]  }
 0x1e3   :  { %5891 = vmatprep.subr.bf16.mxu1 %v8287_v30  ;;  %v8347_v29 = vld [vmem:[#allocation5 + $0x6ac] ss:$16 sps:$4 sm:$0xff]   ;;  %v8342_v30 = vld [vmem:[#allocation5 + $0x4a8] ss:$16 sps:$4 sm:$0xff]  }
 0x1e5   :  { %5849 = vmatpush2.bf16.msra.mxu0 %v8282_v31  ;;  %v8345_v31 = vld [vmem:[#allocation5 + $0x6a8] ss:$16 sps:$4 sm:$0xff]  }
 0x1e6   :  { %5892 = vmatpush2.bf16.msra.mxu1 %v8285_v55  ;;  %5850 = vmatprep.subr.bf16.mxu0 %v8290_v32  ;;  %v8350_v55 = vld [vmem:[#allocation5 + $0x48c] ss:$16 sps:$4 sm:$0xff]   ;;  %v8348_v32 = vld [vmem:[#allocation5 + $0x488] ss:$16 sps:$4 sm:$0xff]  }
 0x1e7   :  { %5893 = vmatprep.subr.bf16.mxu1 %v8293_v38  ;;  %v8356_v38 = vld [vmem:[#allocation5 + $0x46c] ss:$16 sps:$4 sm:$0xff]  }
 0x1e9   :  { %5851 = vmatpush2.bf16.msra.mxu0 %v8288_v59  ;;  %v8359_v59 = vld [vmem:[#allocation5 + $0x66c] ss:$16 sps:$4 sm:$0xff]  }
 0x1ea   :  { %5894 = vmatpush2.bf16.msra.mxu1 %v8291_v63  ;;  %5852 = vmatprep.subr.bf16.mxu0 %v8296_v0  ;;  %v8354_v63 = vld [vmem:[#allocation5 + $0x468] ss:$16 sps:$4 sm:$0xff]   ;;  %v8365_v0 = vld [vmem:[#allocation5 + $0x64c] ss:$16 sps:$4 sm:$0xff]  }
 0x1eb   :  { %5895 = vmatprep.subr.bf16.mxu1 %v8299_v37  ;;  %v8360_v37 = vld [vmem:[#allocation5 + $0x448] ss:$16 sps:$4 sm:$0xff]  }
 0x1ed   :  { %5853 = vmatpush2.bf16.msra.mxu0 %v8294_v49  ;;  %v8363_v49 = vld [vmem:[#allocation5 + $0x648] ss:$16 sps:$4 sm:$0xff]  }
 0x1ee   :  { %5896 = vmatpush2.bf16.msra.mxu1 %v8297_v50  ;;  %5854 = vmatprep.subr.bf16.mxu0 %v8302_v40  ;;  %v8368_v50 = vld [vmem:[#allocation5 + $0x42c] ss:$16 sps:$4 sm:$0xff]  }
 0x1ef   :  { %5897 = vmatprep.subr.bf16.mxu1 %v8305_v45  ;;  %v8371_v40 = vld [vmem:[#allocation5 + $0x62c] ss:$16 sps:$4 sm:$0xff]   ;;  %v8366_v45 = vld [vmem:[#allocation5 + $0x428] ss:$16 sps:$4 sm:$0xff]  }
 0x1f1   :  { %5855 = vmatpush2.bf16.msra.mxu0 %v8300_v4  ;;  %v8369_v4 = vld [vmem:[#allocation5 + $0x628] ss:$16 sps:$4 sm:$0xff]  }
 0x1f2   :  { %5898 = vmatpush2.bf16.msra.mxu1 %v8303_v12  ;;  %5856 = vmatprep.subr.bf16.mxu0 %v8308_v13  ;;  %v8374_v12 = vld [vmem:[#allocation5 + $0x40c] ss:$16 sps:$4 sm:$0xff]  }
 0x1f3   :  { %5899 = vmatprep.subr.bf16.mxu1 %v8311_v15  ;;  %v8377_v13 = vld [vmem:[#allocation5 + $0x60c] ss:$16 sps:$4 sm:$0xff]   ;;  %v8372_v15 = vld [vmem:[#allocation5 + $0x408] ss:$16 sps:$4 sm:$0xff]  }
 0x1f5   :  { %5857 = vmatpush2.bf16.msra.mxu0 %v8306_v22  ;;  %v8375_v22 = vld [vmem:[#allocation5 + $0x608] ss:$16 sps:$4 sm:$0xff]  }
 0x1f6   :  { %5900 = vmatpush2.bf16.msra.mxu1 %v8309_v46  ;;  %5858 = vmatprep.subr.bf16.mxu0 %v8314_v47  ;;  %v8380_v46 = vld [vmem:[#allocation5 + $0x5ec] ss:$16 sps:$4 sm:$0xff]  }
 0x1f7   :  { %5901 = vmatprep.subr.bf16.mxu1 %v8317_v51  ;;  %v8383_v47 = vld [vmem:[#allocation5 + $0x7ec] ss:$16 sps:$4 sm:$0xff]   ;;  %v8378_v51 = vld [vmem:[#allocation5 + $0x5e8] ss:$16 sps:$4 sm:$0xff]  }
 0x1f9   :  { %5859 = vmatpush2.bf16.msra.mxu0 %v8312_v53  ;;  %v8381_v53 = vld [vmem:[#allocation5 + $0x7e8] ss:$16 sps:$4 sm:$0xff]  }
 0x1fa   :  { %5902 = vmatpush2.bf16.msra.mxu1 %v8315_v54  ;;  %5860 = vmatprep.subr.bf16.mxu0 %v8320_v56  ;;  %v8386_v54 = vld [vmem:[#allocation5 + $0x5cc] ss:$16 sps:$4 sm:$0xff]  }
 0x1fb   :  { %5903 = vmatprep.subr.bf16.mxu1 %v8323_v57  ;;  %v8389_v56 = vld [vmem:[#allocation5 + $0x7cc] ss:$16 sps:$4 sm:$0xff]   ;;  %v8384_v57 = vld [vmem:[#allocation5 + $0x5c8] ss:$16 sps:$4 sm:$0xff]  }
 0x1fd   :  { %5861 = vmatpush2.bf16.msra.mxu0 %v8318_v60  ;;  %v8387_v60 = vld [vmem:[#allocation5 + $0x7c8] ss:$16 sps:$4 sm:$0xff]  }
 0x1fe   :  { %5904 = vmatpush2.bf16.msra.mxu1 %v8321_v62  ;;  %5862 = vmatprep.subr.bf16.mxu0 %v8326_v18  ;;  %v8392_v62 = vld [vmem:[#allocation5 + $0x5ac] ss:$16 sps:$4 sm:$0xff]  }
 0x1ff   :  { %5905 = vmatprep.subr.bf16.mxu1 %v8329_v21  ;;  %v8395_v18 = vld [vmem:[#allocation5 + $0x7ac] ss:$16 sps:$4 sm:$0xff]   ;;  %v8390_v21 = vld [vmem:[#allocation5 + $0x5a8] ss:$16 sps:$4 sm:$0xff]  }
 0x201   :  { %5863 = vmatpush2.bf16.msra.mxu0 %v8324_v52  ;;  %v8393_v52 = vld [vmem:[#allocation5 + $0x7a8] ss:$16 sps:$4 sm:$0xff]  }
 0x202   :  { %5906 = vmatpush2.bf16.msra.mxu1 %v8327_v3  ;;  %5918 = vmatprep.subr.bf16.mxu0 %v8332_v9  ;;  %v8398_v3 = vld [vmem:[#allocation5 + $0x58c] ss:$16 sps:$4 sm:$0xff]  }
 0x203   :  { %5961 = vmatprep.subr.bf16.mxu1 %v8335_v10  ;;  %v8401_v9 = vld [vmem:[#allocation5 + $0x78c] ss:$16 sps:$4 sm:$0xff]   ;;  %v8396_v10 = vld [vmem:[#allocation5 + $0x588] ss:$16 sps:$4 sm:$0xff]  }
 0x204   :  { %5865 = vmatmul.mubr.bf16.vlgmr.msra.gmra.mxu0 %v9049_v34  ;;  %v8353_v34 = vld [vmem:[#allocation5 + $0x68c] ss:$16 sps:$4 sm:$0xff]  }
 0x205   :  { %5908 = vmatmul.mubr.bf16.vlgmr.msra.gmra.mxu1 %v9051_v35  ;;  %5919 = vmatpush1.bf16.msra.mxu0 %v8330_v11  ;;  %v8351_v35 = vld [vmem:[#allocation5 + $0x688] ss:$16 sps:$4 sm:$0xff]  }
 0x206   :  { %5962 = vmatpush1.bf16.msra.mxu1 %v8333_v14  ;;  %5920 = vmatprep.subr.bf16.mxu0 %v8338_v17  ;;  %v8399_v11 = vld [vmem:[#allocation5 + $0x788] ss:$16 sps:$4 sm:$0xff]   ;;  %v8404_v14 = vld [vmem:[#allocation5 + $0x56c] ss:$16 sps:$4 sm:$0xff]  }
 0x207   :  { %5963 = vmatprep.subr.bf16.mxu1 %v8341_v19  ;;  %5950 = vmatprep.mubr.bf16.mxu0 %v9085_v36  ;;  %v8357_v36 = vld [vmem:[#allocation5 + $0x668] ss:$16 sps:$4 sm:$0xff]   ;;  %v8407_v17 = vld [vmem:[#allocation5 + $0x76c] ss:$16 sps:$4 sm:$0xff]  }
 0x208   :  { %5993 = vmatprep.mubr.bf16.mxu1 %v9090_v39  ;;  %v8362_v39 = vld [vmem:[#allocation5 + $0x44c] ss:$16 sps:$4 sm:$0xff]   ;;  %v8402_v19 = vld [vmem:[#allocation5 + $0x568] ss:$16 sps:$4 sm:$0xff]  }
 0x209   :  { %5921 = vmatpush1.bf16.msra.mxu0 %v8336_v26  ;;  %v8405_v26 = vld [vmem:[#allocation5 + $0x768] ss:$16 sps:$4 sm:$0xff]  }
 0x20a   :  { %5964 = vmatpush1.bf16.msra.mxu1 %v8339_v27  ;;  %5922 = vmatprep.subr.bf16.mxu0 %v8344_v28  ;;  %v8410_v27 = vld [vmem:[#allocation5 + $0x54c] ss:$16 sps:$4 sm:$0xff]  }
 0x20b   :  { %5965 = vmatprep.subr.bf16.mxu1 %v8347_v29  ;;  %v8413_v28 = vld [vmem:[#allocation5 + $0x74c] ss:$16 sps:$4 sm:$0xff]   ;;  %v8408_v29 = vld [vmem:[#allocation5 + $0x548] ss:$16 sps:$4 sm:$0xff]  }
 0x20d   :  { %5923 = vmatpush1.bf16.msra.mxu0 %v8342_v30  ;;  %v8411_v30 = vld [vmem:[#allocation5 + $0x748] ss:$16 sps:$4 sm:$0xff]  }
 0x20e   :  { %5966 = vmatpush1.bf16.msra.mxu1 %v8345_v31  ;;  %5924 = vmatprep.subr.bf16.mxu0 %v8350_v55  ;;  %v8416_v31 = vld [vmem:[#allocation5 + $0x52c] ss:$16 sps:$4 sm:$0xff]  }
 0x20f   :  { %5967 = vmatprep.subr.bf16.mxu1 %v8353_v34  ;;  %v8419_v55 = vld [vmem:[#allocation5 + $0x72c] ss:$16 sps:$4 sm:$0xff]   ;;  %v8414_v34 = vld [vmem:[#allocation5 + $0x528] ss:$16 sps:$4 sm:$0xff]  }
 0x211   :  { %5925 = vmatpush1.bf16.msra.mxu0 %v8348_v32  ;;  %v8417_v32 = vld [vmem:[#allocation5 + $0x728] ss:$16 sps:$4 sm:$0xff]  }
 0x212   :  { %5968 = vmatpush1.bf16.msra.mxu1 %v8351_v35  ;;  %5926 = vmatprep.subr.bf16.mxu0 %v8356_v38  ;;  %v8422_v35 = vld [vmem:[#allocation5 + $0x50c] ss:$16 sps:$4 sm:$0xff]  }
 0x213   :  { %5969 = vmatprep.subr.bf16.mxu1 %v8359_v59  ;;  %v8425_v38 = vld [vmem:[#allocation5 + $0x70c] ss:$16 sps:$4 sm:$0xff]   ;;  %v8420_v59 = vld [vmem:[#allocation5 + $0x508] ss:$16 sps:$4 sm:$0xff]  }
 0x215   :  { %5927 = vmatpush1.bf16.msra.mxu0 %v8354_v63  ;;  %v8423_v63 = vld [vmem:[#allocation5 + $0x708] ss:$16 sps:$4 sm:$0xff]  }
 0x216   :  { %5970 = vmatpush1.bf16.msra.mxu1 %v8357_v36  ;;  %5928 = vmatprep.subr.bf16.mxu0 %v8362_v39  ;;  %v8428_v36 = vld [vmem:[#allocation5 + $0x8ec] ss:$16 sps:$4 sm:$0xff]  }
 0x217   :  { %5971 = vmatprep.subr.bf16.mxu1 %v8365_v0  ;;  %v8431_v39 = vld [vmem:[#allocation5 + $0xaec] ss:$16 sps:$4 sm:$0xff]   ;;  %v8426_v0 = vld [vmem:[#allocation5 + $0x8e8] ss:$16 sps:$4 sm:$0xff]  }
 0x219   :  { %5929 = vmatpush1.bf16.msra.mxu0 %v8360_v37  ;;  %v8429_v37 = vld [vmem:[#allocation5 + $0xae8] ss:$16 sps:$4 sm:$0xff]  }
 0x21a   :  { %5972 = vmatpush1.bf16.msra.mxu1 %v8363_v49  ;;  %5930 = vmatprep.subr.bf16.mxu0 %v8368_v50  ;;  %v8434_v49 = vld [vmem:[#allocation5 + $0x8cc] ss:$16 sps:$4 sm:$0xff]  }
 0x21b   :  { %5973 = vmatprep.subr.bf16.mxu1 %v8371_v40  ;;  %v8437_v50 = vld [vmem:[#allocation5 + $0xacc] ss:$16 sps:$4 sm:$0xff]   ;;  %v8432_v40 = vld [vmem:[#allocation5 + $0x8c8] ss:$16 sps:$4 sm:$0xff]  }
 0x21d   :  { %5931 = vmatpush1.bf16.msra.mxu0 %v8366_v45  ;;  %v8435_v45 = vld [vmem:[#allocation5 + $0xac8] ss:$16 sps:$4 sm:$0xff]  }
 0x21e   :  { %5974 = vmatpush1.bf16.msra.mxu1 %v8369_v4  ;;  %5932 = vmatprep.subr.bf16.mxu0 %v8374_v12  ;;  %v8440_v4 = vld [vmem:[#allocation5 + $0x8ac] ss:$16 sps:$4 sm:$0xff]  }
 0x21f   :  { %5975 = vmatprep.subr.bf16.mxu1 %v8377_v13  ;;  %v8443_v12 = vld [vmem:[#allocation5 + $0xaac] ss:$16 sps:$4 sm:$0xff]   ;;  %v8438_v13 = vld [vmem:[#allocation5 + $0x8a8] ss:$16 sps:$4 sm:$0xff]  }
 0x221   :  { %5933 = vmatpush1.bf16.msra.mxu0 %v8372_v15  ;;  %v8441_v15 = vld [vmem:[#allocation5 + $0xaa8] ss:$16 sps:$4 sm:$0xff]  }
 0x222   :  { %5976 = vmatpush1.bf16.msra.mxu1 %v8375_v22  ;;  %5934 = vmatprep.subr.bf16.mxu0 %v8380_v46  ;;  %v8446_v22 = vld [vmem:[#allocation5 + $0x88c] ss:$16 sps:$4 sm:$0xff]   ;;  %v8447_v46 = vld [vmem:[#allocation5 + $0xa88] ss:$16 sps:$4 sm:$0xff]  }
 0x223   :  { %5977 = vmatprep.subr.bf16.mxu1 %v8383_v47  ;;  %v8452_v47 = vld [vmem:[#allocation5 + $0x86c] ss:$16 sps:$4 sm:$0xff]  }
 0x225   :  { %5935 = vmatpush2.bf16.msra.mxu0 %v8378_v51  ;;  %v8455_v51 = vld [vmem:[#allocation5 + $0xa6c] ss:$16 sps:$4 sm:$0xff]  }
 0x226   :  { %5978 = vmatpush2.bf16.msra.mxu1 %v8381_v53  ;;  %5936 = vmatprep.subr.bf16.mxu0 %v8386_v54  ;;  %v8450_v53 = vld [vmem:[#allocation5 + $0x868] ss:$16 sps:$4 sm:$0xff]   ;;  %v8461_v54 = vld [vmem:[#allocation5 + $0xa4c] ss:$16 sps:$4 sm:$0xff]  }
 0x227   :  { %5979 = vmatprep.subr.bf16.mxu1 %v8389_v56  ;;  %v8456_v56 = vld [vmem:[#allocation5 + $0x848] ss:$16 sps:$4 sm:$0xff]  }
 0x229   :  { %5937 = vmatpush2.bf16.msra.mxu0 %v8384_v57  ;;  %v8459_v57 = vld [vmem:[#allocation5 + $0xa48] ss:$16 sps:$4 sm:$0xff]  }
 0x22a   :  { %5980 = vmatpush2.bf16.msra.mxu1 %v8387_v60  ;;  %5938 = vmatprep.subr.bf16.mxu0 %v8392_v62  ;;  %v8464_v60 = vld [vmem:[#allocation5 + $0x82c] ss:$16 sps:$4 sm:$0xff]  }
 0x22b   :  { %5981 = vmatprep.subr.bf16.mxu1 %v8395_v18  ;;  %v8467_v62 = vld [vmem:[#allocation5 + $0xa2c] ss:$16 sps:$4 sm:$0xff]   ;;  %v8462_v18 = vld [vmem:[#allocation5 + $0x828] ss:$16 sps:$4 sm:$0xff]  }
 0x22d   :  { %5939 = vmatpush2.bf16.msra.mxu0 %v8390_v21  ;;  %v8465_v21 = vld [vmem:[#allocation5 + $0xa28] ss:$16 sps:$4 sm:$0xff]  }
 0x22e   :  { %5982 = vmatpush2.bf16.msra.mxu1 %v8393_v52  ;;  %5940 = vmatprep.subr.bf16.mxu0 %v8398_v3  ;;  %v8470_v52 = vld [vmem:[#allocation5 + $0x80c] ss:$16 sps:$4 sm:$0xff]  }
 0x22f   :  { %5983 = vmatprep.subr.bf16.mxu1 %v8401_v9  ;;  %v8473_v3 = vld [vmem:[#allocation5 + $0xa0c] ss:$16 sps:$4 sm:$0xff]   ;;  %v8468_v9 = vld [vmem:[#allocation5 + $0x808] ss:$16 sps:$4 sm:$0xff]  }
 0x231   :  { %5941 = vmatpush2.bf16.msra.mxu0 %v8396_v10  ;;  %v8471_v10 = vld [vmem:[#allocation5 + $0xa08] ss:$16 sps:$4 sm:$0xff]  }
 0x232   :  { %5984 = vmatpush2.bf16.msra.mxu1 %v8399_v11  ;;  %5942 = vmatprep.subr.bf16.mxu0 %v8404_v14  ;;  %v8476_v11 = vld [vmem:[#allocation5 + $0x9ec] ss:$16 sps:$4 sm:$0xff]  }
 0x233   :  { %5985 = vmatprep.subr.bf16.mxu1 %v8407_v17  ;;  %v8479_v14 = vld [vmem:[#allocation5 + $0xbec] ss:$16 sps:$4 sm:$0xff]   ;;  %v8474_v17 = vld [vmem:[#allocation5 + $0x9e8] ss:$16 sps:$4 sm:$0xff]  }
 0x235   :  { %5943 = vmatpush2.bf16.msra.mxu0 %v8402_v19  ;;  %v8477_v19 = vld [vmem:[#allocation5 + $0xbe8] ss:$16 sps:$4 sm:$0xff]  }
 0x236   :  { %5986 = vmatpush2.bf16.msra.mxu1 %v8405_v26  ;;  %5944 = vmatprep.subr.bf16.mxu0 %v8410_v27  ;;  %v8482_v26 = vld [vmem:[#allocation5 + $0x9cc] ss:$16 sps:$4 sm:$0xff]  }
 0x237   :  { %5987 = vmatprep.subr.bf16.mxu1 %v8413_v28  ;;  %v8485_v27 = vld [vmem:[#allocation5 + $0xbcc] ss:$16 sps:$4 sm:$0xff]   ;;  %v8480_v28 = vld [vmem:[#allocation5 + $0x9c8] ss:$16 sps:$4 sm:$0xff]  }
 0x239   :  { %5945 = vmatpush2.bf16.msra.mxu0 %v8408_v29  ;;  %v8483_v29 = vld [vmem:[#allocation5 + $0xbc8] ss:$16 sps:$4 sm:$0xff]  }
 0x23a   :  { %5988 = vmatpush2.bf16.msra.mxu1 %v8411_v30  ;;  %5946 = vmatprep.subr.bf16.mxu0 %v8416_v31  ;;  %v8488_v30 = vld [vmem:[#allocation5 + $0x9ac] ss:$16 sps:$4 sm:$0xff]  }
 0x23b   :  { %5989 = vmatprep.subr.bf16.mxu1 %v8419_v55  ;;  %v8491_v31 = vld [vmem:[#allocation5 + $0xbac] ss:$16 sps:$4 sm:$0xff]   ;;  %v8486_v55 = vld [vmem:[#allocation5 + $0x9a8] ss:$16 sps:$4 sm:$0xff]  }
 0x23d   :  { %5947 = vmatpush2.bf16.msra.mxu0 %v8414_v34  ;;  %v8489_v34 = vld [vmem:[#allocation5 + $0xba8] ss:$16 sps:$4 sm:$0xff]  }
 0x23e   :  { %5990 = vmatpush2.bf16.msra.mxu1 %v8417_v32  ;;  %5948 = vmatprep.subr.bf16.mxu0 %v8422_v35  ;;  %v8494_v32 = vld [vmem:[#allocation5 + $0x98c] ss:$16 sps:$4 sm:$0xff]  }
 0x23f   :  { %5991 = vmatprep.subr.bf16.mxu1 %v8425_v38  ;;  %v8497_v35 = vld [vmem:[#allocation5 + $0xb8c] ss:$16 sps:$4 sm:$0xff]   ;;  %v8492_v38 = vld [vmem:[#allocation5 + $0x988] ss:$16 sps:$4 sm:$0xff]  }
 0x241   :  { %5949 = vmatpush2.bf16.msra.mxu0 %v8420_v59  ;;  %v8495_v59 = vld [vmem:[#allocation5 + $0xb88] ss:$16 sps:$4 sm:$0xff]  }
 0x242   :  { %5992 = vmatpush2.bf16.msra.mxu1 %v8423_v63  ;;  %6004 = vmatprep.subr.bf16.mxu0 %v8428_v36  ;;  %v8500_v63 = vld [vmem:[#allocation5 + $0x96c] ss:$16 sps:$4 sm:$0xff]  }
 0x243   :  { %6047 = vmatprep.subr.bf16.mxu1 %v8431_v39  ;;  %v8503_v36 = vld [vmem:[#allocation5 + $0xb6c] ss:$16 sps:$4 sm:$0xff]   ;;  %v8498_v39 = vld [vmem:[#allocation5 + $0x968] ss:$16 sps:$4 sm:$0xff]  }
 0x244   :  { %5951 = vmatmul.mubr.bf16.vlgmr.msra.gmra.mxu0 %v9101_v6  ;;  %v8449_v6 = vld [vmem:[#allocation5 + $0xa8c] ss:$16 sps:$4 sm:$0xff]  }
 0x245   :  { %5994 = vmatmul.mubr.bf16.vlgmr.msra.gmra.mxu1 %v9103_v7  ;;  %6005 = vmatpush1.bf16.msra.mxu0 %v8426_v0  ;;  %v8444_v7 = vld [vmem:[#allocation5 + $0x888] ss:$16 sps:$4 sm:$0xff]  }
 0x246   :  { %6048 = vmatpush1.bf16.msra.mxu1 %v8429_v37  ;;  %6006 = vmatprep.subr.bf16.mxu0 %v8434_v49  ;;  %v8501_v0 = vld [vmem:[#allocation5 + $0xb68] ss:$16 sps:$4 sm:$0xff]   ;;  %v8506_v37 = vld [vmem:[#allocation5 + $0x94c] ss:$16 sps:$4 sm:$0xff]  }
 0x247   :  { %6049 = vmatprep.subr.bf16.mxu1 %v8437_v50  ;;  %6036 = vmatprep.mubr.bf16.mxu0 %v9137_v58  ;;  %v8453_v58 = vld [vmem:[#allocation5 + $0xa68] ss:$16 sps:$4 sm:$0xff]   ;;  %v8509_v49 = vld [vmem:[#allocation5 + $0xb4c] ss:$16 sps:$4 sm:$0xff]  }
 0x248   :  { %6079 = vmatprep.mubr.bf16.mxu1 %v9142_v61  ;;  %v8458_v61 = vld [vmem:[#allocation5 + $0x84c] ss:$16 sps:$4 sm:$0xff]   ;;  %v8504_v50 = vld [vmem:[#allocation5 + $0x948] ss:$16 sps:$4 sm:$0xff]  }
 0x249   :  { %6007 = vmatpush1.bf16.msra.mxu0 %v8432_v40  ;;  %v8507_v40 = vld [vmem:[#allocation5 + $0xb48] ss:$16 sps:$4 sm:$0xff]  }
 0x24a   :  { %6050 = vmatpush1.bf16.msra.mxu1 %v8435_v45  ;;  %6008 = vmatprep.subr.bf16.mxu0 %v8440_v4  ;;  %v8512_v45 = vld [vmem:[#allocation5 + $0x92c] ss:$16 sps:$4 sm:$0xff]  }
 0x24b   :  { %6051 = vmatprep.subr.bf16.mxu1 %v8443_v12  ;;  %v8515_v4 = vld [vmem:[#allocation5 + $0xb2c] ss:$16 sps:$4 sm:$0xff]   ;;  %v8510_v12 = vld [vmem:[#allocation5 + $0x928] ss:$16 sps:$4 sm:$0xff]  }
 0x24d   :  { %6009 = vmatpush1.bf16.msra.mxu0 %v8438_v13  ;;  %v8513_v13 = vld [vmem:[#allocation5 + $0xb28] ss:$16 sps:$4 sm:$0xff]  }
 0x24e   :  { %6052 = vmatpush1.bf16.msra.mxu1 %v8441_v15  ;;  %6010 = vmatprep.subr.bf16.mxu0 %v8446_v22  ;;  %v8518_v15 = vld [vmem:[#allocation5 + $0x90c] ss:$16 sps:$4 sm:$0xff]  }
 0x24f   :  { %6053 = vmatprep.subr.bf16.mxu1 %v8449_v6  ;;  %v8521_v22 = vld [vmem:[#allocation5 + $0xb0c] ss:$16 sps:$4 sm:$0xff]   ;;  %v8516_v6 = vld [vmem:[#allocation5 + $0x908] ss:$16 sps:$4 sm:$0xff]  }
 0x251   :  { %6011 = vmatpush1.bf16.msra.mxu0 %v8444_v7  ;;  %v8519_v7 = vld [vmem:[#allocation5 + $0xb08] ss:$16 sps:$4 sm:$0xff]  }
 0x252   :  { %6054 = vmatpush1.bf16.msra.mxu1 %v8447_v46  ;;  %6012 = vmatprep.subr.bf16.mxu0 %v8452_v47  ;;  %v8524_v46 = vld [vmem:[#allocation5 + $0xcec] ss:$16 sps:$4 sm:$0xff]  }
 0x253   :  { %6055 = vmatprep.subr.bf16.mxu1 %v8455_v51  ;;  %v8527_v47 = vld [vmem:[#allocation5 + $0xeec] ss:$16 sps:$4 sm:$0xff]   ;;  %v8522_v51 = vld [vmem:[#allocation5 + $0xce8] ss:$16 sps:$4 sm:$0xff]  }
 0x255   :  { %6013 = vmatpush1.bf16.msra.mxu0 %v8450_v53  ;;  %v8525_v53 = vld [vmem:[#allocation5 + $0xee8] ss:$16 sps:$4 sm:$0xff]  }
 0x256   :  { %6056 = vmatpush1.bf16.msra.mxu1 %v8453_v58  ;;  %6014 = vmatprep.subr.bf16.mxu0 %v8458_v61  ;;  %v8530_v58 = vld [vmem:[#allocation5 + $0xccc] ss:$16 sps:$4 sm:$0xff]  }
 0x257   :  { %6057 = vmatprep.subr.bf16.mxu1 %v8461_v54  ;;  %v8533_v61 = vld [vmem:[#allocation5 + $0xecc] ss:$16 sps:$4 sm:$0xff]   ;;  %v8528_v54 = vld [vmem:[#allocation5 + $0xcc8] ss:$16 sps:$4 sm:$0xff]  }
 0x259   :  { %6015 = vmatpush1.bf16.msra.mxu0 %v8456_v56  ;;  %v8531_v56 = vld [vmem:[#allocation5 + $0xec8] ss:$16 sps:$4 sm:$0xff]  }
 0x25a   :  { %6058 = vmatpush1.bf16.msra.mxu1 %v8459_v57  ;;  %6016 = vmatprep.subr.bf16.mxu0 %v8464_v60  ;;  %v8536_v57 = vld [vmem:[#allocation5 + $0xcac] ss:$16 sps:$4 sm:$0xff]  }
 0x25b   :  { %6059 = vmatprep.subr.bf16.mxu1 %v8467_v62  ;;  %v8539_v60 = vld [vmem:[#allocation5 + $0xeac] ss:$16 sps:$4 sm:$0xff]   ;;  %v8534_v62 = vld [vmem:[#allocation5 + $0xca8] ss:$16 sps:$4 sm:$0xff]  }
 0x25d   :  { %6017 = vmatpush1.bf16.msra.mxu0 %v8462_v18  ;;  %v8537_v18 = vld [vmem:[#allocation5 + $0xea8] ss:$16 sps:$4 sm:$0xff]  }
 0x25e   :  { %6060 = vmatpush1.bf16.msra.mxu1 %v8465_v21  ;;  %6018 = vmatprep.subr.bf16.mxu0 %v8470_v52  ;;  %v8540_v21 = vld [vmem:[#allocation5 + $0xc88] ss:$16 sps:$4 sm:$0xff]  }
 0x25f   :  { %6061 = vmatprep.subr.bf16.mxu1 %v8473_v3  ;;  %v8543_v52 = vld [vmem:[#allocation5 + $0xe88] ss:$16 sps:$4 sm:$0xff]   ;;  %v8548_v3 = vld [vmem:[#allocation5 + $0xc6c] ss:$16 sps:$4 sm:$0xff]  }
 0x261   :  { %6019 = vmatpush1.bf16.msra.mxu0 %v8468_v9  ;;  %v8551_v9 = vld [vmem:[#allocation5 + $0xe6c] ss:$16 sps:$4 sm:$0xff]  }
 0x262   :  { %6062 = vmatpush1.bf16.msra.mxu1 %v8471_v10  ;;  %6020 = vmatprep.subr.bf16.mxu0 %v8476_v11  ;;  %v8554_v10 = vld [vmem:[#allocation5 + $0xc4c] ss:$16 sps:$4 sm:$0xff]  }
 0x263   :  { %6063 = vmatprep.subr.bf16.mxu1 %v8479_v14  ;;  %v8557_v11 = vld [vmem:[#allocation5 + $0xe4c] ss:$16 sps:$4 sm:$0xff]   ;;  %v8552_v14 = vld [vmem:[#allocation5 + $0xc48] ss:$16 sps:$4 sm:$0xff]  }
 0x265   :  { %6021 = vmatpush2.bf16.msra.mxu0 %v8474_v17  ;;  %v8555_v17 = vld [vmem:[#allocation5 + $0xe48] ss:$16 sps:$4 sm:$0xff]  }
 0x266   :  { %6064 = vmatpush2.bf16.msra.mxu1 %v8477_v19  ;;  %6022 = vmatprep.subr.bf16.mxu0 %v8482_v26  ;;  %v8560_v19 = vld [vmem:[#allocation5 + $0xc2c] ss:$16 sps:$4 sm:$0xff]  }
 0x267   :  { %6065 = vmatprep.subr.bf16.mxu1 %v8485_v27  ;;  %v8563_v26 = vld [vmem:[#allocation5 + $0xe2c] ss:$16 sps:$4 sm:$0xff]   ;;  %v8558_v27 = vld [vmem:[#allocation5 + $0xc28] ss:$16 sps:$4 sm:$0xff]  }
 0x269   :  { %6023 = vmatpush2.bf16.msra.mxu0 %v8480_v28  ;;  %v8561_v28 = vld [vmem:[#allocation5 + $0xe28] ss:$16 sps:$4 sm:$0xff]  }
 0x26a   :  { %6066 = vmatpush2.bf16.msra.mxu1 %v8483_v29  ;;  %6024 = vmatprep.subr.bf16.mxu0 %v8488_v30  ;;  %v8566_v29 = vld [vmem:[#allocation5 + $0xc0c] ss:$16 sps:$4 sm:$0xff]  }
 0x26b   :  { %6067 = vmatprep.subr.bf16.mxu1 %v8491_v31  ;;  %v8569_v30 = vld [vmem:[#allocation5 + $0xe0c] ss:$16 sps:$4 sm:$0xff]   ;;  %v8564_v31 = vld [vmem:[#allocation5 + $0xc08] ss:$16 sps:$4 sm:$0xff]  }
 0x26d   :  { %6025 = vmatpush2.bf16.msra.mxu0 %v8486_v55  ;;  %v8567_v55 = vld [vmem:[#allocation5 + $0xe08] ss:$16 sps:$4 sm:$0xff]  }
 0x26e   :  { %6068 = vmatpush2.bf16.msra.mxu1 %v8489_v34  ;;  %6026 = vmatprep.subr.bf16.mxu0 %v8494_v32  ;;  %v8572_v34 = vld [vmem:[#allocation5 + $0xdec] ss:$16 sps:$4 sm:$0xff]  }
 0x26f   :  { %6069 = vmatprep.subr.bf16.mxu1 %v8497_v35  ;;  %v8575_v32 = vld [vmem:[#allocation5 + $0xfec] ss:$16 sps:$4 sm:$0xff]   ;;  %v8570_v35 = vld [vmem:[#allocation5 + $0xde8] ss:$16 sps:$4 sm:$0xff]  }
 0x271   :  { %6027 = vmatpush2.bf16.msra.mxu0 %v8492_v38  ;;  %v8573_v38 = vld [vmem:[#allocation5 + $0xfe8] ss:$16 sps:$4 sm:$0xff]  }
 0x272   :  { %6070 = vmatpush2.bf16.msra.mxu1 %v8495_v59  ;;  %6028 = vmatprep.subr.bf16.mxu0 %v8500_v63  ;;  %v8578_v59 = vld [vmem:[#allocation5 + $0xdcc] ss:$16 sps:$4 sm:$0xff]  }
 0x273   :  { %6071 = vmatprep.subr.bf16.mxu1 %v8503_v36  ;;  %v8581_v63 = vld [vmem:[#allocation5 + $0xfcc] ss:$16 sps:$4 sm:$0xff]   ;;  %v8576_v36 = vld [vmem:[#allocation5 + $0xdc8] ss:$16 sps:$4 sm:$0xff]  }
 0x275   :  { %6029 = vmatpush2.bf16.msra.mxu0 %v8498_v39  ;;  %v8579_v39 = vld [vmem:[#allocation5 + $0xfc8] ss:$16 sps:$4 sm:$0xff]  }
 0x276   :  { %6072 = vmatpush2.bf16.msra.mxu1 %v8501_v0  ;;  %6030 = vmatprep.subr.bf16.mxu0 %v8506_v37  ;;  %v8584_v0 = vld [vmem:[#allocation5 + $0xdac] ss:$16 sps:$4 sm:$0xff]  }
 0x277   :  { %6073 = vmatprep.subr.bf16.mxu1 %v8509_v49  ;;  %v8587_v37 = vld [vmem:[#allocation5 + $0xfac] ss:$16 sps:$4 sm:$0xff]   ;;  %v8582_v49 = vld [vmem:[#allocation5 + $0xda8] ss:$16 sps:$4 sm:$0xff]  }
 0x279   :  { %6031 = vmatpush2.bf16.msra.mxu0 %v8504_v50  ;;  %v8585_v50 = vld [vmem:[#allocation5 + $0xfa8] ss:$16 sps:$4 sm:$0xff]  }
 0x27a   :  { %6074 = vmatpush2.bf16.msra.mxu1 %v8507_v40  ;;  %6032 = vmatprep.subr.bf16.mxu0 %v8512_v45  ;;  %v8590_v40 = vld [vmem:[#allocation5 + $0xd8c] ss:$16 sps:$4 sm:$0xff]  }
 0x27b   :  { %6075 = vmatprep.subr.bf16.mxu1 %v8515_v4  ;;  %v8593_v45 = vld [vmem:[#allocation5 + $0xf8c] ss:$16 sps:$4 sm:$0xff]   ;;  %v8588_v4 = vld [vmem:[#allocation5 + $0xd88] ss:$16 sps:$4 sm:$0xff]  }
 0x27d   :  { %6033 = vmatpush2.bf16.msra.mxu0 %v8510_v12  ;;  %v8591_v12 = vld [vmem:[#allocation5 + $0xf88] ss:$16 sps:$4 sm:$0xff]  }
 0x27e   :  { %6076 = vmatpush2.bf16.msra.mxu1 %v8513_v13  ;;  %6034 = vmatprep.subr.bf16.mxu0 %v8518_v15  ;;  %v8596_v13 = vld [vmem:[#allocation5 + $0xd6c] ss:$16 sps:$4 sm:$0xff]  }
 0x27f   :  { %6077 = vmatprep.subr.bf16.mxu1 %v8521_v22  ;;  %v8599_v15 = vld [vmem:[#allocation5 + $0xf6c] ss:$16 sps:$4 sm:$0xff]   ;;  %v8594_v22 = vld [vmem:[#allocation5 + $0xd68] ss:$16 sps:$4 sm:$0xff]  }
 0x281   :  { %6035 = vmatpush2.bf16.msra.mxu0 %v8516_v6  ;;  %v8597_v6 = vld [vmem:[#allocation5 + $0xf68] ss:$16 sps:$4 sm:$0xff]  }
 0x282   :  { %6078 = vmatpush2.bf16.msra.mxu1 %v8519_v7  ;;  %6090 = vmatprep.subr.bf16.mxu0 %v8524_v46  ;;  %v8602_v7 = vld [vmem:[#allocation5 + $0xd4c] ss:$16 sps:$4 sm:$0xff]  }
 0x283   :  { %6133 = vmatprep.subr.bf16.mxu1 %v8527_v47  ;;  %v8605_v46 = vld [vmem:[#allocation5 + $0xf4c] ss:$16 sps:$4 sm:$0xff]   ;;  %v8600_v47 = vld [vmem:[#allocation5 + $0xd48] ss:$16 sps:$4 sm:$0xff]  }
 0x284   :  { %6037 = vmatmul.mubr.bf16.vlgmr.msra.gmra.mxu0 %v9153_v2  ;;  %v8542_v2 = vld [vmem:[#allocation5 + $0xc8c] ss:$16 sps:$4 sm:$0xff]  }
 0x285   :  { %6080 = vmatmul.mubr.bf16.vlgmr.msra.gmra.mxu1 %v9155_v43  ;;  %6091 = vmatpush1.bf16.msra.mxu0 %v8522_v51  ;;  %v8545_v43 = vld [vmem:[#allocation5 + $0xe8c] ss:$16 sps:$4 sm:$0xff]   ;;  %v8603_v51 = vld [vmem:[#allocation5 + $0xf48] ss:$16 sps:$4 sm:$0xff]  }
 0x286   :  { %6134 = vmatpush1.bf16.msra.mxu1 %v8525_v53  ;;  %6092 = vmatprep.subr.bf16.mxu0 %v8530_v58  ;;  %v8608_v53 = vld [vmem:[#allocation5 + $0xd2c] ss:$16 sps:$4 sm:$0xff]  }
 0x287   :  { %6135 = vmatprep.subr.bf16.mxu1 %v8533_v61  ;;  %6122 = vmatprep.mubr.bf16.mxu0 %v9189_v20  ;;  %v8546_v20 = vld [vmem:[#allocation5 + $0xc68] ss:$16 sps:$4 sm:$0xff]   ;;  %v8611_v58 = vld [vmem:[#allocation5 + $0xf2c] ss:$16 sps:$4 sm:$0xff]  }
 0x288   :  { %6165 = vmatprep.mubr.bf16.mxu1 %v9194_v25  ;;  %v8549_v25 = vld [vmem:[#allocation5 + $0xe68] ss:$16 sps:$4 sm:$0xff]  }
 0x289   :  { %6093 = vmatpush1.bf16.msra.mxu0 %v8528_v54  ;;  %v8606_v61 = vld [vmem:[#allocation5 + $0xd28] ss:$16 sps:$4 sm:$0xff]  }
 0x28a   :  { %6136 = vmatpush1.bf16.msra.mxu1 %v8531_v56  ;;  %6094 = vmatprep.subr.bf16.mxu0 %v8536_v57  ;;  %v8609_v54 = vld [vmem:[#allocation5 + $0xf28] ss:$16 sps:$4 sm:$0xff]   ;;  %v8614_v56 = vld [vmem:[#allocation5 + $0xd0c] ss:$16 sps:$4 sm:$0xff]  }
 0x28b   :  { %6137 = vmatprep.subr.bf16.mxu1 %v8539_v60  ;;  %v8617_v57 = vld [vmem:[#allocation5 + $0xf0c] ss:$16 sps:$4 sm:$0xff]   ;;  %v8612_v60 = vld [vmem:[#allocation5 + $0xd08] ss:$16 sps:$4 sm:$0xff]  }
 0x28d   :  { %6095 = vmatpush1.bf16.msra.mxu0 %v8534_v62  ;;  %v8615_v62 = vld [vmem:[#allocation5 + $0xf08] ss:$16 sps:$4 sm:$0xff]  }
 0x28e   :  { %6138 = vmatpush1.bf16.msra.mxu1 %v8537_v18  ;;  %6096 = vmatprep.subr.bf16.mxu0 %v8542_v2  ;;  %v8620_v18 = vld [vmem:[#allocation5 + $0x10ec] ss:$16 sps:$4 sm:$0xff]  }
 0x28f   :  { %6139 = vmatprep.subr.bf16.mxu1 %v8545_v43  ;;  %v8623_v2 = vld [vmem:[#allocation5 + $0x12ec] ss:$16 sps:$4 sm:$0xff]   ;;  %v8618_v43 = vld [vmem:[#allocation5 + $0x10e8] ss:$16 sps:$4 sm:$0xff]  }
 0x291   :  { %6097 = vmatpush1.bf16.msra.mxu0 %v8540_v21  ;;  %v8621_v21 = vld [vmem:[#allocation5 + $0x12e8] ss:$16 sps:$4 sm:$0xff]  }
 0x292   :  { %6140 = vmatpush1.bf16.msra.mxu1 %v8543_v52  ;;  %6098 = vmatprep.subr.bf16.mxu0 %v8548_v3  ;;  %v8626_v52 = vld [vmem:[#allocation5 + $0x10cc] ss:$16 sps:$4 sm:$0xff]  }
 0x293   :  { %6141 = vmatprep.subr.bf16.mxu1 %v8551_v9  ;;  %v8629_v3 = vld [vmem:[#allocation5 + $0x12cc] ss:$16 sps:$4 sm:$0xff]   ;;  %v8624_v9 = vld [vmem:[#allocation5 + $0x10c8] ss:$16 sps:$4 sm:$0xff]  }
 0x295   :  { %6099 = vmatpush1.bf16.msra.mxu0 %v8546_v20  ;;  %v8627_v20 = vld [vmem:[#allocation5 + $0x12c8] ss:$16 sps:$4 sm:$0xff]  }
 0x296   :  { %6142 = vmatpush1.bf16.msra.mxu1 %v8549_v25  ;;  %6100 = vmatprep.subr.bf16.mxu0 %v8554_v10  ;;  %v8632_v25 = vld [vmem:[#allocation5 + $0x10ac] ss:$16 sps:$4 sm:$0xff]  }
 0x297   :  { %6143 = vmatprep.subr.bf16.mxu1 %v8557_v11  ;;  %v8635_v10 = vld [vmem:[#allocation5 + $0x12ac] ss:$16 sps:$4 sm:$0xff]   ;;  %v8630_v11 = vld [vmem:[#allocation5 + $0x10a8] ss:$16 sps:$4 sm:$0xff]  }
 0x299   :  { %6101 = vmatpush1.bf16.msra.mxu0 %v8552_v14  ;;  %v8633_v14 = vld [vmem:[#allocation5 + $0x12a8] ss:$16 sps:$4 sm:$0xff]  }
 0x29a   :  { %6144 = vmatpush1.bf16.msra.mxu1 %v8555_v17  ;;  %6102 = vmatprep.subr.bf16.mxu0 %v8560_v19  ;;  %v8636_v17 = vld [vmem:[#allocation5 + $0x1088] ss:$16 sps:$4 sm:$0xff]  }
 0x29b   :  { %6145 = vmatprep.subr.bf16.mxu1 %v8563_v26  ;;  %v8639_v19 = vld [vmem:[#allocation5 + $0x1288] ss:$16 sps:$4 sm:$0xff]   ;;  %v8644_v26 = vld [vmem:[#allocation5 + $0x106c] ss:$16 sps:$4 sm:$0xff]  }
 0x29d   :  { %6103 = vmatpush1.bf16.msra.mxu0 %v8558_v27  ;;  %v8647_v27 = vld [vmem:[#allocation5 + $0x126c] ss:$16 sps:$4 sm:$0xff]  }
 0x29e   :  { %6146 = vmatpush1.bf16.msra.mxu1 %v8561_v28  ;;  %6104 = vmatprep.subr.bf16.mxu0 %v8566_v29  ;;  %v8650_v28 = vld [vmem:[#allocation5 + $0x104c] ss:$16 sps:$4 sm:$0xff]  }
 0x29f   :  { %6147 = vmatprep.subr.bf16.mxu1 %v8569_v30  ;;  %v8653_v29 = vld [vmem:[#allocation5 + $0x124c] ss:$16 sps:$4 sm:$0xff]   ;;  %v8648_v30 = vld [vmem:[#allocation5 + $0x1048] ss:$16 sps:$4 sm:$0xff]  }
 0x2a1   :  { %6105 = vmatpush1.bf16.msra.mxu0 %v8564_v31  ;;  %v8651_v31 = vld [vmem:[#allocation5 + $0x1248] ss:$16 sps:$4 sm:$0xff]  }
 0x2a2   :  { %6148 = vmatpush1.bf16.msra.mxu1 %v8567_v55  ;;  %6106 = vmatprep.subr.bf16.mxu0 %v8572_v34  ;;  %v8656_v55 = vld [vmem:[#allocation5 + $0x102c] ss:$16 sps:$4 sm:$0xff]  }
 0x2a3   :  { %6149 = vmatprep.subr.bf16.mxu1 %v8575_v32  ;;  %v8659_v34 = vld [vmem:[#allocation5 + $0x122c] ss:$16 sps:$4 sm:$0xff]   ;;  %v8654_v32 = vld [vmem:[#allocation5 + $0x1028] ss:$16 sps:$4 sm:$0xff]  }
 0x2a5   :  { %6107 = vmatpush2.bf16.msra.mxu0 %v8570_v35  ;;  %v8657_v35 = vld [vmem:[#allocation5 + $0x1228] ss:$16 sps:$4 sm:$0xff]  }
 0x2a6   :  { %6150 = vmatpush2.bf16.msra.mxu1 %v8573_v38  ;;  %6108 = vmatprep.subr.bf16.mxu0 %v8578_v59  ;;  %v8662_v38 = vld [vmem:[#allocation5 + $0x100c] ss:$16 sps:$4 sm:$0xff]  }
 0x2a7   :  { %6151 = vmatprep.subr.bf16.mxu1 %v8581_v63  ;;  %v8665_v59 = vld [vmem:[#allocation5 + $0x120c] ss:$16 sps:$4 sm:$0xff]   ;;  %v8660_v63 = vld [vmem:[#allocation5 + $0x1008] ss:$16 sps:$4 sm:$0xff]  }
 0x2a9   :  { %6109 = vmatpush2.bf16.msra.mxu0 %v8576_v36  ;;  %v8663_v36 = vld [vmem:[#allocation5 + $0x1208] ss:$16 sps:$4 sm:$0xff]  }
 0x2aa   :  { %6152 = vmatpush2.bf16.msra.mxu1 %v8579_v39  ;;  %6110 = vmatprep.subr.bf16.mxu0 %v8584_v0  ;;  %v8668_v39 = vld [vmem:[#allocation5 + $0x11ec] ss:$16 sps:$4 sm:$0xff]  }
 0x2ab   :  { %6153 = vmatprep.subr.bf16.mxu1 %v8587_v37  ;;  %v8671_v0 = vld [vmem:[#allocation5 + $0x13ec] ss:$16 sps:$4 sm:$0xff]   ;;  %v8666_v37 = vld [vmem:[#allocation5 + $0x11e8] ss:$16 sps:$4 sm:$0xff]  }
 0x2ad   :  { %6111 = vmatpush2.bf16.msra.mxu0 %v8582_v49  ;;  %v8669_v49 = vld [vmem:[#allocation5 + $0x13e8] ss:$16 sps:$4 sm:$0xff]  }
 0x2ae   :  { %6154 = vmatpush2.bf16.msra.mxu1 %v8585_v50  ;;  %6112 = vmatprep.subr.bf16.mxu0 %v8590_v40  ;;  %v9333_v50 = vpop.f32.mrf.mxu0  ;;  %v8674_v40 = vld [vmem:[#allocation5 + $0x11cc] ss:$16 sps:$4 sm:$0xff]  }
 0x2af   :  { %6155 = vmatprep.subr.bf16.mxu1 %v8593_v45  ;;  %v8677_v45 = vld [vmem:[#allocation5 + $0x13cc] ss:$16 sps:$4 sm:$0xff]  }
 0x2b1   :  { %6113 = vmatpush2.bf16.msra.mxu0 %v8588_v4  ;;  %v8672_v4 = vld [vmem:[#allocation5 + $0x11c8] ss:$16 sps:$4 sm:$0xff]  }
 0x2b2   :  { %6156 = vmatpush2.bf16.msra.mxu1 %v8591_v12  ;;  %6114 = vmatprep.subr.bf16.mxu0 %v8596_v13  ;;  %v8675_v12 = vld [vmem:[#allocation5 + $0x13c8] ss:$16 sps:$4 sm:$0xff]   ;;  %v9335_v13 = vpop.f32.mrf.mxu0 }
 0x2b3   :  { %6157 = vmatprep.subr.bf16.mxu1 %v8599_v15  ;;  %v8680_v15 = vld [vmem:[#allocation5 + $0x11ac] ss:$16 sps:$4 sm:$0xff]  }
 0x2b5   :  { %6115 = vmatpush2.bf16.msra.mxu0 %v8594_v22  ;;  %v8683_v22 = vld [vmem:[#allocation5 + $0x13ac] ss:$16 sps:$4 sm:$0xff]  }
 0x2b6   :  { %6158 = vmatpush2.bf16.msra.mxu1 %v8597_v6  ;;  %6116 = vmatprep.subr.bf16.mxu0 %v8602_v7  ;;  %v9337_v6 = vpop.f32.mrf.mxu1  ;;  %v8678_v7 = vld [vmem:[#allocation5 + $0x11a8] ss:$16 sps:$4 sm:$0xff]  }
 0x2b7   :  { %6159 = vmatprep.subr.bf16.mxu1 %v8605_v46  ;;  %v8681_v46 = vld [vmem:[#allocation5 + $0x13a8] ss:$16 sps:$4 sm:$0xff]  }
 0x2b9   :  { %6117 = vmatpush2.bf16.msra.mxu0 %v8600_v47  ;;  %v9339_v47 = vpop.f32.mrf.mxu0 }
 0x2ba   :  { %6160 = vmatpush2.bf16.msra.mxu1 %v8603_v51  ;;  %6118 = vmatprep.subr.bf16.mxu0 %v8608_v53  ;;  %v8686_v51 = vld [vmem:[#allocation5 + $0x118c] ss:$16 sps:$4 sm:$0xff]  }
 0x2bb   :  { %6161 = vmatprep.subr.bf16.mxu1 %v8611_v58  ;;  %v8689_v53 = vld [vmem:[#allocation5 + $0x138c] ss:$16 sps:$4 sm:$0xff]   ;;  %v9341_v58 = vpop.f32.mrf.mxu1 }
 0x2bd   :  { %6119 = vmatpush2.bf16.msra.mxu0 %v8606_v61  ;;  %v8684_v61 = vld [vmem:[#allocation5 + $0x1188] ss:$16 sps:$4 sm:$0xff]  }
 0x2be   :  { %6162 = vmatpush2.bf16.msra.mxu1 %v8609_v54  ;;  %6120 = vmatprep.subr.bf16.mxu0 %v8614_v56  ;;  %v8687_v54 = vld [vmem:[#allocation5 + $0x1388] ss:$16 sps:$4 sm:$0xff]   ;;  %v9343_v56 = vpop.f32.mrf.mxu0 }
 0x2bf   :  { %6163 = vmatprep.subr.bf16.mxu1 %v8617_v57  ;;  %v8692_v57 = vld [vmem:[#allocation5 + $0x116c] ss:$16 sps:$4 sm:$0xff]  }
 0x2c1   :  { %6121 = vmatpush2.bf16.msra.mxu0 %v8612_v60  ;;  %v8695_v60 = vld [vmem:[#allocation5 + $0x136c] ss:$16 sps:$4 sm:$0xff]  }
 0x2c2   :  { %6164 = vmatpush2.bf16.msra.mxu1 %v8615_v62  ;;  %6176 = vmatprep.subr.bf16.mxu0 %v8620_v18  ;;  %v9345_v62 = vpop.f32.mrf.mxu1  ;;  %v9347_v18 = vpop.f32.mrf.mxu0 }
 0x2c3   :  { %6219 = vmatprep.subr.bf16.mxu1 %v8623_v2  ;;  %v8690_v2 = vld [vmem:[#allocation5 + $0x1168] ss:$16 sps:$4 sm:$0xff]  }
 0x2c4   :  { %6123 = vmatmul.mubr.bf16.vlgmr.msra.gmra.mxu0 %v9237_v5  ;;  %v8638_v5 = vld [vmem:[#allocation5 + $0x108c] ss:$16 sps:$4 sm:$0xff]  }
 0x2c5   :  { %6166 = vmatmul.mubr.bf16.vlgmr.msra.gmra.mxu1 %v9239_v8  ;;  %6177 = vmatpush1.bf16.msra.mxu0 %v8618_v43  ;;  %v8641_v8 = vld [vmem:[#allocation5 + $0x128c] ss:$16 sps:$4 sm:$0xff]   ;;  %v8693_v43 = vld [vmem:[#allocation5 + $0x1368] ss:$16 sps:$4 sm:$0xff]  }
 0x2c6   :  { %6220 = vmatpush1.bf16.msra.mxu1 %v8621_v21  ;;  %6178 = vmatprep.subr.bf16.mxu0 %v8626_v52  ;;  %v8698_v21 = vld [vmem:[#allocation5 + $0x114c] ss:$16 sps:$4 sm:$0xff]  }
 0x2c7   :  { %6221 = vmatprep.subr.bf16.mxu1 %v8629_v3  ;;  %6208 = vmatprep.mubr.bf16.mxu0 %v9241_v23  ;;  %v8642_v23 = vld [vmem:[#allocation5 + $0x1068] ss:$16 sps:$4 sm:$0xff]   ;;  %v8701_v52 = vld [vmem:[#allocation5 + $0x134c] ss:$16 sps:$4 sm:$0xff]   ;;  %v9349_v3 = vpop.f32.mrf.mxu1 }
 0x2c8   :  { %6251 = vmatprep.mubr.bf16.mxu1 %v9243_v24  ;;  %v8645_v24 = vld [vmem:[#allocation5 + $0x1268] ss:$16 sps:$4 sm:$0xff]  }
 0x2c9   :  { %6179 = vmatpush1.bf16.msra.mxu0 %v8624_v9  ;;  %v9351_v9 = vpop.f32.mrf.mxu0 }
 0x2ca   :  { %6222 = vmatpush1.bf16.msra.mxu1 %v8627_v20  ;;  %6180 = vmatprep.subr.bf16.mxu0 %v8632_v25  ;;  %v8696_v20 = vld [vmem:[#allocation5 + $0x1148] ss:$16 sps:$4 sm:$0xff]  }
 0x2cb   :  { %6223 = vmatprep.subr.bf16.mxu1 %v8635_v10  ;;  %v8699_v25 = vld [vmem:[#allocation5 + $0x1348] ss:$16 sps:$4 sm:$0xff]   ;;  %v9353_v10 = vpop.f32.mrf.mxu1 }
 0x2cd   :  { %6181 = vmatpush1.bf16.msra.mxu0 %v8630_v11  ;;  %v8704_v11 = vld [vmem:[#allocation5 + $0x112c] ss:$16 sps:$4 sm:$0xff]  }
 0x2ce   :  { %6224 = vmatpush1.bf16.msra.mxu1 %v8633_v14  ;;  %6182 = vmatprep.subr.bf16.mxu0 %v8638_v5  ;;  %v8707_v14 = vld [vmem:[#allocation5 + $0x132c] ss:$16 sps:$4 sm:$0xff]   ;;  %v9355_v5 = vpop.f32.mrf.mxu0 }
 0x2cf   :  { %6225 = vmatprep.subr.bf16.mxu1 %v8641_v8  ;;  %v8702_v8 = vld [vmem:[#allocation5 + $0x1128] ss:$16 sps:$4 sm:$0xff]  }
 0x2d1   :  { %6183 = vmatpush1.bf16.msra.mxu0 %v8636_v17  ;;  %v8705_v17 = vld [vmem:[#allocation5 + $0x1328] ss:$16 sps:$4 sm:$0xff]  }
 0x2d2   :  { %6226 = vmatpush1.bf16.msra.mxu1 %v8639_v19  ;;  %6184 = vmatprep.subr.bf16.mxu0 %v8644_v26  ;;  %v9357_v19 = vpop.f32.mrf.mxu1  ;;  %v8710_v26 = vld [vmem:[#allocation5 + $0x110c] ss:$16 sps:$4 sm:$0xff]  }
 0x2d3   :  { %6227 = vmatprep.subr.bf16.mxu1 %v8647_v27  ;;  %v8713_v27 = vld [vmem:[#allocation5 + $0x130c] ss:$16 sps:$4 sm:$0xff]  }
 0x2d5   :  { %6185 = vmatpush1.bf16.msra.mxu0 %v8642_v23  ;;  %v9359_v23 = vpop.f32.mrf.mxu0 }
 0x2d6   :  { %6228 = vmatpush1.bf16.msra.mxu1 %v8645_v24  ;;  %6186 = vmatprep.subr.bf16.mxu0 %v8650_v28  ;;  %v8708_v24 = vld [vmem:[#allocation5 + $0x1108] ss:$16 sps:$4 sm:$0xff]  }
 0x2d7   :  { %6229 = vmatprep.subr.bf16.mxu1 %v8653_v29  ;;  %v8711_v28 = vld [vmem:[#allocation5 + $0x1308] ss:$16 sps:$4 sm:$0xff]   ;;  %v9361_v29 = vpop.f32.mrf.mxu1 }
 0x2d9   :  { %6187 = vmatpush1.bf16.msra.mxu0 %v8648_v30  ;;  %v9363_v30 = vpop.f32.mrf.mxu0 }
 0x2da   :  { %6230 = vmatpush1.bf16.msra.mxu1 %v8651_v31  ;;  %6188 = vmatprep.subr.bf16.mxu0 %v8656_v55  ;;  %v8716_v31 = vld [vmem:[#allocation5 + $0x14ec] ss:$16 sps:$4 sm:$0xff]  }
 0x2db   :  { %6231 = vmatprep.subr.bf16.mxu1 %v8659_v34  ;;  %v8719_v55 = vld [vmem:[#allocation5 + $0x16ec] ss:$16 sps:$4 sm:$0xff]   ;;  %v8714_v34 = vld [vmem:[#allocation5 + $0x14e8] ss:$16 sps:$4 sm:$0xff]  }
 0x2dd   :  { %6189 = vmatpush1.bf16.msra.mxu0 %v8654_v32  ;;  %v8717_v32 = vld [vmem:[#allocation5 + $0x16e8] ss:$16 sps:$4 sm:$0xff]  }
 0x2de   :  { %6232 = vmatpush1.bf16.msra.mxu1 %v8657_v35  ;;  %6190 = vmatprep.subr.bf16.mxu0 %v8662_v38  ;;  %v9365_v35 = vpop.f32.mrf.mxu1  ;;  %v9367_v38 = vpop.f32.mrf.mxu0 }
 0x2df   :  { %6233 = vmatprep.subr.bf16.mxu1 %v8665_v59  ;;  %v8722_v59 = vld [vmem:[#allocation5 + $0x14cc] ss:$16 sps:$4 sm:$0xff]  }
 0x2e1   :  { %6191 = vmatpush1.bf16.msra.mxu0 %v8660_v63  ;;  %v8725_v63 = vld [vmem:[#allocation5 + $0x16cc] ss:$16 sps:$4 sm:$0xff]  }
 0x2e2   :  { %6234 = vmatpush1.bf16.msra.mxu1 %v8663_v36  ;;  %6192 = vmatprep.subr.bf16.mxu0 %v8668_v39  ;;  %v9369_v36 = vpop.f32.mrf.mxu1  ;;  %v8720_v39 = vld [vmem:[#allocation5 + $0x14c8] ss:$16 sps:$4 sm:$0xff]  }
 0x2e3   :  { %6235 = vmatprep.subr.bf16.mxu1 %v8671_v0  ;;  %v8723_v0 = vld [vmem:[#allocation5 + $0x16c8] ss:$16 sps:$4 sm:$0xff]  }
 0x2e5   :  { %6193 = vmatpush2.bf16.msra.mxu0 %v8666_v37  ;;  %v9373_v37 = vpop.f32.mrf.mxu0 }
 0x2e6   :  { %6236 = vmatpush2.bf16.msra.mxu1 %v8669_v49  ;;  %6194 = vmatprep.subr.bf16.mxu0 %v8674_v40  ;;  %v8728_v49 = vld [vmem:[#allocation5 + $0x14ac] ss:$16 sps:$4 sm:$0xff]  }
 0x2e7   :  { %6237 = vmatprep.subr.bf16.mxu1 %v8677_v45  ;;  %v8731_v40 = vld [vmem:[#allocation5 + $0x16ac] ss:$16 sps:$4 sm:$0xff]   ;;  %v9377_v45 = vpop.f32.mrf.mxu1 }
 0x2e9   :  { %6195 = vmatpush2.bf16.msra.mxu0 %v8672_v4  ;;  %v9379_v4 = vpop.f32.mrf.mxu0 }
 0x2ea   :  { %6238 = vmatpush2.bf16.msra.mxu1 %v8675_v12  ;;  %6196 = vmatprep.subr.bf16.mxu0 %v8680_v15  ;;  %v8734_v12 = vld [vmem:[#allocation5 + $0x148c] ss:$16 sps:$4 sm:$0xff]  }
 0x2eb   :  { %6239 = vmatprep.subr.bf16.mxu1 %v8683_v22  ;;  %v8737_v15 = vld [vmem:[#allocation5 + $0x168c] ss:$16 sps:$4 sm:$0xff]   ;;  %v9381_v22 = vpop.f32.mrf.mxu1 }
 0x2ed   :  { %6197 = vmatpush2.bf16.msra.mxu0 %v8678_v7  ;;  %v9383_v7 = vpop.f32.mrf.mxu0 }
 0x2ee   :  { %6240 = vmatpush2.bf16.msra.mxu1 %v8681_v46  ;;  %6198 = vmatprep.subr.bf16.mxu0 %v8686_v51  ;;  %v8740_v46 = vld [vmem:[#allocation5 + $0x146c] ss:$16 sps:$4 sm:$0xff]  }
 0x2ef   :  { %6241 = vmatprep.subr.bf16.mxu1 %v8689_v53  ;;  %v8743_v51 = vld [vmem:[#allocation5 + $0x166c] ss:$16 sps:$4 sm:$0xff]   ;;  %v9385_v53 = vpop.f32.mrf.mxu1 }
 0x2f1   :  { %6199 = vmatpush2.bf16.msra.mxu0 %v8684_v61  ;;  %v9387_v61 = vpop.f32.mrf.mxu0 }
 0x2f2   :  { %6242 = vmatpush2.bf16.msra.mxu1 %v8687_v54  ;;  %6200 = vmatprep.subr.bf16.mxu0 %v8692_v57  ;;  %v8738_v54 = vld [vmem:[#allocation5 + $0x1468] ss:$16 sps:$4 sm:$0xff]  }
 0x2f3   :  { %6243 = vmatprep.subr.bf16.mxu1 %v8695_v60  ;;  %v8741_v57 = vld [vmem:[#allocation5 + $0x1668] ss:$16 sps:$4 sm:$0xff]   ;;  %v9389_v60 = vpop.f32.mrf.mxu1 }
 0x2f5   :  { %6201 = vmatpush2.bf16.msra.mxu0 %v8690_v2  ;;  %v8746_v2 = vld [vmem:[#allocation5 + $0x144c] ss:$16 sps:$4 sm:$0xff]  }
 0x2f6   :  { %6244 = vmatpush2.bf16.msra.mxu1 %v8693_v43  ;;  %6202 = vmatprep.subr.bf16.mxu0 %v8698_v21  ;;  %v8749_v43 = vld [vmem:[#allocation5 + $0x164c] ss:$16 sps:$4 sm:$0xff]   ;;  %v1462_v21 = vsub.s32 1, %v9030_v48 }
 0x2f7   :  { %6245 = vmatprep.subr.bf16.mxu1 %v8701_v52  ;;  %v9392_v52 = vld [vmem:[#allocation7] sm:$0xf] }
 0x2f9   :  { %6203 = vmatpush2.bf16.msra.mxu0 %v8696_v20  ;;  %v9394_v20 = vpop.f32.mrf.mxu0 }
 0x2fa   :  { %6246 = vmatpush2.bf16.msra.mxu1 %v8699_v25  ;;  %6204 = vmatprep.subr.bf16.mxu0 %v8704_v11  ;;  %v8744_v25 = vld [vmem:[#allocation5 + $0x1448] ss:$16 sps:$4 sm:$0xff]  }
 0x2fb   :  { %6247 = vmatprep.subr.bf16.mxu1 %v8707_v14  ;;  %v8747_v11 = vld [vmem:[#allocation5 + $0x1648] ss:$16 sps:$4 sm:$0xff]   ;;  %v9396_v14 = vpop.f32.mrf.mxu1 }
 0x2fd   :  { %6205 = vmatpush2.bf16.msra.mxu0 %v8702_v8  ;;  %v8752_v8 = vld [vmem:[#allocation5 + $0x142c] ss:$16 sps:$4 sm:$0xff]  }
 0x2fe   :  { %6248 = vmatpush2.bf16.msra.mxu1 %v8705_v17  ;;  %6206 = vmatprep.subr.bf16.mxu0 %v8710_v26  ;;  %v8755_v17 = vld [vmem:[#allocation5 + $0x162c] ss:$16 sps:$4 sm:$0xff]   ;;  %v1463_v26 = vrot.slane %v9392_v52, %v1462_v21 }
 0x2ff   :  { %6249 = vmatprep.subr.bf16.mxu1 %v8713_v27  ;;  %v9399_v27 = vpop.f32.mrf.mxu0 }
 0x301   :  { %6207 = vmatpush2.bf16.msra.mxu0 %v8708_v24  ;;  %v5357_v24 = vadd.f32 %v9343_v56, %v1463_v26  ;;  %v8759_v56 = vld [vmem:[#allocation5 + $0x1608] ss:$16 sps:$4 sm:$0xff]  }
 0x302   :  { %6250 = vmatpush2.bf16.msra.mxu1 %v8711_v28  ;;  %6262 = vmatprep.subr.bf16.mxu0 %v8716_v31  ;;  %v8750_v28 = vld [vmem:[#allocation5 + $0x1428] ss:$16 sps:$4 sm:$0xff]  }
 0x303   :  { %6305 = vmatprep.subr.bf16.mxu1 %v8719_v55  ;;  %v8753_v31 = vld [vmem:[#allocation5 + $0x1628] ss:$16 sps:$4 sm:$0xff]   ;;  %v9402_v55 = vpop.f32.mrf.mxu1 }
 0x304   :  { %6209 = vmatmul.mubr.bf16.vlgmr.msra.gmra.mxu0 %v9289_v1  ;;  %v8726_v1 = vld [vmem:[#allocation5 + $0x14a8] ss:$16 sps:$4 sm:$0xff]  }
 0x305   :  { %6252 = vmatmul.mubr.bf16.vlgmr.msra.gmra.mxu1 %v9291_v33  ;;  %6263 = vmatpush1.bf16.msra.mxu0 %v8714_v34  ;;  %v8729_v33 = vld [vmem:[#allocation5 + $0x16a8] ss:$16 sps:$4 sm:$0xff]   ;;  %v9404_v34 = vpop.f32.mrf.mxu0 }
 0x306   :  { %6306 = vmatpush1.bf16.msra.mxu1 %v8717_v32  ;;  %6264 = vmatprep.subr.bf16.mxu0 %v8722_v59  ;;  %v8758_v32 = vld [vmem:[#allocation5 + $0x140c] ss:$16 sps:$4 sm:$0xff]  }
 0x307   :  { %6307 = vmatprep.subr.bf16.mxu1 %v8725_v63  ;;  %6294 = vmatprep.mubr.bf16.mxu0 %v9293_v41  ;;  %v8732_v41 = vld [vmem:[#allocation5 + $0x1488] ss:$16 sps:$4 sm:$0xff]   ;;  %v8761_v59 = vld [vmem:[#allocation5 + $0x160c] ss:$16 sps:$4 sm:$0xff]   ;;  %v5353_v63 = vadd.f32 %v9335_v13, %v1463_v26 }
 0x308   :  { %6337 = vmatprep.mubr.bf16.mxu1 %v9295_v42  ;;  %v8735_v42 = vld [vmem:[#allocation5 + $0x1688] ss:$16 sps:$4 sm:$0xff]  }
 0x309   :  { %6265 = vmatpush1.bf16.msra.mxu0 %v8720_v39  ;;  %v5400_v39 = vadd.f32 %v9349_v3, %v5357_v24  ;;  %v8762_v3 = vld [vmem:[#allocation5 + $0x15e8] ss:$16 sps:$4 sm:$0xff]   ;;  %v8782_v24 = vld [vmem:[#allocation5 + $0x158c] ss:$16 sps:$4 sm:$0xff]  }
 0x30a   :  { %6308 = vmatpush1.bf16.msra.mxu1 %v8723_v0  ;;  %6266 = vmatprep.subr.bf16.mxu0 %v8728_v49  ;;  %v8756_v0 = vld [vmem:[#allocation5 + $0x1408] ss:$16 sps:$4 sm:$0xff]   ;;  %v5657_v49 = vpop.f32.mrf.mxu1 }
 0x30b   :  { %6309 = vmatprep.subr.bf16.mxu1 %v8731_v40  ;;  %v9408_v40 = vpop.f32.mrf.mxu0 }
 0x30d   :  { %6267 = vmatpush1.bf16.msra.mxu0 %v8726_v1  ;;  %v8764_v1 = vld [vmem:[#allocation5 + $0x15ec] ss:$16 sps:$4 sm:$0xff]  }
 0x30e   :  { %6310 = vmatpush1.bf16.msra.mxu1 %v8729_v33  ;;  %6268 = vmatprep.subr.bf16.mxu0 %v8734_v12  ;;  %v8767_v33 = vld [vmem:[#allocation5 + $0x17ec] ss:$16 sps:$4 sm:$0xff]   ;;  %v5396_v12 = vadd.f32 %v9341_v58, %v5353_v63 }
 0x30f   :  { %6311 = vmatprep.subr.bf16.mxu1 %v8737_v15  ;;  %v5443_v15 = vadd.f32 %v9359_v23, %v5400_v39  ;;  %v8780_v39 = vld [vmem:[#allocation5 + $0x1588] ss:$16 sps:$4 sm:$0xff]  }
 0x310   :  { %v5439_v13 = vadd.f32 %v9351_v9, %v5396_v12  ;;  %v8768_v9 = vld [vmem:[#allocation5 + $0x15c8] ss:$16 sps:$4 sm:$0xff]  }
 0x311   :  { %6269 = vmatpush1.bf16.msra.mxu0 %v8732_v41  ;;  %v9412_v41 = vpop.f32.mrf.mxu1 }
 0x312   :  { %6312 = vmatpush1.bf16.msra.mxu1 %v8735_v42  ;;  %6270 = vmatprep.subr.bf16.mxu0 %v8740_v46  ;;  %v8765_v42 = vld [vmem:[#allocation5 + $0x17e8] ss:$16 sps:$4 sm:$0xff]   ;;  %v9415_v46 = vpop.f32.mrf.mxu0  ;;  %v5482_v58 = vadd.f32 %v9357_v19, %v5439_v13  ;;  %v1458_v13 = vsub.s32 0, %v9030_v48 }
 0x313   :  { %6313 = vmatprep.subr.bf16.mxu1 %v8743_v51  ;;  %v8770_v51 = vld [vmem:[#allocation5 + $0x15cc] ss:$16 sps:$4 sm:$0xff]   ;;  %v8774_v19 = vld [vmem:[#allocation5 + $0x15a8] ss:$16 sps:$4 sm:$0xff]  }
 0x314   :  { %v5700_v21 = vpop.f32.mrf.mxu0 }
 0x315   :  { %6271 = vmatpush1.bf16.msra.mxu0 %v8738_v54  ;;  %v8773_v54 = vld [vmem:[#allocation5 + $0x17cc] ss:$16 sps:$4 sm:$0xff]  }
 0x316   :  { %6314 = vmatpush1.bf16.msra.mxu1 %v8741_v57  ;;  %6272 = vmatprep.subr.bf16.mxu0 %v8746_v2  ;;  %v5486_v57 = vadd.f32 %v9365_v35, %v5443_v15  ;;  %v9418_v2 = vpop.f32.mrf.mxu1  ;;  %v9425_v35 = vpop.f32.mrf.mxu0  ;;  %v8786_v15 = vld [vmem:[#allocation5 + $0x1568] ss:$16 sps:$4 sm:$0xff]  }
 0x317   :  { %6315 = vmatprep.subr.bf16.mxu1 %v8749_v43  ;;  %v8771_v43 = vld [vmem:[#allocation5 + $0x17c8] ss:$16 sps:$4 sm:$0xff]  }
 0x318   :  { %v5529_v23 = vadd.f32 %v9379_v4, %v5486_v57  ;;  %v8777_v4 = vld [vmem:[#allocation5 + $0x17a8] ss:$16 sps:$4 sm:$0xff]  }
 0x319   :  { %6273 = vmatpush1.bf16.msra.mxu0 %v8744_v25  ;;  %v8776_v25 = vld [vmem:[#allocation5 + $0x15ac] ss:$16 sps:$4 sm:$0xff]  }
 0x31a   :  { %6316 = vmatpush1.bf16.msra.mxu1 %v8747_v11  ;;  %6274 = vmatprep.subr.bf16.mxu0 %v8752_v8  ;;  %v8779_v11 = vld [vmem:[#allocation5 + $0x17ac] ss:$16 sps:$4 sm:$0xff]   ;;  %v5525_v8 = vadd.f32 %v9367_v38, %v5482_v58  ;;  %v5572_v26 = vadd.f32 %v9385_v53, %v5529_v23  ;;  %v5782_v38 = vpop.f32.mrf.mxu0  ;;  %v8783_v53 = vld [vmem:[#allocation5 + $0x1788] ss:$16 sps:$4 sm:$0xff]   ;;  %v1459_v23 = vrot.slane %v9392_v52, %v1458_v13 }
 0x31b   :  { %6317 = vmatprep.subr.bf16.mxu1 %v8755_v17  ;;  %v9423_v17 = vpop.f32.mrf.mxu1  ;;  %v8792_v58 = vld [vmem:[#allocation5 + $0x1548] ss:$16 sps:$4 sm:$0xff]   ;;  %v8815_v13 = vld [vmem:[#allocation8 + $0x28] sm:$0xff]  }
 0x31c   :  { %v9433_v12 = vpop.f32.mrf.mxu0 }
 0x31d   :  { %6275 = vmatpush1.bf16.msra.mxu0 %v8750_v28  ;;  %v8785_v28 = vld [vmem:[#allocation5 + $0x178c] ss:$16 sps:$4 sm:$0xff]  }
 0x31e   :  { %6318 = vmatpush1.bf16.msra.mxu1 %v8753_v31  ;;  %6276 = vmatprep.subr.bf16.mxu0 %v8758_v32  ;;  %v5568_v31 = vadd.f32 %v9377_v45, %v5525_v8  ;;  %v5615_v32 = vadd.f32 %v9399_v27, %v5572_v26  ;;  %v5786_v57 = vpop.f32.mrf.mxu0  ;;  %v5355_v8 = vadd.f32 %v9339_v47, %v1459_v23  ;;  %v8798_v26 = vld [vmem:[#allocation5 + $0x1528] ss:$16 sps:$4 sm:$0xff]  }
 0x31f   :  { %6319 = vmatprep.subr.bf16.mxu1 %v8761_v59  ;;  %v5743_v59 = vpop.f32.mrf.mxu1  ;;  %v8807_v47 = vld [vmem:[#allocation5 + $0x1708] ss:$16 sps:$4 sm:$0xff]  }
 0x320   :  { %v5611_v63 = vadd.f32 %v9387_v61, %v5568_v31  ;;  %v8789_v61 = vld [vmem:[#allocation5 + $0x1768] ss:$16 sps:$4 sm:$0xff]   ;;  %v8809_v31 = vld [vmem:[#allocation5 + $0x170c] ss:$16 sps:$4 sm:$0xff]  }
 0x321   :  { %6277 = vmatpush1.bf16.msra.mxu0 %v8756_v0  ;;  %v9431_v0 = vpop.f32.mrf.mxu1 }
 0x322   :  { %6320 = vmatpush1.bf16.msra.mxu1 %v8759_v56  ;;  %6278 = vmatprep.subr.bf16.mxu0 %v8764_v1  ;;  %v8788_v56 = vld [vmem:[#allocation5 + $0x156c] ss:$16 sps:$4 sm:$0xff]   ;;  %v5654_v45 = vadd.f32 %v9396_v14, %v5611_v63  ;;  %v8795_v14 = vld [vmem:[#allocation5 + $0x1748] ss:$16 sps:$4 sm:$0xff]  }
 0x323   :  { %6321 = vmatprep.subr.bf16.mxu1 %v8767_v33  ;;  %v8791_v1 = vld [vmem:[#allocation5 + $0x176c] ss:$16 sps:$4 sm:$0xff]   ;;  %v5658_v33 = vadd.f32 %v5657_v49, %v5615_v32 }
 0x325   :  { %6279 = vmatpush2.bf16.msra.mxu0 %v8762_v3  ;;  %v5701_v27 = vadd.f32 %v5700_v21, %v5658_v33  ;;  %v5825_v3 = vpop.f32.mrf.mxu1  ;;  %v8803_v21 = vld [vmem:[#allocation5 + $0x172c] ss:$16 sps:$4 sm:$0xff]  }
 0x326   :  { %6322 = vmatpush2.bf16.msra.mxu1 %v8765_v42  ;;  %6280 = vmatprep.subr.bf16.mxu0 %v8770_v51  ;;  %v8794_v42 = vld [vmem:[#allocation5 + $0x154c] ss:$16 sps:$4 sm:$0xff]  }
 0x327   :  { %6323 = vmatprep.subr.bf16.mxu1 %v8773_v54  ;;  %v8797_v51 = vld [vmem:[#allocation5 + $0x174c] ss:$16 sps:$4 sm:$0xff]   ;;  %v5697_v54 = vadd.f32 %v9408_v40, %v5654_v45  ;;  %v5744_v49 = vadd.f32 %v5743_v59, %v5701_v27  ;;  %v5398_v59 = vadd.f32 %v9345_v62, %v5355_v8  ;;  %v8812_v45 = vld [vmem:[#allocation8 + $0x70] sm:$0xff]  }
 0x328   :  { %v8811_v33 = vld [vmem:[#allocation8 + $0x38] sm:$0xff]   ;;  %v8823_v8 = vld [vmem:[#allocation8 + $0x8] sm:$0xff]  }
 0x329   :  { %6281 = vmatpush2.bf16.msra.mxu0 %v8768_v9  ;;  %v9439_v9 = vpop.f32.mrf.mxu1 }
 0x32a   :  { %6324 = vmatpush2.bf16.msra.mxu1 %v8771_v43  ;;  %6282 = vmatprep.subr.bf16.mxu0 %v8776_v25  ;;  %v8800_v43 = vld [vmem:[#allocation5 + $0x152c] ss:$16 sps:$4 sm:$0xff]   ;;  %v5740_v25 = vadd.f32 %v9418_v2, %v5697_v54  ;;  %v8804_v2 = vld [vmem:[#allocation5 + $0x1508] ss:$16 sps:$4 sm:$0xff]  }
 0x32b   :  { %6325 = vmatprep.subr.bf16.mxu1 %v8779_v11  ;;  %v5787_v11 = vadd.f32 %v5786_v57, %v5744_v49  ;;  %v8828_v54 = vld [vmem:[#allocation8 + $0xf0] sm:$0xff]   ;;  %v8818_v57 = vld [vmem:[#allocation8 + $0x58] sm:$0xff]  }
 0x32c   :  { %v5783_v40 = vadd.f32 %v5782_v38, %v5740_v25  ;;  %v8819_v49 = vld [vmem:[#allocation8 + $0x18] sm:$0xff]   ;;  %v8822_v25 = vld [vmem:[#allocation8 + $0x48] sm:$0xff]  }
 0x32d   :  { %6283 = vmatpush2.bf16.msra.mxu0 %v8774_v19  ;;  %v8801_v19 = vld [vmem:[#allocation5 + $0x1728] ss:$16 sps:$4 sm:$0xff]  }
 0x32e   :  { %6326 = vmatpush2.bf16.msra.mxu1 %v8777_v4  ;;  %6284 = vmatprep.subr.bf16.mxu0 %v8782_v24  ;;  %v5351_v4 = vadd.f32 %v9333_v50, %v1459_v23  ;;  %v5829_v24 = vpop.f32.mrf.mxu1  ;;  %v5826_v63 = vadd.f32 %v5825_v3, %v5783_v40  ;;  %v8810_v50 = vld [vmem:[#allocation8 + $0x78] sm:$0xff]   ;;  %v8824_v40 = vld [vmem:[#allocation8 + $0x40] sm:$0xff]  }
 0x32f   :  { %6327 = vmatprep.subr.bf16.mxu1 %v8785_v28  ;;  %v8806_v28 = vld [vmem:[#allocation5 + $0x150c] ss:$16 sps:$4 sm:$0xff]   ;;  %v5830_v32 = vadd.f32 %v5829_v24, %v5787_v11 }
 0x330   :  { %v5394_v38 = vadd.f32 %v9337_v6, %v5351_v4  ;;  %v8835_v24 = vld [vmem:[#allocation8 + $0x98] sm:$0xff]  }
 0x331   :  { %6285 = vmatpush2.bf16.msra.mxu0 %v8780_v39  ;;  %v5441_v39 = vadd.f32 %v9355_v5, %v5398_v59  ;;  %v8841_v59 = vld [vmem:[#allocation8 + $0x80] sm:$0xff]  }
 0x332   :  { %6328 = vmatpush2.bf16.msra.mxu1 %v8783_v53  ;;  %6286 = vmatprep.subr.bf16.mxu0 %v8788_v56  ;;  %v6353_v53 = vmax.f32 %v5830_v32, 0.0  ;;  %v5437_v56 = vadd.f32 %v9347_v18, %v5394_v38  ;;  %v8813_v18 = vld [vmem:[#allocation8 + $0x30] sm:$0xff]   ;;  %v8839_v32 = vld [vmem:[#allocation8 + $0x88] sm:$0xff]  }
 0x333   :  { %6329 = vmatprep.subr.bf16.mxu1 %v8791_v1  ;;  %v6349_v1 = vmax.f32 %v5826_v63, 0.0  ;;  %v5484_v62 = vadd.f32 %v9361_v29, %v5441_v39  ;;  %v5866_v63 = vpop.f32.mrf.mxu0 }
 0x335   :  { %6287 = vmatpush2.bf16.msra.mxu0 %v8786_v15  ;;  %v6357_v27 = vpack.c.bf16 %v6353_v53, %v6349_v1  ;;  %v5480_v15 = vadd.f32 %v9353_v10, %v5437_v56  ;;  %v5527_v6 = vadd.f32 %v9373_v37, %v5484_v62  ;;  %v8816_v37 = vld [vmem:[#allocation8 + $0x60] sm:$0xff]  }
 0x336   :  { %6330 = vmatpush2.bf16.msra.mxu1 %v8789_v61  ;;  %6288 = vmatprep.subr.bf16.mxu0 %v8794_v42  ;;  %v8814_v61 = vld [vmem:[#allocation8 + $0x68] sm:$0xff]   ;;  %v8826_v42 = vld [vmem:[#allocation8 + $0xf8] sm:$0xff]  }
 0x337   :  { %6331 = vmatprep.subr.bf16.mxu1 %v8797_v51  ;;  %v5523_v5 = vadd.f32 %v9363_v30, %v5480_v15  ;;  %v5570_v29 = vadd.f32 %v9381_v22, %v5527_v6  ;;  %v8827_v51 = vld [vmem:[#allocation8 + $0xb8] sm:$0xff]  }
 0x339   :  { %6289 = vmatpush2.bf16.msra.mxu0 %v8792_v58  ;;  %v5566_v3 = vadd.f32 %v9369_v36, %v5523_v5  ;;  %v5613_v10 = vadd.f32 %v9394_v20, %v5570_v29  ;;  %v8829_v20 = vld [vmem:[#allocation8 + $0xb0] sm:$0xff]  }
 0x33a   :  { %6332 = vmatpush2.bf16.msra.mxu1 %v8795_v14  ;;  %6290 = vmatprep.subr.bf16.mxu0 %v8800_v43  ;;  %v8820_v14 = vld [vmem:[#allocation8 + $0x50] sm:$0xff]  }
 0x33b   :  { %6333 = vmatprep.subr.bf16.mxu1 %v8803_v21  ;;  %v5656_v30 = vadd.f32 %v9402_v55, %v5613_v10  ;;  %v8831_v55 = vld [vmem:[#allocation8 + $0xa8] sm:$0xff]   ;;  %v8821_v43 = vld [vmem:[#allocation8 + $0x10] sm:$0xff]   ;;  %v1466_v10 = vsub.s32 2, %v9030_v48 }
 0x33d   :  { %6291 = vmatpush2.bf16.msra.mxu0 %v8798_v26  ;;  %v5699_v36 = vadd.f32 %v9415_v46, %v5656_v30 }
 0x33e   :  { %6334 = vmatpush2.bf16.msra.mxu1 %v8801_v19  ;;  %6292 = vmatprep.subr.bf16.mxu0 %v8806_v28  ;;  %v8836_v28 = vld [vmem:[#allocation8 + $0xd0] sm:$0xff]  }
 0x33f   :  { %6335 = vmatprep.subr.bf16.mxu1 %v8809_v31  ;;  %v5742_v23 = vadd.f32 %v9423_v17, %v5699_v36  ;;  %v8837_v31 = vld [vmem:[#allocation8 + $0x90] sm:$0xff]  }
 0x341   :  { %6293 = vmatpush2.bf16.msra.mxu0 %v8804_v2  ;;  %v5785_v21 = vadd.f32 %v9433_v12, %v5742_v23  ;;  %v5909_v2 = vpop.f32.mrf.mxu1 }
 0x342   :  { %6336 = vmatpush2.bf16.msra.mxu1 %v8807_v47  ;;  %7527 = vmatprep.subr.bf16.mxu0 %v8810_v50  ;;  %v5868_v47 = vpop.f32.mrf.mxu0 }
 0x343   :  { %7549 = vmatprep.subr.bf16.mxu1 %v8826_v42  ;;  %v5828_v17 = vadd.f32 %v9439_v9, %v5785_v21  ;;  %v8838_v9 = vld [vmem:[#allocation8 + $0xc8] sm:$0xff]   ;;  %v5911_v38 = vpop.f32.mrf.mxu1  ;;  %v1467_v42 = vrot.slane %v9392_v52, %v1466_v10 }
 0x344   :  { %6295 = vmatmul.mubr.bf16.vlgmr.msra.gmra.mxu0 %v9309_v16  ;;  %v5609_v16 = vadd.f32 %v9383_v7, %v5566_v3  ;;  %v8830_v7 = vld [vmem:[#allocation8 + $0xe8] sm:$0xff]   ;;  %v5870_v39 = vpop.f32.mrf.mxu0  ;;  %v1470_v3 = vsub.s32 3, %v9030_v48 }
 0x345   :  { %6338 = vmatmul.mubr.bf16.vlgmr.msra.gmra.mxu1 %v9311_v44  ;;  %7528 = vmatpush3.bf16.msra.mxu0 %v8811_v33  ;;  %v8817_v44 = vld [vmem:[#allocation8 + $0x20] sm:$0xff]   ;;  %v6352_v19 = vmax.f32 %v5828_v17, 0.0  ;;  %v5913_v50 = vpop.f32.mrf.mxu1  ;;  %v5867_v36 = vadd.f32 %v5866_v63, %v1467_v42 }
 0x346   :  { %6655 = vmatprep.mubr.bf16.mxu0 %v6357_v27  ;;  %7529 = vmatprep.subr.bf16.mxu0 %v8812_v45  ;;  %v5652_v22 = vadd.f32 %v9389_v60, %v5609_v16  ;;  %v8832_v60 = vld [vmem:[#allocation8 + $0xe0] sm:$0xff]   ;;  %v5872_v53 = vpop.f32.mrf.mxu0 }
 0x347   :  { %7550 = vmatpush3.bf16.msra.mxu1 %v8827_v51  ;;  %v5915_v56 = vpop.f32.mrf.mxu1  ;;  %v5910_v23 = vadd.f32 %v5909_v2, %v5867_v36 }
 0x348   :  { %7551 = vmatprep.subr.bf16.mxu1 %v8828_v54  ;;  %v5695_v58 = vadd.f32 %v9404_v34, %v5652_v22  ;;  %v8833_v34 = vld [vmem:[#allocation8 + $0xa0] sm:$0xff]   ;;  %v5952_v1 = vpop.f32.mrf.mxu0 }
 0x349   :  { %7530 = vmatpush3.bf16.msra.mxu0 %v8813_v18  ;;  %v5995_v33 = vpop.f32.mrf.mxu1 }
 0x34a   :  { %7531 = vmatprep.subr.bf16.mxu0 %v8814_v61  ;;  %v5738_v46 = vadd.f32 %v9412_v41, %v5695_v58  ;;  %v8825_v41 = vld [vmem:[#allocation8] sm:$0xff]   ;;  %v5954_v62 = vpop.f32.mrf.mxu0 }
 0x34b   :  { %7552 = vmatpush3.bf16.msra.mxu1 %v8829_v20  ;;  %v5997_v45 = vpop.f32.mrf.mxu1  ;;  %v5871_v20 = vadd.f32 %v5870_v39, %v1467_v42 }
 0x34c   :  { %7553 = vmatprep.subr.bf16.mxu1 %v8830_v7  ;;  %v5781_v11 = vadd.f32 %v9425_v35, %v5738_v46  ;;  %v8834_v35 = vld [vmem:[#allocation8 + $0xd8] sm:$0xff]   ;;  %v5956_v27 = vpop.f32.mrf.mxu0 }
 0x34d   :  { %7532 = vmatpush3.bf16.msra.mxu0 %v8815_v13  ;;  %v5999_v15 = vpop.f32.mrf.mxu1 }
 0x34e   :  { %7533 = vmatprep.subr.bf16.mxu0 %v8816_v37  ;;  %v5824_v26 = vadd.f32 %v9431_v0, %v5781_v11  ;;  %v8840_v0 = vld [vmem:[#allocation8 + $0xc0] sm:$0xff]   ;;  %v5958_v6 = vpop.f32.mrf.mxu0 }
 0x34f   :  { %7554 = vmatpush3.bf16.msra.mxu1 %v8831_v55  ;;  %v6001_v18 = vpop.f32.mrf.mxu1  ;;  %v5914_v55 = vadd.f32 %v5913_v50, %v5871_v20 }
 0x350   :  { %7555 = vmatprep.subr.bf16.mxu1 %v8832_v60  ;;  %v6348_v12 = vmax.f32 %v5824_v26, 0.0  ;;  %v6038_v5 = vpop.f32.mrf.mxu0 }
 0x351   :  { %7534 = vmatpush3.bf16.msra.mxu0 %v8817_v44  ;;  %v6081_v61 = vpop.f32.mrf.mxu1  ;;  %v1471_v44 = vrot.slane %v9392_v52, %v1470_v3 }
 0x352   :  { %7535 = vmatprep.subr.bf16.mxu0 %v8818_v57  ;;  %v6356_v4 = vpack.c.bf16 %v6352_v19, %v6348_v12  ;;  %v6040_v29 = vpop.f32.mrf.mxu0 }
 0x353   :  { %7556 = vmatpush3.bf16.msra.mxu1 %v8833_v34  ;;  %v6083_v13 = vpop.f32.mrf.mxu1  ;;  %v5869_v22 = vadd.f32 %v5868_v47, %v1471_v44 }
 0x354   :  { %7557 = vmatprep.subr.bf16.mxu1 %v8834_v35  ;;  %v6042_v37 = vpop.f32.mrf.mxu0 }
 0x355   :  { %7536 = vmatpush3.bf16.msra.mxu0 %v8819_v49  ;;  %v6085_v16 = vpop.f32.mrf.mxu1  ;;  %v5912_v58 = vadd.f32 %v5911_v38, %v5869_v22 }
 0x356   :  { %7537 = vmatprep.subr.bf16.mxu0 %v8820_v14  ;;  %v6044_v51 = vpop.f32.mrf.mxu0  ;;  %v5873_v14 = vadd.f32 %v5872_v53, %v1471_v44 }
 0x357   :  { %7558 = vmatpush3.bf16.msra.mxu1 %v8835_v24  ;;  %v6087_v54 = vpop.f32.mrf.mxu1  ;;  %v5955_v48 = vadd.f32 %v5954_v62, %v5912_v58 }
 0x358   :  { %7559 = vmatprep.subr.bf16.mxu1 %v8836_v28  ;;  %v5916_v21 = vadd.f32 %v5915_v56, %v5873_v14 }
 0x359   :  { %7538 = vmatpush3.bf16.msra.mxu0 %v8821_v43  ;;  %v5953_v43 = vadd.f32 %v5952_v1, %v5910_v23  ;;  %v5998_v52 = vadd.f32 %v5997_v45, %v5955_v48 }
 0x35a   :  { %7539 = vmatprep.subr.bf16.mxu0 %v8822_v25  ;;  %v5957_v25 = vadd.f32 %v5956_v27, %v5914_v55  ;;  %v5959_v11 = vadd.f32 %v5958_v6, %v5916_v21 }
 0x35b   :  { %7560 = vmatpush3.bf16.msra.mxu1 %v8837_v31  ;;  %v5996_v34 = vadd.f32 %v5995_v33, %v5953_v43  ;;  %v6041_v26 = vadd.f32 %v6040_v29, %v5998_v52 }
 0x35c   :  { %7561 = vmatprep.subr.bf16.mxu1 %v8838_v9 }
 0x35d   :  { %7540 = vmatpush3.bf16.msra.mxu0 %v8823_v8  ;;  %v6084_v24 = vadd.f32 %v6083_v13, %v6041_v26 }
 0x35e   :  { %7541 = vmatprep.subr.bf16.mxu0 %v8824_v40  ;;  %v6000_v40 = vadd.f32 %v5999_v15, %v5957_v25 }
 0x35f   :  { %7562 = vmatpush3.bf16.msra.mxu1 %v8839_v32 }
 0x360   :  { %7563 = vmatprep.subr.bf16.mxu1 %v8840_v0  ;;  %v6043_v35 = vadd.f32 %v6042_v37, %v6000_v40 }
 0x361   :  { %7542 = vmatpush3.bf16.msra.mxu0 %v8825_v41  ;;  %v6039_v41 = vadd.f32 %v6038_v5, %v5996_v34 }
 0x362   :  { %v6086_v0 = vadd.f32 %v6085_v16, %v6043_v35 }
 0x363   :  { %7564 = vmatpush3.bf16.msra.mxu1 %v8841_v59  ;;  %v6082_v31 = vadd.f32 %v6081_v61, %v6039_v41 }
 0x364   :  { %6656 = vmatmul.mubr.bf16.vlgmr.msra.gmra.mxu0 %v6356_v4  ;;  %v6002_v4 = vadd.f32 %v6001_v18, %v5959_v11  ;;  %v7494_v11 = vld [vmem:[#allocation10] ss:$0 sm:$0xff] }
 0x366   :  { %v6045_v28 = vadd.f32 %v6044_v51, %v6002_v4 }
 0x368   :  { %v6088_v2 = vadd.f32 %v6087_v54, %v6045_v28 }
 0x384   :  { %v6124_v30 = vpop.f32.mrf.mxu0 }
 0x385   :  { %v6167_v57 = vpop.f32.mrf.mxu1  ;;  %v6125_v63 = vadd.f32 %v6124_v30, %v6082_v31 }
 0x386   :  { %v6126_v49 = vpop.f32.mrf.mxu0 }
 0x387   :  { %v6169_v7 = vpop.f32.mrf.mxu1  ;;  %v6127_v59 = vadd.f32 %v6126_v49, %v6084_v24  ;;  %v6168_v56 = vadd.f32 %v6167_v57, %v6125_v63 }
 0x388   :  { %v6128_v60 = vpop.f32.mrf.mxu0 }
 0x389   :  { %v6171_v46 = vpop.f32.mrf.mxu1  ;;  %v6129_v47 = vadd.f32 %v6128_v60, %v6086_v0  ;;  %v6170_v50 = vadd.f32 %v6169_v7, %v6127_v59 }
 0x38a   :  { %v6130_v8 = vpop.f32.mrf.mxu0 }
 0x38b   :  { %v6173_v17 = vpop.f32.mrf.mxu1  ;;  %v6131_v53 = vadd.f32 %v6130_v8, %v6088_v2  ;;  %v6172_v1 = vadd.f32 %v6171_v46, %v6129_v47 }
 0x38d   :  { %v6174_v15 = vadd.f32 %v6173_v17, %v6131_v53 }
 0x3c4   :  { %v6210_v19 = vpop.f32.mrf.mxu0 }
 0x3c5   :  { %v6253_v12 = vpop.f32.mrf.mxu1  ;;  %v6211_v62 = vadd.f32 %v6210_v19, %v6168_v56 }
 0x3c6   :  { %v6212_v9 = vpop.f32.mrf.mxu0 }
 0x3c7   :  { %v6255_v32 = vpop.f32.mrf.mxu1  ;;  %v6213_v33 = vadd.f32 %v6212_v9, %v6170_v50  ;;  %v6254_v13 = vadd.f32 %v6253_v12, %v6211_v62 }
 0x3c8   :  { %v6214_v38 = vpop.f32.mrf.mxu0 }
 0x3c9   :  { %v6257_v39 = vpop.f32.mrf.mxu1  ;;  %v6215_v6 = vadd.f32 %v6214_v38, %v6172_v1  ;;  %v6256_v61 = vadd.f32 %v6255_v32, %v6213_v33 }
 0x3ca   :  { %v6216_v45 = vpop.f32.mrf.mxu0 }
 0x3cb   :  { %v6259_v27 = vpop.f32.mrf.mxu1  ;;  %v6217_v29 = vadd.f32 %v6216_v45, %v6174_v15  ;;  %v6258_v37 = vadd.f32 %v6257_v39, %v6215_v6 }
 0x3cd   :  { %v6260_v54 = vadd.f32 %v6259_v27, %v6217_v29 }
 0x404   :  { %v6296_v18 = vpop.f32.mrf.mxu0 }
 0x405   :  { %v6339_v5 = vpop.f32.mrf.mxu1  ;;  %v6297_v44 = vadd.f32 %v6296_v18, %v6254_v13 }
 0x406   :  { %v6298_v3 = vpop.f32.mrf.mxu0 }
 0x407   :  { %v6341_v10 = vpop.f32.mrf.mxu1  ;;  %v6299_v16 = vadd.f32 %v6298_v3, %v6256_v61  ;;  %v6340_v49 = vadd.f32 %v6339_v5, %v6297_v44 }
 0x408   :  { %v6300_v42 = vpop.f32.mrf.mxu0 }
 0x409   :  { %v6343_v51 = vpop.f32.mrf.mxu1  ;;  %v6301_v30 = vadd.f32 %v6300_v42, %v6258_v37  ;;  %v6342_v22 = vadd.f32 %v6341_v10, %v6299_v16  ;;  %v6350_v48 = vmax.f32 %v6340_v49, 0.0 }
 0x40a   :  { %v6302_v57 = vpop.f32.mrf.mxu0 }
 0x40b   :  { %v6344_v36 = vadd.f32 %v6343_v51, %v6301_v30  ;;  %v6303_v20 = vadd.f32 %v6302_v57, %v6260_v54  ;;  %v6345_v7 = vpop.f32.mrf.mxu1  ;;  %v6351_v23 = vmax.f32 %v6342_v22, 0.0 }
 0x40d   :  { %v6346_v58 = vadd.f32 %v6345_v7, %v6303_v20  ;;  %v6354_v14 = vmax.f32 %v6344_v36, 0.0 }
 0x40f   :  { %v6355_v55 = vmax.f32 %v6346_v58, 0.0  ;;  %v6358_v60 = vpack.c.bf16 %v6354_v14, %v6350_v48 }
 0x411   :  { %v6359_v43 = vpack.c.bf16 %v6355_v55, %v6351_v23 }
 0x413   :  { %6696 = vmatprep.mubr.bf16.mxu1 %v6359_v43 }
 0x414   :  { %6697 = vmatmul.mubr.bf16.vlgmr.msra.gmra.mxu1 %v6358_v60 }
 0x424   :  { %v7543_v46 = vpop.f32.mrf.mxu0 }
 0x426   :  { %v7544_v21 = vpop.f32.mrf.mxu0 }
 0x427   :  { %v7545_v52 = vadd.f32 %v7544_v21, %v7543_v46 }
 0x428   :  { %v7546_v25 = vpop.f32.mrf.mxu0 }
 0x429   :  { %v6658_v40 = vadd.f32 %v7545_v52, %v7494_v11 }
 0x42a   :  { %v7547_v34 = vpop.f32.mrf.mxu0 }
 0x42b   :  { %v7548_v26 = vadd.f32 %v7547_v34, %v7546_v25 }
 0x42d   :  { %v6661_v35 = vadd.f32 %v7548_v26, %v7494_v11 }
 0x4d4   :  { %v7565_v8 = vpop.f32.mrf.mxu1 }
 0x4d6   :  { %v7566_v17 = vpop.f32.mrf.mxu1 }
 0x4d7   :  { %v7567_v41 = vadd.f32 %v7566_v17, %v7565_v8 }
 0x4d8   :  { %v7568_v19 = vpop.f32.mrf.mxu1 }
 0x4d9   :  { %v6699_v12 = vadd.f32 %v7567_v41, %v6658_v40 }
 0x4da   :  { %v7569_v4 = vpop.f32.mrf.mxu1 }
 0x4db   :  { %6705 = vst [vmem:[#allocation11] sm:$0xff] %v6699_v12  ;;  %v7570_v24 = vadd.f32 %v7569_v4, %v7568_v19 }
 0x4dd   :  { %v6702_v28 = vadd.f32 %v7570_v24, %v6661_v35 }
 0x4df   :  { %6706 = vst [vmem:[#allocation11 + $0x8] sm:$0xff] %v6702_v28 }
 0x4e0   :  { %6711 = vsyncadd [#allocation4], 224  ;;  %s8982_s2 = smov [#allocation11]  }
 0x4e1   :  { %s6712_s4 = sshll.u32 %s8982_s2, 4  ;;  %s6713_s4 = int_to_ptr.vmem [resolvable:$true] %s6712_s4 }
 0x4e2   :  { %s8942_s23 = scalar_lea.vmem %s6713_s4, 32  ;;  %s8946_s24 = scalar_lea.vmem %s6713_s4, 256 }
 0x4e3   :  { %p8943_p11 = scmp.ne.s32.totalorder %s6713_s4, %s8942_s23  ;;  %p8947_p12 = scmp.lt.s32.totalorder %s6713_s4, %s6713_s4 }
 0x4e4   :  { %p8948_p13 = scmp.lt.s32.totalorder %s8946_s24, %s8942_s23 }
 0x4e6   :  { %p8949_p0 = por %p8948_p13, %p8947_p12 }
 0x4e8   :  { %p8950_p1 = pnand %p8949_p0, %p8943_p11 }
 0x4ea   :  { %8953 = shalt.err (!%p8950_p1)
}
 0x4eb   :  { %s8983_s25 = smov 32   ;;  %s8984_s26 = smov 2  }
 0x4ec   :  { %6718 = dma.vmem_to_hbm [thread:$0]  %s6713_s4, 32, %s9480_s5, [#allocation4], %s8983_s25, %s8983_s25, %s8984_s26  }
 0x4ed   :  { %8968 = dma.done.wait [#allocation4], 256  }
 0x4ee   :  { %8969 = vsyncadd [#allocation4], 4294967040 }
 0x4ef   :  { %6722 = vsyncpa [#allocation3], 1 }
 0x4f0   :  { %6723 = vsyncpa [#allocation6], 1 }
 0x4f1   :  { %6724 = vsyncpa [#allocation9], 1 }
 0x4f2   :  { %6725 = vsyncpa [#allocation4], 1 }

</bundles_post_ra>
